<compile_context>
chip_gen: v7x
topology: tpu7x:2x2x1
jax: 0.10.0
libtpu: 0.0.40
codegen_flags: <defaults>
</compile_context>

<pallas_src>
import math
import functools

import jax
import jax.numpy as jnp
from jax import lax
from jax.experimental import pallas as pl
from jax.experimental.pallas import tpu as pltpu

_LN_EPS = 1e-5
_INV_SQRT2 = 1.0 / math.sqrt(2.0)


# ---------------------------------------------------------------------------
# BlockSpec helpers
# ---------------------------------------------------------------------------

def _full_spec(shape):
    """Whole-array block, constant across the batch grid (stays VMEM-resident)."""
    nd = len(shape)
    return pl.BlockSpec(shape, lambda b, _nd=nd: (0,) * _nd)


def _batch_spec(S, D):
    return pl.BlockSpec((1, S, D), lambda b: (b, 0, 0))


# ---------------------------------------------------------------------------
# Fully fused decoder kernel (one grid step == one batch element, all layers)
# ---------------------------------------------------------------------------

def _make_decoder_kernel(num_layers, num_heads):
    L, H = num_layers, num_heads

    def kernel(x_ref, mem_ref,
               wqkv, bqkv, wo, bo, g1, be1,
               wq_c, bq_c, wkv_c, bkv_c, wo_c, bo_c, g2, be2,
               w1, b1, w2, b2, g3, be3,
               gf, bfin, wout, bout,
               o_ref):
        x = x_ref[0]                                   # (S, E)  f32
        mem = mem_ref[0].astype(jnp.bfloat16)          # (Sm, E) bf16, cast once
        E = x.shape[-1]
        Dh = E // H
        scale = 1.0 / math.sqrt(Dh)

        def dense(a, w, b):
            # bf16 operands on the MXU, f32 accumulation.
            return (jnp.dot(a.astype(jnp.bfloat16), w,
                            preferred_element_type=jnp.float32) + b)

        def layer_norm(y, g, b):
            mu = jnp.mean(y, axis=-1, keepdims=True)
            var = jnp.mean(jnp.square(y - mu), axis=-1, keepdims=True)
            return (y - mu) * lax.rsqrt(var + _LN_EPS) * g + b

        def mha(q, k, v):
            # q already scaled by 1/sqrt(Dh).  Softmax stays f32.
            parts = []
            for h in range(H):                         # H static -> unrolled
                sl = slice(h * Dh, (h + 1) * Dh)
                qh = q[:, sl].astype(jnp.bfloat16)
                kh = k[:, sl].astype(jnp.bfloat16)
                vh = v[:, sl].astype(jnp.bfloat16)
                # q @ k^T without materializing a transpose.
                s = lax.dot_general(qh, kh, (((1,), (1,)), ((), ())),
                                    preferred_element_type=jnp.float32)
                m = jnp.max(s, axis=-1, keepdims=True)
                p = jnp.exp(s - m)
                inv = pl.reciprocal(jnp.sum(p, axis=-1, keepdims=True),
                                    approx=True)
                parts.append(jnp.dot((p * inv).astype(jnp.bfloat16), vh,
                                     preferred_element_type=jnp.float32))
            return jnp.concatenate(parts, axis=-1)     # (S, E)

        for l in range(L):                             # static layer loop
            # --- self-attention block (post-norm) ---
            qkv = dense(x, wqkv[l], bqkv[l])                         # (S, 3E)
            sa = mha(qkv[:, :E] * scale, qkv[:, E:2 * E], qkv[:, 2 * E:])
            x = layer_norm(x + dense(sa, wo[l], bo[l]), g1[l], be1[l])

            # --- cross-attention block ---
            q_c = dense(x, wq_c[l], bq_c[l])                         # (S, E)
            kv = dense(mem, wkv_c[l], bkv_c[l])                      # (Sm, 2E)
            ca = mha(q_c * scale, kv[:, :E], kv[:, E:])
            x = layer_norm(x + dense(ca, wo_c[l], bo_c[l]), g2[l], be2[l])

            # --- feed-forward block (exact erf GELU, matches F.gelu default) --
            hid = dense(x, w1[l], b1[l])                             # (S, 4E)
            hid = 0.5 * hid * (1.0 + lax.erf(hid * _INV_SQRT2))
            x = layer_norm(x + dense(hid, w2[l], b2[l]), g3[l], be3[l])

        # --- tail: final LayerNorm + output projection + tanh ---
        y = layer_norm(x, gf[...], bfin[...])
        out = dense(y, wout[...], bout[...])                         # (S, 3*p*p)
        o_ref[0] = jnp.tanh(out).astype(o_ref.dtype)

    return kernel


# ---------------------------------------------------------------------------
# Forward pass (single pallas_call)
# ---------------------------------------------------------------------------

def transformer_decoder_forward(encoded, memory, params, *, patch_size, num_heads):
    B, S, E = encoded.shape
    Sm = memory.shape[1]
    L = len(params["layers"])
    N = params["out_w"].shape[1]

    bf = lambda w: w.astype(jnp.bfloat16)      # halve weight HBM/VMEM traffic
    row = lambda v: v.reshape(1, -1)
    stk = lambda name, f: jnp.stack([f(lp[name]) for lp in params["layers"]])

    weights = [
        stk("self_wqkv", bf),  stk("self_bqkv", row),
        stk("self_wo", bf),    stk("self_bo", row),
        stk("ln1_g", row),     stk("ln1_b", row),
        stk("cross_wq", bf),   stk("cross_bq", row),
        stk("cross_wkv", bf),  stk("cross_bkv", row),
        stk("cross_wo", bf),   stk("cross_bo", row),
        stk("ln2_g", row),     stk("ln2_b", row),
        stk("w1", bf),         stk("b1", row),
        stk("w2", bf),         stk("b2", row),
        stk("ln3_g", row),     stk("ln3_b", row),
        row(params["norm_g"]), row(params["norm_b"]),
        bf(params["out_w"]),   row(params["out_b"]),
    ]
    in_specs = ([_batch_spec(S, E), _batch_spec(Sm, E)]
                + [_full_spec(w.shape) for w in weights])

    out = pl.pallas_call(
        _make_decoder_kernel(L, num_heads),
        grid=(B,),
        in_specs=in_specs,
        out_specs=pl.BlockSpec((1, S, N), lambda b: (b, 0, 0)),
        out_shape=jax.ShapeDtypeStruct((B, S, N), encoded.dtype),
        compiler_params=pltpu.CompilerParams(
            dimension_semantics=("parallel",),
            vmem_limit_bytes=32 * 1024 * 1024),
    )(encoded, memory, *weights)

    return out.reshape(B, S, 3, patch_size, patch_size)


# ---------------------------------------------------------------------------
# Deterministic parameter init (synthetic; mirrors module __init__ shapes,
# with QKV and cross-KV projections packed for single-matmul fusion)
# ---------------------------------------------------------------------------

def init_params(key, E, H, num_layers, mlp_ratio, patch_size):
    hidden = mlp_ratio * E
    out_dim = patch_size * patch_size * 3

    def dense(k, fan_in, fan_out):
        k1, k2 = jax.random.split(k)
        w = jax.random.normal(k1, (fan_in, fan_out), jnp.float32) * 0.02
        b = jax.random.normal(k2, (fan_out,), jnp.float32) * 0.02
        return w, b

    keys = jax.random.split(key, num_layers + 1)
    layers = []
    for l in range(num_layers):
        ks = jax.random.split(keys[l], 7)
        lp = {}
        lp["self_wqkv"], lp["self_bqkv"] = dense(ks[0], E, 3 * E)
        lp["self_wo"],   lp["self_bo"]   = dense(ks[1], E, E)
        lp["cross_wq"],  lp["cross_bq"]  = dense(ks[2], E, E)
        lp["cross_wkv"], lp["cross_bkv"] = dense(ks[3], E, 2 * E)
        lp["cross_wo"],  lp["cross_bo"]  = dense(ks[4], E, E)
        lp["w1"], lp["b1"] = dense(ks[5], E, hidden)
        lp["w2"], lp["b2"] = dense(ks[6], hidden, E)
        for i in (1, 2, 3):
            lp[f"ln{i}_g"] = jnp.ones((E,), jnp.float32)
            lp[f"ln{i}_b"] = jnp.zeros((E,), jnp.float32)
        layers.append(lp)

    params = {
        "layers": layers,
        "norm_g": jnp.ones((E,), jnp.float32),
        "norm_b": jnp.zeros((E,), jnp.float32),
    }
    params["out_w"], params["out_b"] = dense(keys[-1], E, out_dim)
    return params


# ---------------------------------------------------------------------------
# Main
# ---------------------------------------------------------------------------

if __name__ == "__main__":
    # small config consistent with the module's forward
    batch = 2
    num_patches = 8
    embedding_dim = 32
    num_heads = 4
    num_layers = 2
    mlp_ratio = 4
    patch_size = 4
    # TODO(synk): dropout is treated as eval-mode identity (dropout=0).

    key = jax.random.PRNGKey(0)
    k_enc, k_mem, k_par = jax.random.split(key, 3)

    encoded_input = jax.random.normal(
        k_enc, (batch, num_patches, embedding_dim), jnp.float32)
    memory = jax.random.normal(
        k_mem, (batch, num_patches, embedding_dim), jnp.float32)

    params = init_params(k_par, embedding_dim, num_heads,
                         num_layers, mlp_ratio, patch_size)

    fwd = jax.jit(functools.partial(transformer_decoder_forward,
                                    patch_size=patch_size, num_heads=num_heads))
    out = fwd(encoded_input, memory, params)
    out = jax.block_until_ready(out)

    assert out.shape == (batch, num_patches, 3, patch_size, patch_size), out.shape
    assert bool(jnp.all(jnp.isfinite(out)))
    assert bool(jnp.all(jnp.abs(out) <= 1.0))  # tanh-bounded
    print("KERNEL_OK")
</pallas_src>

<mosaic_0001>
module attributes {stable_mosaic.version = 11 : i64} {
  func.func @kernel(%arg0: i32, %arg1: memref<1x8x32xf32, #tpu.memory_space<vmem>>, %arg2: memref<1x8x32xf32, #tpu.memory_space<vmem>>, %arg3: memref<2x32x96xbf16, #tpu.memory_space<vmem>>, %arg4: memref<2x1x96xf32, #tpu.memory_space<vmem>>, %arg5: memref<2x32x32xbf16, #tpu.memory_space<vmem>>, %arg6: memref<2x1x32xf32, #tpu.memory_space<vmem>>, %arg7: memref<2x1x32xf32, #tpu.memory_space<vmem>>, %arg8: memref<2x1x32xf32, #tpu.memory_space<vmem>>, %arg9: memref<2x32x32xbf16, #tpu.memory_space<vmem>>, %arg10: memref<2x1x32xf32, #tpu.memory_space<vmem>>, %arg11: memref<2x32x64xbf16, #tpu.memory_space<vmem>>, %arg12: memref<2x1x64xf32, #tpu.memory_space<vmem>>, %arg13: memref<2x32x32xbf16, #tpu.memory_space<vmem>>, %arg14: memref<2x1x32xf32, #tpu.memory_space<vmem>>, %arg15: memref<2x1x32xf32, #tpu.memory_space<vmem>>, %arg16: memref<2x1x32xf32, #tpu.memory_space<vmem>>, %arg17: memref<2x32x128xbf16, #tpu.memory_space<vmem>>, %arg18: memref<2x1x128xf32, #tpu.memory_space<vmem>>, %arg19: memref<2x128x32xbf16, #tpu.memory_space<vmem>>, %arg20: memref<2x1x32xf32, #tpu.memory_space<vmem>>, %arg21: memref<2x1x32xf32, #tpu.memory_space<vmem>>, %arg22: memref<2x1x32xf32, #tpu.memory_space<vmem>>, %arg23: memref<1x32xf32, #tpu.memory_space<vmem>>, %arg24: memref<1x32xf32, #tpu.memory_space<vmem>>, %arg25: memref<32x48xbf16, #tpu.memory_space<vmem>>, %arg26: memref<1x48xf32, #tpu.memory_space<vmem>>, %arg27: memref<1x8x48xf32, #tpu.memory_space<vmem>>) attributes {dimension_semantics = [#tpu.dimension_semantics<parallel>], iteration_bounds = array<i64: 2>, scalar_prefetch = 0 : i64, scratch_operands = 0 : i64, tpu.core_type = #tpu.core_type<tc>, window_params = [{transform_indices = @transform_0, window_bounds = array<i64: 1, 8, 32>}, {transform_indices = @transform_1, window_bounds = array<i64: 1, 8, 32>}, {pipeline_mode = #tpu.pipeline_mode<synchronous>, transform_indices = @transform_2, window_bounds = array<i64: 2, 32, 96>}, {pipeline_mode = #tpu.pipeline_mode<synchronous>, transform_indices = @transform_3, window_bounds = array<i64: 2, 1, 96>}, {pipeline_mode = #tpu.pipeline_mode<synchronous>, transform_indices = @transform_4, window_bounds = array<i64: 2, 32, 32>}, {pipeline_mode = #tpu.pipeline_mode<synchronous>, transform_indices = @transform_5, window_bounds = array<i64: 2, 1, 32>}, {pipeline_mode = #tpu.pipeline_mode<synchronous>, transform_indices = @transform_6, window_bounds = array<i64: 2, 1, 32>}, {pipeline_mode = #tpu.pipeline_mode<synchronous>, transform_indices = @transform_7, window_bounds = array<i64: 2, 1, 32>}, {pipeline_mode = #tpu.pipeline_mode<synchronous>, transform_indices = @transform_8, window_bounds = array<i64: 2, 32, 32>}, {pipeline_mode = #tpu.pipeline_mode<synchronous>, transform_indices = @transform_9, window_bounds = array<i64: 2, 1, 32>}, {pipeline_mode = #tpu.pipeline_mode<synchronous>, transform_indices = @transform_10, window_bounds = array<i64: 2, 32, 64>}, {pipeline_mode = #tpu.pipeline_mode<synchronous>, transform_indices = @transform_11, window_bounds = array<i64: 2, 1, 64>}, {pipeline_mode = #tpu.pipeline_mode<synchronous>, transform_indices = @transform_12, window_bounds = array<i64: 2, 32, 32>}, {pipeline_mode = #tpu.pipeline_mode<synchronous>, transform_indices = @transform_13, window_bounds = array<i64: 2, 1, 32>}, {pipeline_mode = #tpu.pipeline_mode<synchronous>, transform_indices = @transform_14, window_bounds = array<i64: 2, 1, 32>}, {pipeline_mode = #tpu.pipeline_mode<synchronous>, transform_indices = @transform_15, window_bounds = array<i64: 2, 1, 32>}, {pipeline_mode = #tpu.pipeline_mode<synchronous>, transform_indices = @transform_16, window_bounds = array<i64: 2, 32, 128>}, {pipeline_mode = #tpu.pipeline_mode<synchronous>, transform_indices = @transform_17, window_bounds = array<i64: 2, 1, 128>}, {pipeline_mode = #tpu.pipeline_mode<synchronous>, transform_indices = @transform_18, window_bounds = array<i64: 2, 128, 32>}, {pipeline_mode = #tpu.pipeline_mode<synchronous>, transform_indices = @transform_19, window_bounds = array<i64: 2, 1, 32>}, {pipeline_mode = #tpu.pipeline_mode<synchronous>, transform_indices = @transform_20, window_bounds = array<i64: 2, 1, 32>}, {pipeline_mode = #tpu.pipeline_mode<synchronous>, transform_indices = @transform_21, window_bounds = array<i64: 2, 1, 32>}, {pipeline_mode = #tpu.pipeline_mode<synchronous>, transform_indices = @transform_22, window_bounds = array<i64: 1, 32>}, {pipeline_mode = #tpu.pipeline_mode<synchronous>, transform_indices = @transform_23, window_bounds = array<i64: 1, 32>}, {pipeline_mode = #tpu.pipeline_mode<synchronous>, transform_indices = @transform_24, window_bounds = array<i64: 32, 48>}, {pipeline_mode = #tpu.pipeline_mode<synchronous>, transform_indices = @transform_25, window_bounds = array<i64: 1, 48>}, {transform_indices = @transform_26, window_bounds = array<i64: 1, 8, 48>}]} {
    %c0 = arith.constant 0 : index
    %c0_0 = arith.constant 0 : index
    %c0_1 = arith.constant 0 : index
    %0 = vector.load %arg1[%c0, %c0_0, %c0_1] : memref<1x8x32xf32, #tpu.memory_space<vmem>>, vector<1x8x32xf32>
    %1 = vector.shape_cast %0 : vector<1x8x32xf32> to vector<8x32xf32>
    %c0_2 = arith.constant 0 : index
    %c0_3 = arith.constant 0 : index
    %c0_4 = arith.constant 0 : index
    %2 = vector.load %arg2[%c0_2, %c0_3, %c0_4] : memref<1x8x32xf32, #tpu.memory_space<vmem>>, vector<1x8x32xf32>
    %3 = vector.shape_cast %2 : vector<1x8x32xf32> to vector<8x32xf32>
    %4 = arith.truncf %3 : vector<8x32xf32> to vector<8x32xbf16>
    %c0_5 = arith.constant 0 : index
    %c0_6 = arith.constant 0 : index
    %c0_7 = arith.constant 0 : index
    %5 = vector.load %arg3[%c0_5, %c0_6, %c0_7] : memref<2x32x96xbf16, #tpu.memory_space<vmem>>, vector<1x32x96xbf16>
    %6 = vector.shape_cast %5 : vector<1x32x96xbf16> to vector<32x96xbf16>
    %c0_8 = arith.constant 0 : index
    %c0_9 = arith.constant 0 : index
    %c0_10 = arith.constant 0 : index
    %7 = vector.load %arg4[%c0_8, %c0_9, %c0_10] : memref<2x1x96xf32, #tpu.memory_space<vmem>>, vector<1x1x96xf32>
    %8 = vector.shape_cast %7 : vector<1x1x96xf32> to vector<1x96xf32>
    %9 = arith.truncf %1 : vector<8x32xf32> to vector<8x32xbf16>
    %cst = arith.constant dense<0.000000e+00> : vector<8x96xf32>
    %10 = tpu.matmul %9, %6, %cst {dimension_numbers = #tpu.dot_dimension_numbers<[1], [0], [0], [1], [0, 0, 1, 1], [], []>} : vector<8x32xbf16>, vector<32x96xbf16>, vector<8x96xf32> -> vector<8x96xf32>
    %11 = vector.broadcast %8 : vector<1x96xf32> to vector<8x96xf32>
    %12 = arith.addf %10, %11 : vector<8x96xf32>
    %13 = vector.extract_strided_slice %12 {offsets = [0, 0], sizes = [8, 32], strides = [1, 1]} : vector<8x96xf32> to vector<8x32xf32>
    %cst_11 = arith.constant 0.353553385 : f32
    %14 = vector.broadcast %cst_11 : f32 to vector<8x32xf32>
    %15 = arith.mulf %13, %14 : vector<8x32xf32>
    %16 = vector.extract_strided_slice %12 {offsets = [0, 32], sizes = [8, 32], strides = [1, 1]} : vector<8x96xf32> to vector<8x32xf32>
    %17 = vector.extract_strided_slice %12 {offsets = [0, 64], sizes = [8, 32], strides = [1, 1]} : vector<8x96xf32> to vector<8x32xf32>
    %18 = vector.extract_strided_slice %15 {offsets = [0, 0], sizes = [8, 8], strides = [1, 1]} : vector<8x32xf32> to vector<8x8xf32>
    %19 = arith.truncf %18 : vector<8x8xf32> to vector<8x8xbf16>
    %20 = vector.extract_strided_slice %16 {offsets = [0, 0], sizes = [8, 8], strides = [1, 1]} : vector<8x32xf32> to vector<8x8xf32>
    %21 = arith.truncf %20 : vector<8x8xf32> to vector<8x8xbf16>
    %22 = vector.extract_strided_slice %17 {offsets = [0, 0], sizes = [8, 8], strides = [1, 1]} : vector<8x32xf32> to vector<8x8xf32>
    %23 = arith.truncf %22 : vector<8x8xf32> to vector<8x8xbf16>
    %cst_12 = arith.constant dense<0.000000e+00> : vector<8x8xf32>
    %24 = tpu.matmul %19, %21, %cst_12 {dimension_numbers = #tpu.dot_dimension_numbers<[1], [1], [0], [0], [0, 0, 1, 0], [], []>} : vector<8x8xbf16>, vector<8x8xbf16>, vector<8x8xf32> -> vector<8x8xf32>
    %cst_13 = arith.constant dense<0xFF800000> : vector<8xf32>
    %25 = vector.multi_reduction <maximumf>, %24, %cst_13 [1] : vector<8x8xf32> to vector<8xf32>
    %26 = vector.shape_cast %25 : vector<8xf32> to vector<8x1xf32>
    %27 = vector.broadcast %26 : vector<8x1xf32> to vector<8x8xf32>
    %28 = arith.subf %24, %27 : vector<8x8xf32>
    %29 = math.exp %28 : vector<8x8xf32>
    %cst_14 = arith.constant dense<0.000000e+00> : vector<8xf32>
    %30 = vector.multi_reduction <add>, %29, %cst_14 [1] : vector<8x8xf32> to vector<8xf32>
    %31 = vector.shape_cast %30 : vector<8xf32> to vector<8x1xf32>
    %32 = tpu.reciprocal %31 {approx = true} : vector<8x1xf32> -> vector<8x1xf32>
    %33 = vector.broadcast %32 : vector<8x1xf32> to vector<8x8xf32>
    %34 = arith.mulf %29, %33 : vector<8x8xf32>
    %35 = arith.truncf %34 : vector<8x8xf32> to vector<8x8xbf16>
    %cst_15 = arith.constant dense<0.000000e+00> : vector<8x8xf32>
    %36 = tpu.matmul %35, %23, %cst_15 {dimension_numbers = #tpu.dot_dimension_numbers<[1], [0], [0], [1], [0, 0, 1, 1], [], []>} : vector<8x8xbf16>, vector<8x8xbf16>, vector<8x8xf32> -> vector<8x8xf32>
    %37 = vector.extract_strided_slice %15 {offsets = [0, 8], sizes = [8, 8], strides = [1, 1]} : vector<8x32xf32> to vector<8x8xf32>
    %38 = arith.truncf %37 : vector<8x8xf32> to vector<8x8xbf16>
    %39 = vector.extract_strided_slice %16 {offsets = [0, 8], sizes = [8, 8], strides = [1, 1]} : vector<8x32xf32> to vector<8x8xf32>
    %40 = arith.truncf %39 : vector<8x8xf32> to vector<8x8xbf16>
    %41 = vector.extract_strided_slice %17 {offsets = [0, 8], sizes = [8, 8], strides = [1, 1]} : vector<8x32xf32> to vector<8x8xf32>
    %42 = arith.truncf %41 : vector<8x8xf32> to vector<8x8xbf16>
    %cst_16 = arith.constant dense<0.000000e+00> : vector<8x8xf32>
    %43 = tpu.matmul %38, %40, %cst_16 {dimension_numbers = #tpu.dot_dimension_numbers<[1], [1], [0], [0], [0, 0, 1, 0], [], []>} : vector<8x8xbf16>, vector<8x8xbf16>, vector<8x8xf32> -> vector<8x8xf32>
    %cst_17 = arith.constant dense<0xFF800000> : vector<8xf32>
    %44 = vector.multi_reduction <maximumf>, %43, %cst_17 [1] : vector<8x8xf32> to vector<8xf32>
    %45 = vector.shape_cast %44 : vector<8xf32> to vector<8x1xf32>
    %46 = vector.broadcast %45 : vector<8x1xf32> to vector<8x8xf32>
    %47 = arith.subf %43, %46 : vector<8x8xf32>
    %48 = math.exp %47 : vector<8x8xf32>
    %cst_18 = arith.constant dense<0.000000e+00> : vector<8xf32>
    %49 = vector.multi_reduction <add>, %48, %cst_18 [1] : vector<8x8xf32> to vector<8xf32>
    %50 = vector.shape_cast %49 : vector<8xf32> to vector<8x1xf32>
    %51 = tpu.reciprocal %50 {approx = true} : vector<8x1xf32> -> vector<8x1xf32>
    %52 = vector.broadcast %51 : vector<8x1xf32> to vector<8x8xf32>
    %53 = arith.mulf %48, %52 : vector<8x8xf32>
    %54 = arith.truncf %53 : vector<8x8xf32> to vector<8x8xbf16>
    %cst_19 = arith.constant dense<0.000000e+00> : vector<8x8xf32>
    %55 = tpu.matmul %54, %42, %cst_19 {dimension_numbers = #tpu.dot_dimension_numbers<[1], [0], [0], [1], [0, 0, 1, 1], [], []>} : vector<8x8xbf16>, vector<8x8xbf16>, vector<8x8xf32> -> vector<8x8xf32>
    %56 = vector.extract_strided_slice %15 {offsets = [0, 16], sizes = [8, 8], strides = [1, 1]} : vector<8x32xf32> to vector<8x8xf32>
    %57 = arith.truncf %56 : vector<8x8xf32> to vector<8x8xbf16>
    %58 = vector.extract_strided_slice %16 {offsets = [0, 16], sizes = [8, 8], strides = [1, 1]} : vector<8x32xf32> to vector<8x8xf32>
    %59 = arith.truncf %58 : vector<8x8xf32> to vector<8x8xbf16>
    %60 = vector.extract_strided_slice %17 {offsets = [0, 16], sizes = [8, 8], strides = [1, 1]} : vector<8x32xf32> to vector<8x8xf32>
    %61 = arith.truncf %60 : vector<8x8xf32> to vector<8x8xbf16>
    %cst_20 = arith.constant dense<0.000000e+00> : vector<8x8xf32>
    %62 = tpu.matmul %57, %59, %cst_20 {dimension_numbers = #tpu.dot_dimension_numbers<[1], [1], [0], [0], [0, 0, 1, 0], [], []>} : vector<8x8xbf16>, vector<8x8xbf16>, vector<8x8xf32> -> vector<8x8xf32>
    %cst_21 = arith.constant dense<0xFF800000> : vector<8xf32>
    %63 = vector.multi_reduction <maximumf>, %62, %cst_21 [1] : vector<8x8xf32> to vector<8xf32>
    %64 = vector.shape_cast %63 : vector<8xf32> to vector<8x1xf32>
    %65 = vector.broadcast %64 : vector<8x1xf32> to vector<8x8xf32>
    %66 = arith.subf %62, %65 : vector<8x8xf32>
    %67 = math.exp %66 : vector<8x8xf32>
    %cst_22 = arith.constant dense<0.000000e+00> : vector<8xf32>
    %68 = vector.multi_reduction <add>, %67, %cst_22 [1] : vector<8x8xf32> to vector<8xf32>
    %69 = vector.shape_cast %68 : vector<8xf32> to vector<8x1xf32>
    %70 = tpu.reciprocal %69 {approx = true} : vector<8x1xf32> -> vector<8x1xf32>
    %71 = vector.broadcast %70 : vector<8x1xf32> to vector<8x8xf32>
    %72 = arith.mulf %67, %71 : vector<8x8xf32>
    %73 = arith.truncf %72 : vector<8x8xf32> to vector<8x8xbf16>
    %cst_23 = arith.constant dense<0.000000e+00> : vector<8x8xf32>
    %74 = tpu.matmul %73, %61, %cst_23 {dimension_numbers = #tpu.dot_dimension_numbers<[1], [0], [0], [1], [0, 0, 1, 1], [], []>} : vector<8x8xbf16>, vector<8x8xbf16>, vector<8x8xf32> -> vector<8x8xf32>
    %75 = vector.extract_strided_slice %15 {offsets = [0, 24], sizes = [8, 8], strides = [1, 1]} : vector<8x32xf32> to vector<8x8xf32>
    %76 = arith.truncf %75 : vector<8x8xf32> to vector<8x8xbf16>
    %77 = vector.extract_strided_slice %16 {offsets = [0, 24], sizes = [8, 8], strides = [1, 1]} : vector<8x32xf32> to vector<8x8xf32>
    %78 = arith.truncf %77 : vector<8x8xf32> to vector<8x8xbf16>
    %79 = vector.extract_strided_slice %17 {offsets = [0, 24], sizes = [8, 8], strides = [1, 1]} : vector<8x32xf32> to vector<8x8xf32>
    %80 = arith.truncf %79 : vector<8x8xf32> to vector<8x8xbf16>
    %cst_24 = arith.constant dense<0.000000e+00> : vector<8x8xf32>
    %81 = tpu.matmul %76, %78, %cst_24 {dimension_numbers = #tpu.dot_dimension_numbers<[1], [1], [0], [0], [0, 0, 1, 0], [], []>} : vector<8x8xbf16>, vector<8x8xbf16>, vector<8x8xf32> -> vector<8x8xf32>
    %cst_25 = arith.constant dense<0xFF800000> : vector<8xf32>
    %82 = vector.multi_reduction <maximumf>, %81, %cst_25 [1] : vector<8x8xf32> to vector<8xf32>
    %83 = vector.shape_cast %82 : vector<8xf32> to vector<8x1xf32>
    %84 = vector.broadcast %83 : vector<8x1xf32> to vector<8x8xf32>
    %85 = arith.subf %81, %84 : vector<8x8xf32>
    %86 = math.exp %85 : vector<8x8xf32>
    %cst_26 = arith.constant dense<0.000000e+00> : vector<8xf32>
    %87 = vector.multi_reduction <add>, %86, %cst_26 [1] : vector<8x8xf32> to vector<8xf32>
    %88 = vector.shape_cast %87 : vector<8xf32> to vector<8x1xf32>
    %89 = tpu.reciprocal %88 {approx = true} : vector<8x1xf32> -> vector<8x1xf32>
    %90 = vector.broadcast %89 : vector<8x1xf32> to vector<8x8xf32>
    %91 = arith.mulf %86, %90 : vector<8x8xf32>
    %92 = arith.truncf %91 : vector<8x8xf32> to vector<8x8xbf16>
    %cst_27 = arith.constant dense<0.000000e+00> : vector<8x8xf32>
    %93 = tpu.matmul %92, %80, %cst_27 {dimension_numbers = #tpu.dot_dimension_numbers<[1], [0], [0], [1], [0, 0, 1, 1], [], []>} : vector<8x8xbf16>, vector<8x8xbf16>, vector<8x8xf32> -> vector<8x8xf32>
    %94 = tpu.concatenate %36, %55, %74, %93 in 1 : vector<8x8xf32>, vector<8x8xf32>, vector<8x8xf32>, vector<8x8xf32> -> vector<8x32xf32>
    %c0_28 = arith.constant 0 : index
    %c0_29 = arith.constant 0 : index
    %c0_30 = arith.constant 0 : index
    %95 = vector.load %arg5[%c0_28, %c0_29, %c0_30] : memref<2x32x32xbf16, #tpu.memory_space<vmem>>, vector<1x32x32xbf16>
    %96 = vector.shape_cast %95 : vector<1x32x32xbf16> to vector<32x32xbf16>
    %c0_31 = arith.constant 0 : index
    %c0_32 = arith.constant 0 : index
    %c0_33 = arith.constant 0 : index
    %97 = vector.load %arg6[%c0_31, %c0_32, %c0_33] : memref<2x1x32xf32, #tpu.memory_space<vmem>>, vector<1x1x32xf32>
    %98 = vector.shape_cast %97 : vector<1x1x32xf32> to vector<1x32xf32>
    %99 = arith.truncf %94 : vector<8x32xf32> to vector<8x32xbf16>
    %cst_34 = arith.constant dense<0.000000e+00> : vector<8x32xf32>
    %100 = tpu.matmul %99, %96, %cst_34 {dimension_numbers = #tpu.dot_dimension_numbers<[1], [0], [0], [1], [0, 0, 1, 1], [], []>} : vector<8x32xbf16>, vector<32x32xbf16>, vector<8x32xf32> -> vector<8x32xf32>
    %101 = vector.broadcast %98 : vector<1x32xf32> to vector<8x32xf32>
    %102 = arith.addf %100, %101 : vector<8x32xf32>
    %103 = arith.addf %1, %102 : vector<8x32xf32>
    %c0_35 = arith.constant 0 : index
    %c0_36 = arith.constant 0 : index
    %c0_37 = arith.constant 0 : index
    %104 = vector.load %arg7[%c0_35, %c0_36, %c0_37] : memref<2x1x32xf32, #tpu.memory_space<vmem>>, vector<1x1x32xf32>
    %105 = vector.shape_cast %104 : vector<1x1x32xf32> to vector<1x32xf32>
    %c0_38 = arith.constant 0 : index
    %c0_39 = arith.constant 0 : index
    %c0_40 = arith.constant 0 : index
    %106 = vector.load %arg8[%c0_38, %c0_39, %c0_40] : memref<2x1x32xf32, #tpu.memory_space<vmem>>, vector<1x1x32xf32>
    %107 = vector.shape_cast %106 : vector<1x1x32xf32> to vector<1x32xf32>
    %cst_41 = arith.constant dense<0.000000e+00> : vector<8xf32>
    %108 = vector.multi_reduction <add>, %103, %cst_41 [1] : vector<8x32xf32> to vector<8xf32>
    %109 = vector.shape_cast %108 : vector<8xf32> to vector<8x1xf32>
    %cst_42 = arith.constant 3.200000e+01 : f32
    %110 = vector.broadcast %cst_42 : f32 to vector<8x1xf32>
    %111 = arith.divf %109, %110 : vector<8x1xf32>
    %112 = vector.broadcast %111 : vector<8x1xf32> to vector<8x32xf32>
    %113 = arith.subf %103, %112 : vector<8x32xf32>
    %114 = arith.mulf %113, %113 : vector<8x32xf32>
    %cst_43 = arith.constant dense<0.000000e+00> : vector<8xf32>
    %115 = vector.multi_reduction <add>, %114, %cst_43 [1] : vector<8x32xf32> to vector<8xf32>
    %116 = vector.shape_cast %115 : vector<8xf32> to vector<8x1xf32>
    %cst_44 = arith.constant 3.200000e+01 : f32
    %117 = vector.broadcast %cst_44 : f32 to vector<8x1xf32>
    %118 = arith.divf %116, %117 : vector<8x1xf32>
    %119 = vector.broadcast %111 : vector<8x1xf32> to vector<8x32xf32>
    %120 = arith.subf %103, %119 : vector<8x32xf32>
    %cst_45 = arith.constant 9.99999974E-6 : f32
    %121 = vector.broadcast %cst_45 : f32 to vector<8x1xf32>
    %122 = arith.addf %118, %121 : vector<8x1xf32>
    %123 = math.rsqrt %122 : vector<8x1xf32>
    %124 = vector.broadcast %123 : vector<8x1xf32> to vector<8x32xf32>
    %125 = arith.mulf %120, %124 : vector<8x32xf32>
    %126 = vector.broadcast %105 : vector<1x32xf32> to vector<8x32xf32>
    %127 = arith.mulf %125, %126 : vector<8x32xf32>
    %128 = vector.broadcast %107 : vector<1x32xf32> to vector<8x32xf32>
    %129 = arith.addf %127, %128 : vector<8x32xf32>
    %c0_46 = arith.constant 0 : index
    %c0_47 = arith.constant 0 : index
    %c0_48 = arith.constant 0 : index
    %130 = vector.load %arg9[%c0_46, %c0_47, %c0_48] : memref<2x32x32xbf16, #tpu.memory_space<vmem>>, vector<1x32x32xbf16>
    %131 = vector.shape_cast %130 : vector<1x32x32xbf16> to vector<32x32xbf16>
    %c0_49 = arith.constant 0 : index
    %c0_50 = arith.constant 0 : index
    %c0_51 = arith.constant 0 : index
    %132 = vector.load %arg10[%c0_49, %c0_50, %c0_51] : memref<2x1x32xf32, #tpu.memory_space<vmem>>, vector<1x1x32xf32>
    %133 = vector.shape_cast %132 : vector<1x1x32xf32> to vector<1x32xf32>
    %134 = arith.truncf %129 : vector<8x32xf32> to vector<8x32xbf16>
    %cst_52 = arith.constant dense<0.000000e+00> : vector<8x32xf32>
    %135 = tpu.matmul %134, %131, %cst_52 {dimension_numbers = #tpu.dot_dimension_numbers<[1], [0], [0], [1], [0, 0, 1, 1], [], []>} : vector<8x32xbf16>, vector<32x32xbf16>, vector<8x32xf32> -> vector<8x32xf32>
    %136 = vector.broadcast %133 : vector<1x32xf32> to vector<8x32xf32>
    %137 = arith.addf %135, %136 : vector<8x32xf32>
    %c0_53 = arith.constant 0 : index
    %c0_54 = arith.constant 0 : index
    %c0_55 = arith.constant 0 : index
    %138 = vector.load %arg11[%c0_53, %c0_54, %c0_55] : memref<2x32x64xbf16, #tpu.memory_space<vmem>>, vector<1x32x64xbf16>
    %139 = vector.shape_cast %138 : vector<1x32x64xbf16> to vector<32x64xbf16>
    %c0_56 = arith.constant 0 : index
    %c0_57 = arith.constant 0 : index
    %c0_58 = arith.constant 0 : index
    %140 = vector.load %arg12[%c0_56, %c0_57, %c0_58] : memref<2x1x64xf32, #tpu.memory_space<vmem>>, vector<1x1x64xf32>
    %141 = vector.shape_cast %140 : vector<1x1x64xf32> to vector<1x64xf32>
    %cst_59 = arith.constant dense<0.000000e+00> : vector<8x64xf32>
    %142 = tpu.matmul %4, %139, %cst_59 {dimension_numbers = #tpu.dot_dimension_numbers<[1], [0], [0], [1], [0, 0, 1, 1], [], []>} : vector<8x32xbf16>, vector<32x64xbf16>, vector<8x64xf32> -> vector<8x64xf32>
    %143 = vector.broadcast %141 : vector<1x64xf32> to vector<8x64xf32>
    %144 = arith.addf %142, %143 : vector<8x64xf32>
    %cst_60 = arith.constant 0.353553385 : f32
    %145 = vector.broadcast %cst_60 : f32 to vector<8x32xf32>
    %146 = arith.mulf %137, %145 : vector<8x32xf32>
    %147 = vector.extract_strided_slice %144 {offsets = [0, 0], sizes = [8, 32], strides = [1, 1]} : vector<8x64xf32> to vector<8x32xf32>
    %148 = vector.extract_strided_slice %144 {offsets = [0, 32], sizes = [8, 32], strides = [1, 1]} : vector<8x64xf32> to vector<8x32xf32>
    %149 = vector.extract_strided_slice %146 {offsets = [0, 0], sizes = [8, 8], strides = [1, 1]} : vector<8x32xf32> to vector<8x8xf32>
    %150 = arith.truncf %149 : vector<8x8xf32> to vector<8x8xbf16>
    %151 = vector.extract_strided_slice %147 {offsets = [0, 0], sizes = [8, 8], strides = [1, 1]} : vector<8x32xf32> to vector<8x8xf32>
    %152 = arith.truncf %151 : vector<8x8xf32> to vector<8x8xbf16>
    %153 = vector.extract_strided_slice %148 {offsets = [0, 0], sizes = [8, 8], strides = [1, 1]} : vector<8x32xf32> to vector<8x8xf32>
    %154 = arith.truncf %153 : vector<8x8xf32> to vector<8x8xbf16>
    %cst_61 = arith.constant dense<0.000000e+00> : vector<8x8xf32>
    %155 = tpu.matmul %150, %152, %cst_61 {dimension_numbers = #tpu.dot_dimension_numbers<[1], [1], [0], [0], [0, 0, 1, 0], [], []>} : vector<8x8xbf16>, vector<8x8xbf16>, vector<8x8xf32> -> vector<8x8xf32>
    %cst_62 = arith.constant dense<0xFF800000> : vector<8xf32>
    %156 = vector.multi_reduction <maximumf>, %155, %cst_62 [1] : vector<8x8xf32> to vector<8xf32>
    %157 = vector.shape_cast %156 : vector<8xf32> to vector<8x1xf32>
    %158 = vector.broadcast %157 : vector<8x1xf32> to vector<8x8xf32>
    %159 = arith.subf %155, %158 : vector<8x8xf32>
    %160 = math.exp %159 : vector<8x8xf32>
    %cst_63 = arith.constant dense<0.000000e+00> : vector<8xf32>
    %161 = vector.multi_reduction <add>, %160, %cst_63 [1] : vector<8x8xf32> to vector<8xf32>
    %162 = vector.shape_cast %161 : vector<8xf32> to vector<8x1xf32>
    %163 = tpu.reciprocal %162 {approx = true} : vector<8x1xf32> -> vector<8x1xf32>
    %164 = vector.broadcast %163 : vector<8x1xf32> to vector<8x8xf32>
    %165 = arith.mulf %160, %164 : vector<8x8xf32>
    %166 = arith.truncf %165 : vector<8x8xf32> to vector<8x8xbf16>
    %cst_64 = arith.constant dense<0.000000e+00> : vector<8x8xf32>
    %167 = tpu.matmul %166, %154, %cst_64 {dimension_numbers = #tpu.dot_dimension_numbers<[1], [0], [0], [1], [0, 0, 1, 1], [], []>} : vector<8x8xbf16>, vector<8x8xbf16>, vector<8x8xf32> -> vector<8x8xf32>
    %168 = vector.extract_strided_slice %146 {offsets = [0, 8], sizes = [8, 8], strides = [1, 1]} : vector<8x32xf32> to vector<8x8xf32>
    %169 = arith.truncf %168 : vector<8x8xf32> to vector<8x8xbf16>
    %170 = vector.extract_strided_slice %147 {offsets = [0, 8], sizes = [8, 8], strides = [1, 1]} : vector<8x32xf32> to vector<8x8xf32>
    %171 = arith.truncf %170 : vector<8x8xf32> to vector<8x8xbf16>
    %172 = vector.extract_strided_slice %148 {offsets = [0, 8], sizes = [8, 8], strides = [1, 1]} : vector<8x32xf32> to vector<8x8xf32>
    %173 = arith.truncf %172 : vector<8x8xf32> to vector<8x8xbf16>
    %cst_65 = arith.constant dense<0.000000e+00> : vector<8x8xf32>
    %174 = tpu.matmul %169, %171, %cst_65 {dimension_numbers = #tpu.dot_dimension_numbers<[1], [1], [0], [0], [0, 0, 1, 0], [], []>} : vector<8x8xbf16>, vector<8x8xbf16>, vector<8x8xf32> -> vector<8x8xf32>
    %cst_66 = arith.constant dense<0xFF800000> : vector<8xf32>
    %175 = vector.multi_reduction <maximumf>, %174, %cst_66 [1] : vector<8x8xf32> to vector<8xf32>
    %176 = vector.shape_cast %175 : vector<8xf32> to vector<8x1xf32>
    %177 = vector.broadcast %176 : vector<8x1xf32> to vector<8x8xf32>
    %178 = arith.subf %174, %177 : vector<8x8xf32>
    %179 = math.exp %178 : vector<8x8xf32>
    %cst_67 = arith.constant dense<0.000000e+00> : vector<8xf32>
    %180 = vector.multi_reduction <add>, %179, %cst_67 [1] : vector<8x8xf32> to vector<8xf32>
    %181 = vector.shape_cast %180 : vector<8xf32> to vector<8x1xf32>
    %182 = tpu.reciprocal %181 {approx = true} : vector<8x1xf32> -> vector<8x1xf32>
    %183 = vector.broadcast %182 : vector<8x1xf32> to vector<8x8xf32>
    %184 = arith.mulf %179, %183 : vector<8x8xf32>
    %185 = arith.truncf %184 : vector<8x8xf32> to vector<8x8xbf16>
    %cst_68 = arith.constant dense<0.000000e+00> : vector<8x8xf32>
    %186 = tpu.matmul %185, %173, %cst_68 {dimension_numbers = #tpu.dot_dimension_numbers<[1], [0], [0], [1], [0, 0, 1, 1], [], []>} : vector<8x8xbf16>, vector<8x8xbf16>, vector<8x8xf32> -> vector<8x8xf32>
    %187 = vector.extract_strided_slice %146 {offsets = [0, 16], sizes = [8, 8], strides = [1, 1]} : vector<8x32xf32> to vector<8x8xf32>
    %188 = arith.truncf %187 : vector<8x8xf32> to vector<8x8xbf16>
    %189 = vector.extract_strided_slice %147 {offsets = [0, 16], sizes = [8, 8], strides = [1, 1]} : vector<8x32xf32> to vector<8x8xf32>
    %190 = arith.truncf %189 : vector<8x8xf32> to vector<8x8xbf16>
    %191 = vector.extract_strided_slice %148 {offsets = [0, 16], sizes = [8, 8], strides = [1, 1]} : vector<8x32xf32> to vector<8x8xf32>
    %192 = arith.truncf %191 : vector<8x8xf32> to vector<8x8xbf16>
    %cst_69 = arith.constant dense<0.000000e+00> : vector<8x8xf32>
    %193 = tpu.matmul %188, %190, %cst_69 {dimension_numbers = #tpu.dot_dimension_numbers<[1], [1], [0], [0], [0, 0, 1, 0], [], []>} : vector<8x8xbf16>, vector<8x8xbf16>, vector<8x8xf32> -> vector<8x8xf32>
    %cst_70 = arith.constant dense<0xFF800000> : vector<8xf32>
    %194 = vector.multi_reduction <maximumf>, %193, %cst_70 [1] : vector<8x8xf32> to vector<8xf32>
    %195 = vector.shape_cast %194 : vector<8xf32> to vector<8x1xf32>
    %196 = vector.broadcast %195 : vector<8x1xf32> to vector<8x8xf32>
    %197 = arith.subf %193, %196 : vector<8x8xf32>
    %198 = math.exp %197 : vector<8x8xf32>
    %cst_71 = arith.constant dense<0.000000e+00> : vector<8xf32>
    %199 = vector.multi_reduction <add>, %198, %cst_71 [1] : vector<8x8xf32> to vector<8xf32>
    %200 = vector.shape_cast %199 : vector<8xf32> to vector<8x1xf32>
    %201 = tpu.reciprocal %200 {approx = true} : vector<8x1xf32> -> vector<8x1xf32>
    %202 = vector.broadcast %201 : vector<8x1xf32> to vector<8x8xf32>
    %203 = arith.mulf %198, %202 : vector<8x8xf32>
    %204 = arith.truncf %203 : vector<8x8xf32> to vector<8x8xbf16>
    %cst_72 = arith.constant dense<0.000000e+00> : vector<8x8xf32>
    %205 = tpu.matmul %204, %192, %cst_72 {dimension_numbers = #tpu.dot_dimension_numbers<[1], [0], [0], [1], [0, 0, 1, 1], [], []>} : vector<8x8xbf16>, vector<8x8xbf16>, vector<8x8xf32> -> vector<8x8xf32>
    %206 = vector.extract_strided_slice %146 {offsets = [0, 24], sizes = [8, 8], strides = [1, 1]} : vector<8x32xf32> to vector<8x8xf32>
    %207 = arith.truncf %206 : vector<8x8xf32> to vector<8x8xbf16>
    %208 = vector.extract_strided_slice %147 {offsets = [0, 24], sizes = [8, 8], strides = [1, 1]} : vector<8x32xf32> to vector<8x8xf32>
    %209 = arith.truncf %208 : vector<8x8xf32> to vector<8x8xbf16>
    %210 = vector.extract_strided_slice %148 {offsets = [0, 24], sizes = [8, 8], strides = [1, 1]} : vector<8x32xf32> to vector<8x8xf32>
    %211 = arith.truncf %210 : vector<8x8xf32> to vector<8x8xbf16>
    %cst_73 = arith.constant dense<0.000000e+00> : vector<8x8xf32>
    %212 = tpu.matmul %207, %209, %cst_73 {dimension_numbers = #tpu.dot_dimension_numbers<[1], [1], [0], [0], [0, 0, 1, 0], [], []>} : vector<8x8xbf16>, vector<8x8xbf16>, vector<8x8xf32> -> vector<8x8xf32>
    %cst_74 = arith.constant dense<0xFF800000> : vector<8xf32>
    %213 = vector.multi_reduction <maximumf>, %212, %cst_74 [1] : vector<8x8xf32> to vector<8xf32>
    %214 = vector.shape_cast %213 : vector<8xf32> to vector<8x1xf32>
    %215 = vector.broadcast %214 : vector<8x1xf32> to vector<8x8xf32>
    %216 = arith.subf %212, %215 : vector<8x8xf32>
    %217 = math.exp %216 : vector<8x8xf32>
    %cst_75 = arith.constant dense<0.000000e+00> : vector<8xf32>
    %218 = vector.multi_reduction <add>, %217, %cst_75 [1] : vector<8x8xf32> to vector<8xf32>
    %219 = vector.shape_cast %218 : vector<8xf32> to vector<8x1xf32>
    %220 = tpu.reciprocal %219 {approx = true} : vector<8x1xf32> -> vector<8x1xf32>
    %221 = vector.broadcast %220 : vector<8x1xf32> to vector<8x8xf32>
    %222 = arith.mulf %217, %221 : vector<8x8xf32>
    %223 = arith.truncf %222 : vector<8x8xf32> to vector<8x8xbf16>
    %cst_76 = arith.constant dense<0.000000e+00> : vector<8x8xf32>
    %224 = tpu.matmul %223, %211, %cst_76 {dimension_numbers = #tpu.dot_dimension_numbers<[1], [0], [0], [1], [0, 0, 1, 1], [], []>} : vector<8x8xbf16>, vector<8x8xbf16>, vector<8x8xf32> -> vector<8x8xf32>
    %225 = tpu.concatenate %167, %186, %205, %224 in 1 : vector<8x8xf32>, vector<8x8xf32>, vector<8x8xf32>, vector<8x8xf32> -> vector<8x32xf32>
    %c0_77 = arith.constant 0 : index
    %c0_78 = arith.constant 0 : index
    %c0_79 = arith.constant 0 : index
    %226 = vector.load %arg13[%c0_77, %c0_78, %c0_79] : memref<2x32x32xbf16, #tpu.memory_space<vmem>>, vector<1x32x32xbf16>
    %227 = vector.shape_cast %226 : vector<1x32x32xbf16> to vector<32x32xbf16>
    %c0_80 = arith.constant 0 : index
    %c0_81 = arith.constant 0 : index
    %c0_82 = arith.constant 0 : index
    %228 = vector.load %arg14[%c0_80, %c0_81, %c0_82] : memref<2x1x32xf32, #tpu.memory_space<vmem>>, vector<1x1x32xf32>
    %229 = vector.shape_cast %228 : vector<1x1x32xf32> to vector<1x32xf32>
    %230 = arith.truncf %225 : vector<8x32xf32> to vector<8x32xbf16>
    %cst_83 = arith.constant dense<0.000000e+00> : vector<8x32xf32>
    %231 = tpu.matmul %230, %227, %cst_83 {dimension_numbers = #tpu.dot_dimension_numbers<[1], [0], [0], [1], [0, 0, 1, 1], [], []>} : vector<8x32xbf16>, vector<32x32xbf16>, vector<8x32xf32> -> vector<8x32xf32>
    %232 = vector.broadcast %229 : vector<1x32xf32> to vector<8x32xf32>
    %233 = arith.addf %231, %232 : vector<8x32xf32>
    %234 = arith.addf %129, %233 : vector<8x32xf32>
    %c0_84 = arith.constant 0 : index
    %c0_85 = arith.constant 0 : index
    %c0_86 = arith.constant 0 : index
    %235 = vector.load %arg15[%c0_84, %c0_85, %c0_86] : memref<2x1x32xf32, #tpu.memory_space<vmem>>, vector<1x1x32xf32>
    %236 = vector.shape_cast %235 : vector<1x1x32xf32> to vector<1x32xf32>
    %c0_87 = arith.constant 0 : index
    %c0_88 = arith.constant 0 : index
    %c0_89 = arith.constant 0 : index
    %237 = vector.load %arg16[%c0_87, %c0_88, %c0_89] : memref<2x1x32xf32, #tpu.memory_space<vmem>>, vector<1x1x32xf32>
    %238 = vector.shape_cast %237 : vector<1x1x32xf32> to vector<1x32xf32>
    %cst_90 = arith.constant dense<0.000000e+00> : vector<8xf32>
    %239 = vector.multi_reduction <add>, %234, %cst_90 [1] : vector<8x32xf32> to vector<8xf32>
    %240 = vector.shape_cast %239 : vector<8xf32> to vector<8x1xf32>
    %cst_91 = arith.constant 3.200000e+01 : f32
    %241 = vector.broadcast %cst_91 : f32 to vector<8x1xf32>
    %242 = arith.divf %240, %241 : vector<8x1xf32>
    %243 = vector.broadcast %242 : vector<8x1xf32> to vector<8x32xf32>
    %244 = arith.subf %234, %243 : vector<8x32xf32>
    %245 = arith.mulf %244, %244 : vector<8x32xf32>
    %cst_92 = arith.constant dense<0.000000e+00> : vector<8xf32>
    %246 = vector.multi_reduction <add>, %245, %cst_92 [1] : vector<8x32xf32> to vector<8xf32>
    %247 = vector.shape_cast %246 : vector<8xf32> to vector<8x1xf32>
    %cst_93 = arith.constant 3.200000e+01 : f32
    %248 = vector.broadcast %cst_93 : f32 to vector<8x1xf32>
    %249 = arith.divf %247, %248 : vector<8x1xf32>
    %250 = vector.broadcast %242 : vector<8x1xf32> to vector<8x32xf32>
    %251 = arith.subf %234, %250 : vector<8x32xf32>
    %cst_94 = arith.constant 9.99999974E-6 : f32
    %252 = vector.broadcast %cst_94 : f32 to vector<8x1xf32>
    %253 = arith.addf %249, %252 : vector<8x1xf32>
    %254 = math.rsqrt %253 : vector<8x1xf32>
    %255 = vector.broadcast %254 : vector<8x1xf32> to vector<8x32xf32>
    %256 = arith.mulf %251, %255 : vector<8x32xf32>
    %257 = vector.broadcast %236 : vector<1x32xf32> to vector<8x32xf32>
    %258 = arith.mulf %256, %257 : vector<8x32xf32>
    %259 = vector.broadcast %238 : vector<1x32xf32> to vector<8x32xf32>
    %260 = arith.addf %258, %259 : vector<8x32xf32>
    %c0_95 = arith.constant 0 : index
    %c0_96 = arith.constant 0 : index
    %c0_97 = arith.constant 0 : index
    %261 = vector.load %arg17[%c0_95, %c0_96, %c0_97] : memref<2x32x128xbf16, #tpu.memory_space<vmem>>, vector<1x32x128xbf16>
    %262 = vector.shape_cast %261 : vector<1x32x128xbf16> to vector<32x128xbf16>
    %c0_98 = arith.constant 0 : index
    %c0_99 = arith.constant 0 : index
    %c0_100 = arith.constant 0 : index
    %263 = vector.load %arg18[%c0_98, %c0_99, %c0_100] : memref<2x1x128xf32, #tpu.memory_space<vmem>>, vector<1x1x128xf32>
    %264 = vector.shape_cast %263 : vector<1x1x128xf32> to vector<1x128xf32>
    %265 = arith.truncf %260 : vector<8x32xf32> to vector<8x32xbf16>
    %cst_101 = arith.constant dense<0.000000e+00> : vector<8x128xf32>
    %266 = tpu.matmul %265, %262, %cst_101 {dimension_numbers = #tpu.dot_dimension_numbers<[1], [0], [0], [1], [0, 0, 1, 1], [], []>} : vector<8x32xbf16>, vector<32x128xbf16>, vector<8x128xf32> -> vector<8x128xf32>
    %267 = vector.broadcast %264 : vector<1x128xf32> to vector<8x128xf32>
    %268 = arith.addf %266, %267 : vector<8x128xf32>
    %cst_102 = arith.constant 5.000000e-01 : f32
    %269 = vector.broadcast %cst_102 : f32 to vector<8x128xf32>
    %270 = arith.mulf %269, %268 : vector<8x128xf32>
    %cst_103 = arith.constant 0.707106769 : f32
    %271 = vector.broadcast %cst_103 : f32 to vector<8x128xf32>
    %272 = arith.mulf %268, %271 : vector<8x128xf32>
    %273 = math.erf %272 : vector<8x128xf32>
    %cst_104 = arith.constant 1.000000e+00 : f32
    %274 = vector.broadcast %cst_104 : f32 to vector<8x128xf32>
    %275 = arith.addf %274, %273 : vector<8x128xf32>
    %276 = arith.mulf %270, %275 : vector<8x128xf32>
    %c0_105 = arith.constant 0 : index
    %c0_106 = arith.constant 0 : index
    %c0_107 = arith.constant 0 : index
    %277 = vector.load %arg19[%c0_105, %c0_106, %c0_107] : memref<2x128x32xbf16, #tpu.memory_space<vmem>>, vector<1x128x32xbf16>
    %278 = vector.shape_cast %277 : vector<1x128x32xbf16> to vector<128x32xbf16>
    %c0_108 = arith.constant 0 : index
    %c0_109 = arith.constant 0 : index
    %c0_110 = arith.constant 0 : index
    %279 = vector.load %arg20[%c0_108, %c0_109, %c0_110] : memref<2x1x32xf32, #tpu.memory_space<vmem>>, vector<1x1x32xf32>
    %280 = vector.shape_cast %279 : vector<1x1x32xf32> to vector<1x32xf32>
    %281 = arith.truncf %276 : vector<8x128xf32> to vector<8x128xbf16>
    %cst_111 = arith.constant dense<0.000000e+00> : vector<8x32xf32>
    %282 = tpu.matmul %281, %278, %cst_111 {dimension_numbers = #tpu.dot_dimension_numbers<[1], [0], [0], [1], [0, 0, 1, 1], [], []>} : vector<8x128xbf16>, vector<128x32xbf16>, vector<8x32xf32> -> vector<8x32xf32>
    %283 = vector.broadcast %280 : vector<1x32xf32> to vector<8x32xf32>
    %284 = arith.addf %282, %283 : vector<8x32xf32>
    %285 = arith.addf %260, %284 : vector<8x32xf32>
    %c0_112 = arith.constant 0 : index
    %c0_113 = arith.constant 0 : index
    %c0_114 = arith.constant 0 : index
    %286 = vector.load %arg21[%c0_112, %c0_113, %c0_114] : memref<2x1x32xf32, #tpu.memory_space<vmem>>, vector<1x1x32xf32>
    %287 = vector.shape_cast %286 : vector<1x1x32xf32> to vector<1x32xf32>
    %c0_115 = arith.constant 0 : index
    %c0_116 = arith.constant 0 : index
    %c0_117 = arith.constant 0 : index
    %288 = vector.load %arg22[%c0_115, %c0_116, %c0_117] : memref<2x1x32xf32, #tpu.memory_space<vmem>>, vector<1x1x32xf32>
    %289 = vector.shape_cast %288 : vector<1x1x32xf32> to vector<1x32xf32>
    %cst_118 = arith.constant dense<0.000000e+00> : vector<8xf32>
    %290 = vector.multi_reduction <add>, %285, %cst_118 [1] : vector<8x32xf32> to vector<8xf32>
    %291 = vector.shape_cast %290 : vector<8xf32> to vector<8x1xf32>
    %cst_119 = arith.constant 3.200000e+01 : f32
    %292 = vector.broadcast %cst_119 : f32 to vector<8x1xf32>
    %293 = arith.divf %291, %292 : vector<8x1xf32>
    %294 = vector.broadcast %293 : vector<8x1xf32> to vector<8x32xf32>
    %295 = arith.subf %285, %294 : vector<8x32xf32>
    %296 = arith.mulf %295, %295 : vector<8x32xf32>
    %cst_120 = arith.constant dense<0.000000e+00> : vector<8xf32>
    %297 = vector.multi_reduction <add>, %296, %cst_120 [1] : vector<8x32xf32> to vector<8xf32>
    %298 = vector.shape_cast %297 : vector<8xf32> to vector<8x1xf32>
    %cst_121 = arith.constant 3.200000e+01 : f32
    %299 = vector.broadcast %cst_121 : f32 to vector<8x1xf32>
    %300 = arith.divf %298, %299 : vector<8x1xf32>
    %301 = vector.broadcast %293 : vector<8x1xf32> to vector<8x32xf32>
    %302 = arith.subf %285, %301 : vector<8x32xf32>
    %cst_122 = arith.constant 9.99999974E-6 : f32
    %303 = vector.broadcast %cst_122 : f32 to vector<8x1xf32>
    %304 = arith.addf %300, %303 : vector<8x1xf32>
    %305 = math.rsqrt %304 : vector<8x1xf32>
    %306 = vector.broadcast %305 : vector<8x1xf32> to vector<8x32xf32>
    %307 = arith.mulf %302, %306 : vector<8x32xf32>
    %308 = vector.broadcast %287 : vector<1x32xf32> to vector<8x32xf32>
    %309 = arith.mulf %307, %308 : vector<8x32xf32>
    %310 = vector.broadcast %289 : vector<1x32xf32> to vector<8x32xf32>
    %311 = arith.addf %309, %310 : vector<8x32xf32>
    %c1 = arith.constant 1 : index
    %c0_123 = arith.constant 0 : index
    %c0_124 = arith.constant 0 : index
    %312 = vector.load %arg3[%c1, %c0_123, %c0_124] : memref<2x32x96xbf16, #tpu.memory_space<vmem>>, vector<1x32x96xbf16>
    %313 = vector.shape_cast %312 : vector<1x32x96xbf16> to vector<32x96xbf16>
    %c1_125 = arith.constant 1 : index
    %c0_126 = arith.constant 0 : index
    %c0_127 = arith.constant 0 : index
    %314 = vector.load %arg4[%c1_125, %c0_126, %c0_127] : memref<2x1x96xf32, #tpu.memory_space<vmem>>, vector<1x1x96xf32>
    %315 = vector.shape_cast %314 : vector<1x1x96xf32> to vector<1x96xf32>
    %316 = arith.truncf %311 : vector<8x32xf32> to vector<8x32xbf16>
    %cst_128 = arith.constant dense<0.000000e+00> : vector<8x96xf32>
    %317 = tpu.matmul %316, %313, %cst_128 {dimension_numbers = #tpu.dot_dimension_numbers<[1], [0], [0], [1], [0, 0, 1, 1], [], []>} : vector<8x32xbf16>, vector<32x96xbf16>, vector<8x96xf32> -> vector<8x96xf32>
    %318 = vector.broadcast %315 : vector<1x96xf32> to vector<8x96xf32>
    %319 = arith.addf %317, %318 : vector<8x96xf32>
    %320 = vector.extract_strided_slice %319 {offsets = [0, 0], sizes = [8, 32], strides = [1, 1]} : vector<8x96xf32> to vector<8x32xf32>
    %cst_129 = arith.constant 0.353553385 : f32
    %321 = vector.broadcast %cst_129 : f32 to vector<8x32xf32>
    %322 = arith.mulf %320, %321 : vector<8x32xf32>
    %323 = vector.extract_strided_slice %319 {offsets = [0, 32], sizes = [8, 32], strides = [1, 1]} : vector<8x96xf32> to vector<8x32xf32>
    %324 = vector.extract_strided_slice %319 {offsets = [0, 64], sizes = [8, 32], strides = [1, 1]} : vector<8x96xf32> to vector<8x32xf32>
    %325 = vector.extract_strided_slice %322 {offsets = [0, 0], sizes = [8, 8], strides = [1, 1]} : vector<8x32xf32> to vector<8x8xf32>
    %326 = arith.truncf %325 : vector<8x8xf32> to vector<8x8xbf16>
    %327 = vector.extract_strided_slice %323 {offsets = [0, 0], sizes = [8, 8], strides = [1, 1]} : vector<8x32xf32> to vector<8x8xf32>
    %328 = arith.truncf %327 : vector<8x8xf32> to vector<8x8xbf16>
    %329 = vector.extract_strided_slice %324 {offsets = [0, 0], sizes = [8, 8], strides = [1, 1]} : vector<8x32xf32> to vector<8x8xf32>
    %330 = arith.truncf %329 : vector<8x8xf32> to vector<8x8xbf16>
    %cst_130 = arith.constant dense<0.000000e+00> : vector<8x8xf32>
    %331 = tpu.matmul %326, %328, %cst_130 {dimension_numbers = #tpu.dot_dimension_numbers<[1], [1], [0], [0], [0, 0, 1, 0], [], []>} : vector<8x8xbf16>, vector<8x8xbf16>, vector<8x8xf32> -> vector<8x8xf32>
    %cst_131 = arith.constant dense<0xFF800000> : vector<8xf32>
    %332 = vector.multi_reduction <maximumf>, %331, %cst_131 [1] : vector<8x8xf32> to vector<8xf32>
    %333 = vector.shape_cast %332 : vector<8xf32> to vector<8x1xf32>
    %334 = vector.broadcast %333 : vector<8x1xf32> to vector<8x8xf32>
    %335 = arith.subf %331, %334 : vector<8x8xf32>
    %336 = math.exp %335 : vector<8x8xf32>
    %cst_132 = arith.constant dense<0.000000e+00> : vector<8xf32>
    %337 = vector.multi_reduction <add>, %336, %cst_132 [1] : vector<8x8xf32> to vector<8xf32>
    %338 = vector.shape_cast %337 : vector<8xf32> to vector<8x1xf32>
    %339 = tpu.reciprocal %338 {approx = true} : vector<8x1xf32> -> vector<8x1xf32>
    %340 = vector.broadcast %339 : vector<8x1xf32> to vector<8x8xf32>
    %341 = arith.mulf %336, %340 : vector<8x8xf32>
    %342 = arith.truncf %341 : vector<8x8xf32> to vector<8x8xbf16>
    %cst_133 = arith.constant dense<0.000000e+00> : vector<8x8xf32>
    %343 = tpu.matmul %342, %330, %cst_133 {dimension_numbers = #tpu.dot_dimension_numbers<[1], [0], [0], [1], [0, 0, 1, 1], [], []>} : vector<8x8xbf16>, vector<8x8xbf16>, vector<8x8xf32> -> vector<8x8xf32>
    %344 = vector.extract_strided_slice %322 {offsets = [0, 8], sizes = [8, 8], strides = [1, 1]} : vector<8x32xf32> to vector<8x8xf32>
    %345 = arith.truncf %344 : vector<8x8xf32> to vector<8x8xbf16>
    %346 = vector.extract_strided_slice %323 {offsets = [0, 8], sizes = [8, 8], strides = [1, 1]} : vector<8x32xf32> to vector<8x8xf32>
    %347 = arith.truncf %346 : vector<8x8xf32> to vector<8x8xbf16>
    %348 = vector.extract_strided_slice %324 {offsets = [0, 8], sizes = [8, 8], strides = [1, 1]} : vector<8x32xf32> to vector<8x8xf32>
    %349 = arith.truncf %348 : vector<8x8xf32> to vector<8x8xbf16>
    %cst_134 = arith.constant dense<0.000000e+00> : vector<8x8xf32>
    %350 = tpu.matmul %345, %347, %cst_134 {dimension_numbers = #tpu.dot_dimension_numbers<[1], [1], [0], [0], [0, 0, 1, 0], [], []>} : vector<8x8xbf16>, vector<8x8xbf16>, vector<8x8xf32> -> vector<8x8xf32>
    %cst_135 = arith.constant dense<0xFF800000> : vector<8xf32>
    %351 = vector.multi_reduction <maximumf>, %350, %cst_135 [1] : vector<8x8xf32> to vector<8xf32>
    %352 = vector.shape_cast %351 : vector<8xf32> to vector<8x1xf32>
    %353 = vector.broadcast %352 : vector<8x1xf32> to vector<8x8xf32>
    %354 = arith.subf %350, %353 : vector<8x8xf32>
    %355 = math.exp %354 : vector<8x8xf32>
    %cst_136 = arith.constant dense<0.000000e+00> : vector<8xf32>
    %356 = vector.multi_reduction <add>, %355, %cst_136 [1] : vector<8x8xf32> to vector<8xf32>
    %357 = vector.shape_cast %356 : vector<8xf32> to vector<8x1xf32>
    %358 = tpu.reciprocal %357 {approx = true} : vector<8x1xf32> -> vector<8x1xf32>
    %359 = vector.broadcast %358 : vector<8x1xf32> to vector<8x8xf32>
    %360 = arith.mulf %355, %359 : vector<8x8xf32>
    %361 = arith.truncf %360 : vector<8x8xf32> to vector<8x8xbf16>
    %cst_137 = arith.constant dense<0.000000e+00> : vector<8x8xf32>
    %362 = tpu.matmul %361, %349, %cst_137 {dimension_numbers = #tpu.dot_dimension_numbers<[1], [0], [0], [1], [0, 0, 1, 1], [], []>} : vector<8x8xbf16>, vector<8x8xbf16>, vector<8x8xf32> -> vector<8x8xf32>
    %363 = vector.extract_strided_slice %322 {offsets = [0, 16], sizes = [8, 8], strides = [1, 1]} : vector<8x32xf32> to vector<8x8xf32>
    %364 = arith.truncf %363 : vector<8x8xf32> to vector<8x8xbf16>
    %365 = vector.extract_strided_slice %323 {offsets = [0, 16], sizes = [8, 8], strides = [1, 1]} : vector<8x32xf32> to vector<8x8xf32>
    %366 = arith.truncf %365 : vector<8x8xf32> to vector<8x8xbf16>
    %367 = vector.extract_strided_slice %324 {offsets = [0, 16], sizes = [8, 8], strides = [1, 1]} : vector<8x32xf32> to vector<8x8xf32>
    %368 = arith.truncf %367 : vector<8x8xf32> to vector<8x8xbf16>
    %cst_138 = arith.constant dense<0.000000e+00> : vector<8x8xf32>
    %369 = tpu.matmul %364, %366, %cst_138 {dimension_numbers = #tpu.dot_dimension_numbers<[1], [1], [0], [0], [0, 0, 1, 0], [], []>} : vector<8x8xbf16>, vector<8x8xbf16>, vector<8x8xf32> -> vector<8x8xf32>
    %cst_139 = arith.constant dense<0xFF800000> : vector<8xf32>
    %370 = vector.multi_reduction <maximumf>, %369, %cst_139 [1] : vector<8x8xf32> to vector<8xf32>
    %371 = vector.shape_cast %370 : vector<8xf32> to vector<8x1xf32>
    %372 = vector.broadcast %371 : vector<8x1xf32> to vector<8x8xf32>
    %373 = arith.subf %369, %372 : vector<8x8xf32>
    %374 = math.exp %373 : vector<8x8xf32>
    %cst_140 = arith.constant dense<0.000000e+00> : vector<8xf32>
    %375 = vector.multi_reduction <add>, %374, %cst_140 [1] : vector<8x8xf32> to vector<8xf32>
    %376 = vector.shape_cast %375 : vector<8xf32> to vector<8x1xf32>
    %377 = tpu.reciprocal %376 {approx = true} : vector<8x1xf32> -> vector<8x1xf32>
    %378 = vector.broadcast %377 : vector<8x1xf32> to vector<8x8xf32>
    %379 = arith.mulf %374, %378 : vector<8x8xf32>
    %380 = arith.truncf %379 : vector<8x8xf32> to vector<8x8xbf16>
    %cst_141 = arith.constant dense<0.000000e+00> : vector<8x8xf32>
    %381 = tpu.matmul %380, %368, %cst_141 {dimension_numbers = #tpu.dot_dimension_numbers<[1], [0], [0], [1], [0, 0, 1, 1], [], []>} : vector<8x8xbf16>, vector<8x8xbf16>, vector<8x8xf32> -> vector<8x8xf32>
    %382 = vector.extract_strided_slice %322 {offsets = [0, 24], sizes = [8, 8], strides = [1, 1]} : vector<8x32xf32> to vector<8x8xf32>
    %383 = arith.truncf %382 : vector<8x8xf32> to vector<8x8xbf16>
    %384 = vector.extract_strided_slice %323 {offsets = [0, 24], sizes = [8, 8], strides = [1, 1]} : vector<8x32xf32> to vector<8x8xf32>
    %385 = arith.truncf %384 : vector<8x8xf32> to vector<8x8xbf16>
    %386 = vector.extract_strided_slice %324 {offsets = [0, 24], sizes = [8, 8], strides = [1, 1]} : vector<8x32xf32> to vector<8x8xf32>
    %387 = arith.truncf %386 : vector<8x8xf32> to vector<8x8xbf16>
    %cst_142 = arith.constant dense<0.000000e+00> : vector<8x8xf32>
    %388 = tpu.matmul %383, %385, %cst_142 {dimension_numbers = #tpu.dot_dimension_numbers<[1], [1], [0], [0], [0, 0, 1, 0], [], []>} : vector<8x8xbf16>, vector<8x8xbf16>, vector<8x8xf32> -> vector<8x8xf32>
    %cst_143 = arith.constant dense<0xFF800000> : vector<8xf32>
    %389 = vector.multi_reduction <maximumf>, %388, %cst_143 [1] : vector<8x8xf32> to vector<8xf32>
    %390 = vector.shape_cast %389 : vector<8xf32> to vector<8x1xf32>
    %391 = vector.broadcast %390 : vector<8x1xf32> to vector<8x8xf32>
    %392 = arith.subf %388, %391 : vector<8x8xf32>
    %393 = math.exp %392 : vector<8x8xf32>
    %cst_144 = arith.constant dense<0.000000e+00> : vector<8xf32>
    %394 = vector.multi_reduction <add>, %393, %cst_144 [1] : vector<8x8xf32> to vector<8xf32>
    %395 = vector.shape_cast %394 : vector<8xf32> to vector<8x1xf32>
    %396 = tpu.reciprocal %395 {approx = true} : vector<8x1xf32> -> vector<8x1xf32>
    %397 = vector.broadcast %396 : vector<8x1xf32> to vector<8x8xf32>
    %398 = arith.mulf %393, %397 : vector<8x8xf32>
    %399 = arith.truncf %398 : vector<8x8xf32> to vector<8x8xbf16>
    %cst_145 = arith.constant dense<0.000000e+00> : vector<8x8xf32>
    %400 = tpu.matmul %399, %387, %cst_145 {dimension_numbers = #tpu.dot_dimension_numbers<[1], [0], [0], [1], [0, 0, 1, 1], [], []>} : vector<8x8xbf16>, vector<8x8xbf16>, vector<8x8xf32> -> vector<8x8xf32>
    %401 = tpu.concatenate %343, %362, %381, %400 in 1 : vector<8x8xf32>, vector<8x8xf32>, vector<8x8xf32>, vector<8x8xf32> -> vector<8x32xf32>
    %c1_146 = arith.constant 1 : index
    %c0_147 = arith.constant 0 : index
    %c0_148 = arith.constant 0 : index
    %402 = vector.load %arg5[%c1_146, %c0_147, %c0_148] : memref<2x32x32xbf16, #tpu.memory_space<vmem>>, vector<1x32x32xbf16>
    %403 = vector.shape_cast %402 : vector<1x32x32xbf16> to vector<32x32xbf16>
    %c1_149 = arith.constant 1 : index
    %c0_150 = arith.constant 0 : index
    %c0_151 = arith.constant 0 : index
    %404 = vector.load %arg6[%c1_149, %c0_150, %c0_151] : memref<2x1x32xf32, #tpu.memory_space<vmem>>, vector<1x1x32xf32>
    %405 = vector.shape_cast %404 : vector<1x1x32xf32> to vector<1x32xf32>
    %406 = arith.truncf %401 : vector<8x32xf32> to vector<8x32xbf16>
    %cst_152 = arith.constant dense<0.000000e+00> : vector<8x32xf32>
    %407 = tpu.matmul %406, %403, %cst_152 {dimension_numbers = #tpu.dot_dimension_numbers<[1], [0], [0], [1], [0, 0, 1, 1], [], []>} : vector<8x32xbf16>, vector<32x32xbf16>, vector<8x32xf32> -> vector<8x32xf32>
    %408 = vector.broadcast %405 : vector<1x32xf32> to vector<8x32xf32>
    %409 = arith.addf %407, %408 : vector<8x32xf32>
    %410 = arith.addf %311, %409 : vector<8x32xf32>
    %c1_153 = arith.constant 1 : index
    %c0_154 = arith.constant 0 : index
    %c0_155 = arith.constant 0 : index
    %411 = vector.load %arg7[%c1_153, %c0_154, %c0_155] : memref<2x1x32xf32, #tpu.memory_space<vmem>>, vector<1x1x32xf32>
    %412 = vector.shape_cast %411 : vector<1x1x32xf32> to vector<1x32xf32>
    %c1_156 = arith.constant 1 : index
    %c0_157 = arith.constant 0 : index
    %c0_158 = arith.constant 0 : index
    %413 = vector.load %arg8[%c1_156, %c0_157, %c0_158] : memref<2x1x32xf32, #tpu.memory_space<vmem>>, vector<1x1x32xf32>
    %414 = vector.shape_cast %413 : vector<1x1x32xf32> to vector<1x32xf32>
    %cst_159 = arith.constant dense<0.000000e+00> : vector<8xf32>
    %415 = vector.multi_reduction <add>, %410, %cst_159 [1] : vector<8x32xf32> to vector<8xf32>
    %416 = vector.shape_cast %415 : vector<8xf32> to vector<8x1xf32>
    %cst_160 = arith.constant 3.200000e+01 : f32
    %417 = vector.broadcast %cst_160 : f32 to vector<8x1xf32>
    %418 = arith.divf %416, %417 : vector<8x1xf32>
    %419 = vector.broadcast %418 : vector<8x1xf32> to vector<8x32xf32>
    %420 = arith.subf %410, %419 : vector<8x32xf32>
    %421 = arith.mulf %420, %420 : vector<8x32xf32>
    %cst_161 = arith.constant dense<0.000000e+00> : vector<8xf32>
    %422 = vector.multi_reduction <add>, %421, %cst_161 [1] : vector<8x32xf32> to vector<8xf32>
    %423 = vector.shape_cast %422 : vector<8xf32> to vector<8x1xf32>
    %cst_162 = arith.constant 3.200000e+01 : f32
    %424 = vector.broadcast %cst_162 : f32 to vector<8x1xf32>
    %425 = arith.divf %423, %424 : vector<8x1xf32>
    %426 = vector.broadcast %418 : vector<8x1xf32> to vector<8x32xf32>
    %427 = arith.subf %410, %426 : vector<8x32xf32>
    %cst_163 = arith.constant 9.99999974E-6 : f32
    %428 = vector.broadcast %cst_163 : f32 to vector<8x1xf32>
    %429 = arith.addf %425, %428 : vector<8x1xf32>
    %430 = math.rsqrt %429 : vector<8x1xf32>
    %431 = vector.broadcast %430 : vector<8x1xf32> to vector<8x32xf32>
    %432 = arith.mulf %427, %431 : vector<8x32xf32>
    %433 = vector.broadcast %412 : vector<1x32xf32> to vector<8x32xf32>
    %434 = arith.mulf %432, %433 : vector<8x32xf32>
    %435 = vector.broadcast %414 : vector<1x32xf32> to vector<8x32xf32>
    %436 = arith.addf %434, %435 : vector<8x32xf32>
    %c1_164 = arith.constant 1 : index
    %c0_165 = arith.constant 0 : index
    %c0_166 = arith.constant 0 : index
    %437 = vector.load %arg9[%c1_164, %c0_165, %c0_166] : memref<2x32x32xbf16, #tpu.memory_space<vmem>>, vector<1x32x32xbf16>
    %438 = vector.shape_cast %437 : vector<1x32x32xbf16> to vector<32x32xbf16>
    %c1_167 = arith.constant 1 : index
    %c0_168 = arith.constant 0 : index
    %c0_169 = arith.constant 0 : index
    %439 = vector.load %arg10[%c1_167, %c0_168, %c0_169] : memref<2x1x32xf32, #tpu.memory_space<vmem>>, vector<1x1x32xf32>
    %440 = vector.shape_cast %439 : vector<1x1x32xf32> to vector<1x32xf32>
    %441 = arith.truncf %436 : vector<8x32xf32> to vector<8x32xbf16>
    %cst_170 = arith.constant dense<0.000000e+00> : vector<8x32xf32>
    %442 = tpu.matmul %441, %438, %cst_170 {dimension_numbers = #tpu.dot_dimension_numbers<[1], [0], [0], [1], [0, 0, 1, 1], [], []>} : vector<8x32xbf16>, vector<32x32xbf16>, vector<8x32xf32> -> vector<8x32xf32>
    %443 = vector.broadcast %440 : vector<1x32xf32> to vector<8x32xf32>
    %444 = arith.addf %442, %443 : vector<8x32xf32>
    %c1_171 = arith.constant 1 : index
    %c0_172 = arith.constant 0 : index
    %c0_173 = arith.constant 0 : index
    %445 = vector.load %arg11[%c1_171, %c0_172, %c0_173] : memref<2x32x64xbf16, #tpu.memory_space<vmem>>, vector<1x32x64xbf16>
    %446 = vector.shape_cast %445 : vector<1x32x64xbf16> to vector<32x64xbf16>
    %c1_174 = arith.constant 1 : index
    %c0_175 = arith.constant 0 : index
    %c0_176 = arith.constant 0 : index
    %447 = vector.load %arg12[%c1_174, %c0_175, %c0_176] : memref<2x1x64xf32, #tpu.memory_space<vmem>>, vector<1x1x64xf32>
    %448 = vector.shape_cast %447 : vector<1x1x64xf32> to vector<1x64xf32>
    %cst_177 = arith.constant dense<0.000000e+00> : vector<8x64xf32>
    %449 = tpu.matmul %4, %446, %cst_177 {dimension_numbers = #tpu.dot_dimension_numbers<[1], [0], [0], [1], [0, 0, 1, 1], [], []>} : vector<8x32xbf16>, vector<32x64xbf16>, vector<8x64xf32> -> vector<8x64xf32>
    %450 = vector.broadcast %448 : vector<1x64xf32> to vector<8x64xf32>
    %451 = arith.addf %449, %450 : vector<8x64xf32>
    %cst_178 = arith.constant 0.353553385 : f32
    %452 = vector.broadcast %cst_178 : f32 to vector<8x32xf32>
    %453 = arith.mulf %444, %452 : vector<8x32xf32>
    %454 = vector.extract_strided_slice %451 {offsets = [0, 0], sizes = [8, 32], strides = [1, 1]} : vector<8x64xf32> to vector<8x32xf32>
    %455 = vector.extract_strided_slice %451 {offsets = [0, 32], sizes = [8, 32], strides = [1, 1]} : vector<8x64xf32> to vector<8x32xf32>
    %456 = vector.extract_strided_slice %453 {offsets = [0, 0], sizes = [8, 8], strides = [1, 1]} : vector<8x32xf32> to vector<8x8xf32>
    %457 = arith.truncf %456 : vector<8x8xf32> to vector<8x8xbf16>
    %458 = vector.extract_strided_slice %454 {offsets = [0, 0], sizes = [8, 8], strides = [1, 1]} : vector<8x32xf32> to vector<8x8xf32>
    %459 = arith.truncf %458 : vector<8x8xf32> to vector<8x8xbf16>
    %460 = vector.extract_strided_slice %455 {offsets = [0, 0], sizes = [8, 8], strides = [1, 1]} : vector<8x32xf32> to vector<8x8xf32>
    %461 = arith.truncf %460 : vector<8x8xf32> to vector<8x8xbf16>
    %cst_179 = arith.constant dense<0.000000e+00> : vector<8x8xf32>
    %462 = tpu.matmul %457, %459, %cst_179 {dimension_numbers = #tpu.dot_dimension_numbers<[1], [1], [0], [0], [0, 0, 1, 0], [], []>} : vector<8x8xbf16>, vector<8x8xbf16>, vector<8x8xf32> -> vector<8x8xf32>
    %cst_180 = arith.constant dense<0xFF800000> : vector<8xf32>
    %463 = vector.multi_reduction <maximumf>, %462, %cst_180 [1] : vector<8x8xf32> to vector<8xf32>
    %464 = vector.shape_cast %463 : vector<8xf32> to vector<8x1xf32>
    %465 = vector.broadcast %464 : vector<8x1xf32> to vector<8x8xf32>
    %466 = arith.subf %462, %465 : vector<8x8xf32>
    %467 = math.exp %466 : vector<8x8xf32>
    %cst_181 = arith.constant dense<0.000000e+00> : vector<8xf32>
    %468 = vector.multi_reduction <add>, %467, %cst_181 [1] : vector<8x8xf32> to vector<8xf32>
    %469 = vector.shape_cast %468 : vector<8xf32> to vector<8x1xf32>
    %470 = tpu.reciprocal %469 {approx = true} : vector<8x1xf32> -> vector<8x1xf32>
    %471 = vector.broadcast %470 : vector<8x1xf32> to vector<8x8xf32>
    %472 = arith.mulf %467, %471 : vector<8x8xf32>
    %473 = arith.truncf %472 : vector<8x8xf32> to vector<8x8xbf16>
    %cst_182 = arith.constant dense<0.000000e+00> : vector<8x8xf32>
    %474 = tpu.matmul %473, %461, %cst_182 {dimension_numbers = #tpu.dot_dimension_numbers<[1], [0], [0], [1], [0, 0, 1, 1], [], []>} : vector<8x8xbf16>, vector<8x8xbf16>, vector<8x8xf32> -> vector<8x8xf32>
    %475 = vector.extract_strided_slice %453 {offsets = [0, 8], sizes = [8, 8], strides = [1, 1]} : vector<8x32xf32> to vector<8x8xf32>
    %476 = arith.truncf %475 : vector<8x8xf32> to vector<8x8xbf16>
    %477 = vector.extract_strided_slice %454 {offsets = [0, 8], sizes = [8, 8], strides = [1, 1]} : vector<8x32xf32> to vector<8x8xf32>
    %478 = arith.truncf %477 : vector<8x8xf32> to vector<8x8xbf16>
    %479 = vector.extract_strided_slice %455 {offsets = [0, 8], sizes = [8, 8], strides = [1, 1]} : vector<8x32xf32> to vector<8x8xf32>
    %480 = arith.truncf %479 : vector<8x8xf32> to vector<8x8xbf16>
    %cst_183 = arith.constant dense<0.000000e+00> : vector<8x8xf32>
    %481 = tpu.matmul %476, %478, %cst_183 {dimension_numbers = #tpu.dot_dimension_numbers<[1], [1], [0], [0], [0, 0, 1, 0], [], []>} : vector<8x8xbf16>, vector<8x8xbf16>, vector<8x8xf32> -> vector<8x8xf32>
    %cst_184 = arith.constant dense<0xFF800000> : vector<8xf32>
    %482 = vector.multi_reduction <maximumf>, %481, %cst_184 [1] : vector<8x8xf32> to vector<8xf32>
    %483 = vector.shape_cast %482 : vector<8xf32> to vector<8x1xf32>
    %484 = vector.broadcast %483 : vector<8x1xf32> to vector<8x8xf32>
    %485 = arith.subf %481, %484 : vector<8x8xf32>
    %486 = math.exp %485 : vector<8x8xf32>
    %cst_185 = arith.constant dense<0.000000e+00> : vector<8xf32>
    %487 = vector.multi_reduction <add>, %486, %cst_185 [1] : vector<8x8xf32> to vector<8xf32>
    %488 = vector.shape_cast %487 : vector<8xf32> to vector<8x1xf32>
    %489 = tpu.reciprocal %488 {approx = true} : vector<8x1xf32> -> vector<8x1xf32>
    %490 = vector.broadcast %489 : vector<8x1xf32> to vector<8x8xf32>
    %491 = arith.mulf %486, %490 : vector<8x8xf32>
    %492 = arith.truncf %491 : vector<8x8xf32> to vector<8x8xbf16>
    %cst_186 = arith.constant dense<0.000000e+00> : vector<8x8xf32>
    %493 = tpu.matmul %492, %480, %cst_186 {dimension_numbers = #tpu.dot_dimension_numbers<[1], [0], [0], [1], [0, 0, 1, 1], [], []>} : vector<8x8xbf16>, vector<8x8xbf16>, vector<8x8xf32> -> vector<8x8xf32>
    %494 = vector.extract_strided_slice %453 {offsets = [0, 16], sizes = [8, 8], strides = [1, 1]} : vector<8x32xf32> to vector<8x8xf32>
    %495 = arith.truncf %494 : vector<8x8xf32> to vector<8x8xbf16>
    %496 = vector.extract_strided_slice %454 {offsets = [0, 16], sizes = [8, 8], strides = [1, 1]} : vector<8x32xf32> to vector<8x8xf32>
    %497 = arith.truncf %496 : vector<8x8xf32> to vector<8x8xbf16>
    %498 = vector.extract_strided_slice %455 {offsets = [0, 16], sizes = [8, 8], strides = [1, 1]} : vector<8x32xf32> to vector<8x8xf32>
    %499 = arith.truncf %498 : vector<8x8xf32> to vector<8x8xbf16>
    %cst_187 = arith.constant dense<0.000000e+00> : vector<8x8xf32>
    %500 = tpu.matmul %495, %497, %cst_187 {dimension_numbers = #tpu.dot_dimension_numbers<[1], [1], [0], [0], [0, 0, 1, 0], [], []>} : vector<8x8xbf16>, vector<8x8xbf16>, vector<8x8xf32> -> vector<8x8xf32>
    %cst_188 = arith.constant dense<0xFF800000> : vector<8xf32>
    %501 = vector.multi_reduction <maximumf>, %500, %cst_188 [1] : vector<8x8xf32> to vector<8xf32>
    %502 = vector.shape_cast %501 : vector<8xf32> to vector<8x1xf32>
    %503 = vector.broadcast %502 : vector<8x1xf32> to vector<8x8xf32>
    %504 = arith.subf %500, %503 : vector<8x8xf32>
    %505 = math.exp %504 : vector<8x8xf32>
    %cst_189 = arith.constant dense<0.000000e+00> : vector<8xf32>
    %506 = vector.multi_reduction <add>, %505, %cst_189 [1] : vector<8x8xf32> to vector<8xf32>
    %507 = vector.shape_cast %506 : vector<8xf32> to vector<8x1xf32>
    %508 = tpu.reciprocal %507 {approx = true} : vector<8x1xf32> -> vector<8x1xf32>
    %509 = vector.broadcast %508 : vector<8x1xf32> to vector<8x8xf32>
    %510 = arith.mulf %505, %509 : vector<8x8xf32>
    %511 = arith.truncf %510 : vector<8x8xf32> to vector<8x8xbf16>
    %cst_190 = arith.constant dense<0.000000e+00> : vector<8x8xf32>
    %512 = tpu.matmul %511, %499, %cst_190 {dimension_numbers = #tpu.dot_dimension_numbers<[1], [0], [0], [1], [0, 0, 1, 1], [], []>} : vector<8x8xbf16>, vector<8x8xbf16>, vector<8x8xf32> -> vector<8x8xf32>
    %513 = vector.extract_strided_slice %453 {offsets = [0, 24], sizes = [8, 8], strides = [1, 1]} : vector<8x32xf32> to vector<8x8xf32>
    %514 = arith.truncf %513 : vector<8x8xf32> to vector<8x8xbf16>
    %515 = vector.extract_strided_slice %454 {offsets = [0, 24], sizes = [8, 8], strides = [1, 1]} : vector<8x32xf32> to vector<8x8xf32>
    %516 = arith.truncf %515 : vector<8x8xf32> to vector<8x8xbf16>
    %517 = vector.extract_strided_slice %455 {offsets = [0, 24], sizes = [8, 8], strides = [1, 1]} : vector<8x32xf32> to vector<8x8xf32>
    %518 = arith.truncf %517 : vector<8x8xf32> to vector<8x8xbf16>
    %cst_191 = arith.constant dense<0.000000e+00> : vector<8x8xf32>
    %519 = tpu.matmul %514, %516, %cst_191 {dimension_numbers = #tpu.dot_dimension_numbers<[1], [1], [0], [0], [0, 0, 1, 0], [], []>} : vector<8x8xbf16>, vector<8x8xbf16>, vector<8x8xf32> -> vector<8x8xf32>
    %cst_192 = arith.constant dense<0xFF800000> : vector<8xf32>
    %520 = vector.multi_reduction <maximumf>, %519, %cst_192 [1] : vector<8x8xf32> to vector<8xf32>
    %521 = vector.shape_cast %520 : vector<8xf32> to vector<8x1xf32>
    %522 = vector.broadcast %521 : vector<8x1xf32> to vector<8x8xf32>
    %523 = arith.subf %519, %522 : vector<8x8xf32>
    %524 = math.exp %523 : vector<8x8xf32>
    %cst_193 = arith.constant dense<0.000000e+00> : vector<8xf32>
    %525 = vector.multi_reduction <add>, %524, %cst_193 [1] : vector<8x8xf32> to vector<8xf32>
    %526 = vector.shape_cast %525 : vector<8xf32> to vector<8x1xf32>
    %527 = tpu.reciprocal %526 {approx = true} : vector<8x1xf32> -> vector<8x1xf32>
    %528 = vector.broadcast %527 : vector<8x1xf32> to vector<8x8xf32>
    %529 = arith.mulf %524, %528 : vector<8x8xf32>
    %530 = arith.truncf %529 : vector<8x8xf32> to vector<8x8xbf16>
    %cst_194 = arith.constant dense<0.000000e+00> : vector<8x8xf32>
    %531 = tpu.matmul %530, %518, %cst_194 {dimension_numbers = #tpu.dot_dimension_numbers<[1], [0], [0], [1], [0, 0, 1, 1], [], []>} : vector<8x8xbf16>, vector<8x8xbf16>, vector<8x8xf32> -> vector<8x8xf32>
    %532 = tpu.concatenate %474, %493, %512, %531 in 1 : vector<8x8xf32>, vector<8x8xf32>, vector<8x8xf32>, vector<8x8xf32> -> vector<8x32xf32>
    %c1_195 = arith.constant 1 : index
    %c0_196 = arith.constant 0 : index
    %c0_197 = arith.constant 0 : index
    %533 = vector.load %arg13[%c1_195, %c0_196, %c0_197] : memref<2x32x32xbf16, #tpu.memory_space<vmem>>, vector<1x32x32xbf16>
    %534 = vector.shape_cast %533 : vector<1x32x32xbf16> to vector<32x32xbf16>
    %c1_198 = arith.constant 1 : index
    %c0_199 = arith.constant 0 : index
    %c0_200 = arith.constant 0 : index
    %535 = vector.load %arg14[%c1_198, %c0_199, %c0_200] : memref<2x1x32xf32, #tpu.memory_space<vmem>>, vector<1x1x32xf32>
    %536 = vector.shape_cast %535 : vector<1x1x32xf32> to vector<1x32xf32>
    %537 = arith.truncf %532 : vector<8x32xf32> to vector<8x32xbf16>
    %cst_201 = arith.constant dense<0.000000e+00> : vector<8x32xf32>
    %538 = tpu.matmul %537, %534, %cst_201 {dimension_numbers = #tpu.dot_dimension_numbers<[1], [0], [0], [1], [0, 0, 1, 1], [], []>} : vector<8x32xbf16>, vector<32x32xbf16>, vector<8x32xf32> -> vector<8x32xf32>
    %539 = vector.broadcast %536 : vector<1x32xf32> to vector<8x32xf32>
    %540 = arith.addf %538, %539 : vector<8x32xf32>
    %541 = arith.addf %436, %540 : vector<8x32xf32>
    %c1_202 = arith.constant 1 : index
    %c0_203 = arith.constant 0 : index
    %c0_204 = arith.constant 0 : index
    %542 = vector.load %arg15[%c1_202, %c0_203, %c0_204] : memref<2x1x32xf32, #tpu.memory_space<vmem>>, vector<1x1x32xf32>
    %543 = vector.shape_cast %542 : vector<1x1x32xf32> to vector<1x32xf32>
    %c1_205 = arith.constant 1 : index
    %c0_206 = arith.constant 0 : index
    %c0_207 = arith.constant 0 : index
    %544 = vector.load %arg16[%c1_205, %c0_206, %c0_207] : memref<2x1x32xf32, #tpu.memory_space<vmem>>, vector<1x1x32xf32>
    %545 = vector.shape_cast %544 : vector<1x1x32xf32> to vector<1x32xf32>
    %cst_208 = arith.constant dense<0.000000e+00> : vector<8xf32>
    %546 = vector.multi_reduction <add>, %541, %cst_208 [1] : vector<8x32xf32> to vector<8xf32>
    %547 = vector.shape_cast %546 : vector<8xf32> to vector<8x1xf32>
    %cst_209 = arith.constant 3.200000e+01 : f32
    %548 = vector.broadcast %cst_209 : f32 to vector<8x1xf32>
    %549 = arith.divf %547, %548 : vector<8x1xf32>
    %550 = vector.broadcast %549 : vector<8x1xf32> to vector<8x32xf32>
    %551 = arith.subf %541, %550 : vector<8x32xf32>
    %552 = arith.mulf %551, %551 : vector<8x32xf32>
    %cst_210 = arith.constant dense<0.000000e+00> : vector<8xf32>
    %553 = vector.multi_reduction <add>, %552, %cst_210 [1] : vector<8x32xf32> to vector<8xf32>
    %554 = vector.shape_cast %553 : vector<8xf32> to vector<8x1xf32>
    %cst_211 = arith.constant 3.200000e+01 : f32
    %555 = vector.broadcast %cst_211 : f32 to vector<8x1xf32>
    %556 = arith.divf %554, %555 : vector<8x1xf32>
    %557 = vector.broadcast %549 : vector<8x1xf32> to vector<8x32xf32>
    %558 = arith.subf %541, %557 : vector<8x32xf32>
    %cst_212 = arith.constant 9.99999974E-6 : f32
    %559 = vector.broadcast %cst_212 : f32 to vector<8x1xf32>
    %560 = arith.addf %556, %559 : vector<8x1xf32>
    %561 = math.rsqrt %560 : vector<8x1xf32>
    %562 = vector.broadcast %561 : vector<8x1xf32> to vector<8x32xf32>
    %563 = arith.mulf %558, %562 : vector<8x32xf32>
    %564 = vector.broadcast %543 : vector<1x32xf32> to vector<8x32xf32>
    %565 = arith.mulf %563, %564 : vector<8x32xf32>
    %566 = vector.broadcast %545 : vector<1x32xf32> to vector<8x32xf32>
    %567 = arith.addf %565, %566 : vector<8x32xf32>
    %c1_213 = arith.constant 1 : index
    %c0_214 = arith.constant 0 : index
    %c0_215 = arith.constant 0 : index
    %568 = vector.load %arg17[%c1_213, %c0_214, %c0_215] : memref<2x32x128xbf16, #tpu.memory_space<vmem>>, vector<1x32x128xbf16>
    %569 = vector.shape_cast %568 : vector<1x32x128xbf16> to vector<32x128xbf16>
    %c1_216 = arith.constant 1 : index
    %c0_217 = arith.constant 0 : index
    %c0_218 = arith.constant 0 : index
    %570 = vector.load %arg18[%c1_216, %c0_217, %c0_218] : memref<2x1x128xf32, #tpu.memory_space<vmem>>, vector<1x1x128xf32>
    %571 = vector.shape_cast %570 : vector<1x1x128xf32> to vector<1x128xf32>
    %572 = arith.truncf %567 : vector<8x32xf32> to vector<8x32xbf16>
    %cst_219 = arith.constant dense<0.000000e+00> : vector<8x128xf32>
    %573 = tpu.matmul %572, %569, %cst_219 {dimension_numbers = #tpu.dot_dimension_numbers<[1], [0], [0], [1], [0, 0, 1, 1], [], []>} : vector<8x32xbf16>, vector<32x128xbf16>, vector<8x128xf32> -> vector<8x128xf32>
    %574 = vector.broadcast %571 : vector<1x128xf32> to vector<8x128xf32>
    %575 = arith.addf %573, %574 : vector<8x128xf32>
    %cst_220 = arith.constant 5.000000e-01 : f32
    %576 = vector.broadcast %cst_220 : f32 to vector<8x128xf32>
    %577 = arith.mulf %576, %575 : vector<8x128xf32>
    %cst_221 = arith.constant 0.707106769 : f32
    %578 = vector.broadcast %cst_221 : f32 to vector<8x128xf32>
    %579 = arith.mulf %575, %578 : vector<8x128xf32>
    %580 = math.erf %579 : vector<8x128xf32>
    %cst_222 = arith.constant 1.000000e+00 : f32
    %581 = vector.broadcast %cst_222 : f32 to vector<8x128xf32>
    %582 = arith.addf %581, %580 : vector<8x128xf32>
    %583 = arith.mulf %577, %582 : vector<8x128xf32>
    %c1_223 = arith.constant 1 : index
    %c0_224 = arith.constant 0 : index
    %c0_225 = arith.constant 0 : index
    %584 = vector.load %arg19[%c1_223, %c0_224, %c0_225] : memref<2x128x32xbf16, #tpu.memory_space<vmem>>, vector<1x128x32xbf16>
    %585 = vector.shape_cast %584 : vector<1x128x32xbf16> to vector<128x32xbf16>
    %c1_226 = arith.constant 1 : index
    %c0_227 = arith.constant 0 : index
    %c0_228 = arith.constant 0 : index
    %586 = vector.load %arg20[%c1_226, %c0_227, %c0_228] : memref<2x1x32xf32, #tpu.memory_space<vmem>>, vector<1x1x32xf32>
    %587 = vector.shape_cast %586 : vector<1x1x32xf32> to vector<1x32xf32>
    %588 = arith.truncf %583 : vector<8x128xf32> to vector<8x128xbf16>
    %cst_229 = arith.constant dense<0.000000e+00> : vector<8x32xf32>
    %589 = tpu.matmul %588, %585, %cst_229 {dimension_numbers = #tpu.dot_dimension_numbers<[1], [0], [0], [1], [0, 0, 1, 1], [], []>} : vector<8x128xbf16>, vector<128x32xbf16>, vector<8x32xf32> -> vector<8x32xf32>
    %590 = vector.broadcast %587 : vector<1x32xf32> to vector<8x32xf32>
    %591 = arith.addf %589, %590 : vector<8x32xf32>
    %592 = arith.addf %567, %591 : vector<8x32xf32>
    %c1_230 = arith.constant 1 : index
    %c0_231 = arith.constant 0 : index
    %c0_232 = arith.constant 0 : index
    %593 = vector.load %arg21[%c1_230, %c0_231, %c0_232] : memref<2x1x32xf32, #tpu.memory_space<vmem>>, vector<1x1x32xf32>
    %594 = vector.shape_cast %593 : vector<1x1x32xf32> to vector<1x32xf32>
    %c1_233 = arith.constant 1 : index
    %c0_234 = arith.constant 0 : index
    %c0_235 = arith.constant 0 : index
    %595 = vector.load %arg22[%c1_233, %c0_234, %c0_235] : memref<2x1x32xf32, #tpu.memory_space<vmem>>, vector<1x1x32xf32>
    %596 = vector.shape_cast %595 : vector<1x1x32xf32> to vector<1x32xf32>
    %cst_236 = arith.constant dense<0.000000e+00> : vector<8xf32>
    %597 = vector.multi_reduction <add>, %592, %cst_236 [1] : vector<8x32xf32> to vector<8xf32>
    %598 = vector.shape_cast %597 : vector<8xf32> to vector<8x1xf32>
    %cst_237 = arith.constant 3.200000e+01 : f32
    %599 = vector.broadcast %cst_237 : f32 to vector<8x1xf32>
    %600 = arith.divf %598, %599 : vector<8x1xf32>
    %601 = vector.broadcast %600 : vector<8x1xf32> to vector<8x32xf32>
    %602 = arith.subf %592, %601 : vector<8x32xf32>
    %603 = arith.mulf %602, %602 : vector<8x32xf32>
    %cst_238 = arith.constant dense<0.000000e+00> : vector<8xf32>
    %604 = vector.multi_reduction <add>, %603, %cst_238 [1] : vector<8x32xf32> to vector<8xf32>
    %605 = vector.shape_cast %604 : vector<8xf32> to vector<8x1xf32>
    %cst_239 = arith.constant 3.200000e+01 : f32
    %606 = vector.broadcast %cst_239 : f32 to vector<8x1xf32>
    %607 = arith.divf %605, %606 : vector<8x1xf32>
    %608 = vector.broadcast %600 : vector<8x1xf32> to vector<8x32xf32>
    %609 = arith.subf %592, %608 : vector<8x32xf32>
    %cst_240 = arith.constant 9.99999974E-6 : f32
    %610 = vector.broadcast %cst_240 : f32 to vector<8x1xf32>
    %611 = arith.addf %607, %610 : vector<8x1xf32>
    %612 = math.rsqrt %611 : vector<8x1xf32>
    %613 = vector.broadcast %612 : vector<8x1xf32> to vector<8x32xf32>
    %614 = arith.mulf %609, %613 : vector<8x32xf32>
    %615 = vector.broadcast %594 : vector<1x32xf32> to vector<8x32xf32>
    %616 = arith.mulf %614, %615 : vector<8x32xf32>
    %617 = vector.broadcast %596 : vector<1x32xf32> to vector<8x32xf32>
    %618 = arith.addf %616, %617 : vector<8x32xf32>
    %c0_241 = arith.constant 0 : index
    %c0_242 = arith.constant 0 : index
    %619 = vector.load %arg23[%c0_241, %c0_242] : memref<1x32xf32, #tpu.memory_space<vmem>>, vector<1x32xf32>
    %c0_243 = arith.constant 0 : index
    %c0_244 = arith.constant 0 : index
    %620 = vector.load %arg24[%c0_243, %c0_244] : memref<1x32xf32, #tpu.memory_space<vmem>>, vector<1x32xf32>
    %cst_245 = arith.constant dense<0.000000e+00> : vector<8xf32>
    %621 = vector.multi_reduction <add>, %618, %cst_245 [1] : vector<8x32xf32> to vector<8xf32>
    %622 = vector.shape_cast %621 : vector<8xf32> to vector<8x1xf32>
    %cst_246 = arith.constant 3.200000e+01 : f32
    %623 = vector.broadcast %cst_246 : f32 to vector<8x1xf32>
    %624 = arith.divf %622, %623 : vector<8x1xf32>
    %625 = vector.broadcast %624 : vector<8x1xf32> to vector<8x32xf32>
    %626 = arith.subf %618, %625 : vector<8x32xf32>
    %627 = arith.mulf %626, %626 : vector<8x32xf32>
    %cst_247 = arith.constant dense<0.000000e+00> : vector<8xf32>
    %628 = vector.multi_reduction <add>, %627, %cst_247 [1] : vector<8x32xf32> to vector<8xf32>
    %629 = vector.shape_cast %628 : vector<8xf32> to vector<8x1xf32>
    %cst_248 = arith.constant 3.200000e+01 : f32
    %630 = vector.broadcast %cst_248 : f32 to vector<8x1xf32>
    %631 = arith.divf %629, %630 : vector<8x1xf32>
    %632 = vector.broadcast %624 : vector<8x1xf32> to vector<8x32xf32>
    %633 = arith.subf %618, %632 : vector<8x32xf32>
    %cst_249 = arith.constant 9.99999974E-6 : f32
    %634 = vector.broadcast %cst_249 : f32 to vector<8x1xf32>
    %635 = arith.addf %631, %634 : vector<8x1xf32>
    %636 = math.rsqrt %635 : vector<8x1xf32>
    %637 = vector.broadcast %636 : vector<8x1xf32> to vector<8x32xf32>
    %638 = arith.mulf %633, %637 : vector<8x32xf32>
    %639 = vector.broadcast %619 : vector<1x32xf32> to vector<8x32xf32>
    %640 = arith.mulf %638, %639 : vector<8x32xf32>
    %641 = vector.broadcast %620 : vector<1x32xf32> to vector<8x32xf32>
    %642 = arith.addf %640, %641 : vector<8x32xf32>
    %c0_250 = arith.constant 0 : index
    %c0_251 = arith.constant 0 : index
    %643 = vector.load %arg25[%c0_250, %c0_251] : memref<32x48xbf16, #tpu.memory_space<vmem>>, vector<32x48xbf16>
    %c0_252 = arith.constant 0 : index
    %c0_253 = arith.constant 0 : index
    %644 = vector.load %arg26[%c0_252, %c0_253] : memref<1x48xf32, #tpu.memory_space<vmem>>, vector<1x48xf32>
    %645 = arith.truncf %642 : vector<8x32xf32> to vector<8x32xbf16>
    %cst_254 = arith.constant dense<0.000000e+00> : vector<8x48xf32>
    %646 = tpu.matmul %645, %643, %cst_254 {dimension_numbers = #tpu.dot_dimension_numbers<[1], [0], [0], [1], [0, 0, 1, 1], [], []>} : vector<8x32xbf16>, vector<32x48xbf16>, vector<8x48xf32> -> vector<8x48xf32>
    %647 = vector.broadcast %644 : vector<1x48xf32> to vector<8x48xf32>
    %648 = arith.addf %646, %647 : vector<8x48xf32>
    %649 = math.tanh %648 : vector<8x48xf32>
    %c0_255 = arith.constant 0 : index
    %c0_256 = arith.constant 0 : index
    %c0_257 = arith.constant 0 : index
    %650 = vector.load %arg27[%c0_255, %c0_256, %c0_257] : memref<1x8x48xf32, #tpu.memory_space<vmem>>, vector<1x8x48xf32>
    %651 = vector.shape_cast %650 : vector<1x8x48xf32> to vector<8x48xf32>
    %652 = vector.shape_cast %649 : vector<8x48xf32> to vector<1x8x48xf32>
    tpu.vector_store %arg27[%c0_255, %c0_256, %c0_257], %652 {strides = array<i32>} : memref<1x8x48xf32, #tpu.memory_space<vmem>>, vector<1x8x48xf32>,
    return
  }
  func.func @transform_0(%arg0: i32) -> (i32, i32, i32) {
    %c0_i32 = arith.constant 0 : i32
    %c0_i32_0 = arith.constant 0 : i32
    %c0_i32_1 = arith.constant 0 : i32
    return %arg0, %c0_i32, %c0_i32_0 : i32, i32, i32
  }
  func.func @transform_1(%arg0: i32) -> (i32, i32, i32) {
    %c0_i32 = arith.constant 0 : i32
    %c0_i32_0 = arith.constant 0 : i32
    %c0_i32_1 = arith.constant 0 : i32
    return %arg0, %c0_i32, %c0_i32_0 : i32, i32, i32
  }
  func.func @transform_2(%arg0: i32) -> (i32, i32, i32) {
    %c0_i32 = arith.constant 0 : i32
    %c0_i32_0 = arith.constant 0 : i32
    %c0_i32_1 = arith.constant 0 : i32
    %c0_i32_2 = arith.constant 0 : i32
    return %c0_i32, %c0_i32_0, %c0_i32_1 : i32, i32, i32
  }
  func.func @transform_3(%arg0: i32) -> (i32, i32, i32) {
    %c0_i32 = arith.constant 0 : i32
    %c0_i32_0 = arith.constant 0 : i32
    %c0_i32_1 = arith.constant 0 : i32
    %c0_i32_2 = arith.constant 0 : i32
    return %c0_i32, %c0_i32_0, %c0_i32_1 : i32, i32, i32
  }
  func.func @transform_4(%arg0: i32) -> (i32, i32, i32) {
    %c0_i32 = arith.constant 0 : i32
    %c0_i32_0 = arith.constant 0 : i32
    %c0_i32_1 = arith.constant 0 : i32
    %c0_i32_2 = arith.constant 0 : i32
    return %c0_i32, %c0_i32_0, %c0_i32_1 : i32, i32, i32
  }
  func.func @transform_5(%arg0: i32) -> (i32, i32, i32) {
    %c0_i32 = arith.constant 0 : i32
    %c0_i32_0 = arith.constant 0 : i32
    %c0_i32_1 = arith.constant 0 : i32
    %c0_i32_2 = arith.constant 0 : i32
    return %c0_i32, %c0_i32_0, %c0_i32_1 : i32, i32, i32
  }
  func.func @transform_6(%arg0: i32) -> (i32, i32, i32) {
    %c0_i32 = arith.constant 0 : i32
    %c0_i32_0 = arith.constant 0 : i32
    %c0_i32_1 = arith.constant 0 : i32
    %c0_i32_2 = arith.constant 0 : i32
    return %c0_i32, %c0_i32_0, %c0_i32_1 : i32, i32, i32
  }
  func.func @transform_7(%arg0: i32) -> (i32, i32, i32) {
    %c0_i32 = arith.constant 0 : i32
    %c0_i32_0 = arith.constant 0 : i32
    %c0_i32_1 = arith.constant 0 : i32
    %c0_i32_2 = arith.constant 0 : i32
    return %c0_i32, %c0_i32_0, %c0_i32_1 : i32, i32, i32
  }
  func.func @transform_8(%arg0: i32) -> (i32, i32, i32) {
    %c0_i32 = arith.constant 0 : i32
    %c0_i32_0 = arith.constant 0 : i32
    %c0_i32_1 = arith.constant 0 : i32
    %c0_i32_2 = arith.constant 0 : i32
    return %c0_i32, %c0_i32_0, %c0_i32_1 : i32, i32, i32
  }
  func.func @transform_9(%arg0: i32) -> (i32, i32, i32) {
    %c0_i32 = arith.constant 0 : i32
    %c0_i32_0 = arith.constant 0 : i32
    %c0_i32_1 = arith.constant 0 : i32
    %c0_i32_2 = arith.constant 0 : i32
    return %c0_i32, %c0_i32_0, %c0_i32_1 : i32, i32, i32
  }
  func.func @transform_10(%arg0: i32) -> (i32, i32, i32) {
    %c0_i32 = arith.constant 0 : i32
    %c0_i32_0 = arith.constant 0 : i32
    %c0_i32_1 = arith.constant 0 : i32
    %c0_i32_2 = arith.constant 0 : i32
    return %c0_i32, %c0_i32_0, %c0_i32_1 : i32, i32, i32
  }
  func.func @transform_11(%arg0: i32) -> (i32, i32, i32) {
    %c0_i32 = arith.constant 0 : i32
    %c0_i32_0 = arith.constant 0 : i32
    %c0_i32_1 = arith.constant 0 : i32
    %c0_i32_2 = arith.constant 0 : i32
    return %c0_i32, %c0_i32_0, %c0_i32_1 : i32, i32, i32
  }
  func.func @transform_12(%arg0: i32) -> (i32, i32, i32) {
    %c0_i32 = arith.constant 0 : i32
    %c0_i32_0 = arith.constant 0 : i32
    %c0_i32_1 = arith.constant 0 : i32
    %c0_i32_2 = arith.constant 0 : i32
    return %c0_i32, %c0_i32_0, %c0_i32_1 : i32, i32, i32
  }
  func.func @transform_13(%arg0: i32) -> (i32, i32, i32) {
    %c0_i32 = arith.constant 0 : i32
    %c0_i32_0 = arith.constant 0 : i32
    %c0_i32_1 = arith.constant 0 : i32
    %c0_i32_2 = arith.constant 0 : i32
    return %c0_i32, %c0_i32_0, %c0_i32_1 : i32, i32, i32
  }
  func.func @transform_14(%arg0: i32) -> (i32, i32, i32) {
    %c0_i32 = arith.constant 0 : i32
    %c0_i32_0 = arith.constant 0 : i32
    %c0_i32_1 = arith.constant 0 : i32
    %c0_i32_2 = arith.constant 0 : i32
    return %c0_i32, %c0_i32_0, %c0_i32_1 : i32, i32, i32
  }
  func.func @transform_15(%arg0: i32) -> (i32, i32, i32) {
    %c0_i32 = arith.constant 0 : i32
    %c0_i32_0 = arith.constant 0 : i32
    %c0_i32_1 = arith.constant 0 : i32
    %c0_i32_2 = arith.constant 0 : i32
    return %c0_i32, %c0_i32_0, %c0_i32_1 : i32, i32, i32
  }
  func.func @transform_16(%arg0: i32) -> (i32, i32, i32) {
    %c0_i32 = arith.constant 0 : i32
    %c0_i32_0 = arith.constant 0 : i32
    %c0_i32_1 = arith.constant 0 : i32
    %c0_i32_2 = arith.constant 0 : i32
    return %c0_i32, %c0_i32_0, %c0_i32_1 : i32, i32, i32
  }
  func.func @transform_17(%arg0: i32) -> (i32, i32, i32) {
    %c0_i32 = arith.constant 0 : i32
    %c0_i32_0 = arith.constant 0 : i32
    %c0_i32_1 = arith.constant 0 : i32
    %c0_i32_2 = arith.constant 0 : i32
    return %c0_i32, %c0_i32_0, %c0_i32_1 : i32, i32, i32
  }
  func.func @transform_18(%arg0: i32) -> (i32, i32, i32) {
    %c0_i32 = arith.constant 0 : i32
    %c0_i32_0 = arith.constant 0 : i32
    %c0_i32_1 = arith.constant 0 : i32
    %c0_i32_2 = arith.constant 0 : i32
    return %c0_i32, %c0_i32_0, %c0_i32_1 : i32, i32, i32
  }
  func.func @transform_19(%arg0: i32) -> (i32, i32, i32) {
    %c0_i32 = arith.constant 0 : i32
    %c0_i32_0 = arith.constant 0 : i32
    %c0_i32_1 = arith.constant 0 : i32
    %c0_i32_2 = arith.constant 0 : i32
    return %c0_i32, %c0_i32_0, %c0_i32_1 : i32, i32, i32
  }
  func.func @transform_20(%arg0: i32) -> (i32, i32, i32) {
    %c0_i32 = arith.constant 0 : i32
    %c0_i32_0 = arith.constant 0 : i32
    %c0_i32_1 = arith.constant 0 : i32
    %c0_i32_2 = arith.constant 0 : i32
    return %c0_i32, %c0_i32_0, %c0_i32_1 : i32, i32, i32
  }
  func.func @transform_21(%arg0: i32) -> (i32, i32, i32) {
    %c0_i32 = arith.constant 0 : i32
    %c0_i32_0 = arith.constant 0 : i32
    %c0_i32_1 = arith.constant 0 : i32
    %c0_i32_2 = arith.constant 0 : i32
    return %c0_i32, %c0_i32_0, %c0_i32_1 : i32, i32, i32
  }
  func.func @transform_22(%arg0: i32) -> (i32, i32) {
    %c0_i32 = arith.constant 0 : i32
    %c0_i32_0 = arith.constant 0 : i32
    %c0_i32_1 = arith.constant 0 : i32
    return %c0_i32, %c0_i32_0 : i32, i32
  }
  func.func @transform_23(%arg0: i32) -> (i32, i32) {
    %c0_i32 = arith.constant 0 : i32
    %c0_i32_0 = arith.constant 0 : i32
    %c0_i32_1 = arith.constant 0 : i32
    return %c0_i32, %c0_i32_0 : i32, i32
  }
  func.func @transform_24(%arg0: i32) -> (i32, i32) {
    %c0_i32 = arith.constant 0 : i32
    %c0_i32_0 = arith.constant 0 : i32
    %c0_i32_1 = arith.constant 0 : i32
    return %c0_i32, %c0_i32_0 : i32, i32
  }
  func.func @transform_25(%arg0: i32) -> (i32, i32) {
    %c0_i32 = arith.constant 0 : i32
    %c0_i32_0 = arith.constant 0 : i32
    %c0_i32_1 = arith.constant 0 : i32
    return %c0_i32, %c0_i32_0 : i32, i32
  }
  func.func @transform_26(%arg0: i32) -> (i32, i32, i32) {
    %c0_i32 = arith.constant 0 : i32
    %c0_i32_0 = arith.constant 0 : i32
    %c0_i32_1 = arith.constant 0 : i32
    return %arg0, %c0_i32, %c0_i32_0 : i32, i32, i32
  }
}

</mosaic_0001>

<bundles_post_ra>
// kernel: transformer_decoder_forward.1
= control target key start
LH: loop header
LB: loop body
LE: loop exit
PB: predicated region body
PF: predicated region fallthrough
CT: control target
= control target key end

     0   :  { %s4984_s27 = smov 0   ;;  %s5646_s0 = inlined_call_operand.vmem [shape: f32[2,8,32], index: 0, kind: input, shape index: {}]   ;;  %s5647_s1 = inlined_call_operand.vmem [shape: f32[2,8,32], index: 1, kind: input, shape index: {}]   ;;  %s5648_s2 = inlined_call_operand.vmem [shape: bf16[2,32,96], index: 2, kind: input, shape index: {}]   ;;  %s5649_s3 = inlined_call_operand.vmem [shape: f32[2,1,96], index: 3, kind: input, shape index: {}]   ;;  %s5650_s4 = inlined_call_operand.vmem [shape: bf16[2,32,32], index: 4, kind: input, shape index: {}]   ;;  %s5651_s5 = inlined_call_operand.vmem [shape: f32[2,1,32], index: 5, kind: input, shape index: {}]   ;;  %s5652_s6 = inlined_call_operand.vmem [shape: f32[2,1,32], index: 6, kind: input, shape index: {}]   ;;  %s5653_s7 = inlined_call_operand.vmem [shape: f32[2,1,32], index: 7, kind: input, shape index: {}]   ;;  %s5654_s8 = inlined_call_operand.vmem [shape: bf16[2,32,32], index: 8, kind: input, shape index: {}]   ;;  %s5655_s9 = inlined_call_operand.vmem [shape: f32[2,1,32], index: 9, kind: input, shape index: {}]   ;;  %s5656_s10 = inlined_call_operand.vmem [shape: bf16[2,32,64], index: 10, kind: input, shape index: {}]   ;;  %s5657_s11 = inlined_call_operand.vmem [shape: f32[2,1,64], index: 11, kind: input, shape index: {}]   ;;  %s5658_s12 = inlined_call_operand.vmem [shape: bf16[2,32,32], index: 12, kind: input, shape index: {}]   ;;  %s5659_s13 = inlined_call_operand.vmem [shape: f32[2,1,32], index: 13, kind: input, shape index: {}]   ;;  %s5660_s14 = inlined_call_operand.vmem [shape: f32[2,1,32], index: 14, kind: input, shape index: {}]   ;;  %s5661_s15 = inlined_call_operand.vmem [shape: f32[2,1,32], index: 15, kind: input, shape index: {}]   ;;  %s5662_s16 = inlined_call_operand.vmem [shape: bf16[2,32,128], index: 16, kind: input, shape index: {}]   ;;  %s5663_s17 = inlined_call_operand.vmem [shape: f32[2,1,128], index: 17, kind: input, shape index: {}]   ;;  %s5664_s18 = inlined_call_operand.vmem [shape: bf16[2,128,32], index: 18, kind: input, shape index: {}]   ;;  %s5665_s19 = inlined_call_operand.vmem [shape: f32[2,1,32], index: 19, kind: input, shape index: {}]   ;;  %s5666_s20 = inlined_call_operand.vmem [shape: f32[2,1,32], index: 20, kind: input, shape index: {}]   ;;  %s5667_s21 = inlined_call_operand.vmem [shape: f32[2,1,32], index: 21, kind: input, shape index: {}]   ;;  %s5668_s22 = inlined_call_operand.vmem [shape: f32[1,32], index: 22, kind: input, shape index: {}]   ;;  %s5669_s23 = inlined_call_operand.vmem [shape: f32[1,32], index: 23, kind: input, shape index: {}]   ;;  %s5670_s24 = inlined_call_operand.vmem [shape: bf16[32,48], index: 24, kind: input, shape index: {}]   ;;  %s5671_s25 = inlined_call_operand.vmem [shape: f32[1,48], index: 25, kind: input, shape index: {}]   ;;  %s5672_s26 = inlined_call_operand.vmem [shape: f32[2,8,48], index: 26, kind: output, shape index: {}]  }
   0x1   :  { %5712 = sst [smem:[#allocation4_spill]] %s5646_s0 }
   0x2   :  { %5713 = sst [smem:[#allocation5_spill]] %s5647_s1 }
   0x3   :  { %5714 = sst [smem:[#allocation6_spill]] %s5648_s2 }
   0x4   :  { %5715 = sst [smem:[#allocation7_spill]] %s5649_s3 }
   0x5   :  { %5716 = sst [smem:[#allocation8_spill]] %s5650_s4 }
   0x6   :  { %5717 = sst [smem:[#allocation9_spill]] %s5651_s5 }
   0x7   :  { %5718 = sst [smem:[#allocation10_spill]] %s5652_s6 }
   0x8   :  { %5719 = sst [smem:[#allocation11_spill]] %s5653_s7 }
   0x9   :  { %5720 = sst [smem:[#allocation12_spill]] %s5654_s8 }
   0xa   :  { %5721 = sst [smem:[#allocation13_spill]] %s5655_s9 }
   0xb   :  { %5722 = sst [smem:[#allocation14_spill]] %s5656_s10 }
   0xc   :  { %5723 = sst [smem:[#allocation15_spill]] %s5657_s11 }
   0xd   :  { %5724 = sst [smem:[#allocation16_spill]] %s5658_s12 }
   0xe   :  { %5725 = sst [smem:[#allocation17_spill]] %s5659_s13 }
   0xf   :  { %5726 = sst [smem:[#allocation18_spill]] %s5668_s22 }
  0x10   :  { %5727 = sst [smem:[#allocation19_spill]] %s5669_s23 }
  0x11   :  { %5728 = sst [smem:[#allocation20_spill]] %s5670_s24 }
  0x12   :  { %5729 = sst [smem:[#allocation21_spill]] %s5671_s25 }
  0x13   :  { %5730 = sst [smem:[#allocation22_spill]] %s5672_s26 }
  0x14 LB: > { %5731 = sst [smem:[#allocation2_spill]] %s4831_s27  ;;  %s4039_s3 = sadd.s32 4294967295, %s4831_s27   ;;  %s4831_s27 = sphi %s4984_s27, %s36_s27  }
  0x15   : > { %p4043_p0 = scmp.ge.s32.totalorder %s4831_s27, 1  ;;  %p720_p1 = scmp.lt.s32.totalorder %s4831_s27, 3 }
  0x17   : > { %p721_p2 = pnand %p4043_p0, %p720_p1 }
  0x19   : > { %724 = sbr.rel (%p721_p2) target bundleno = 9743 (0x260f), region = 124 }
  0x20   : > { %s5732_s8 = sld [smem:[#allocation6_spill]]  ;;  %v4833_v1 = vmov 0.0   ;;  %vm4834_vm0 = vmmov 0   ;;  %p792_p3 = scmp.lt.s32.totalorder %s4039_s3, 1  ;;  %vm832_vm1 = vcmask 261120   ;;  %vm882_vm2 = vcmask 64512  }
  0x21   : > { %4339 = vmatprep.subr.bf16.mxu1 %v4833_v1  ;;  %4353 = vmatprep.subr.bf16.mxu0 %v4833_v1  ;;  %s5734_s2 = sld [smem:[#allocation4_spill]]  ;;  %s5735_s1 = sld [smem:[#allocation7_spill]]  ;;  %vm946_vm3 = vcmask 1043456   ;;  %vm1334_vm4 = vcmask 130048   ;;  %vm1336_vm5 = vcmask 195584   ;;  %vm3972_vm6 = vcmask 392192  }
  0x22   : > { %4343 = vmatprep.mubr.msk.bf16.mxu1 %vm4834_vm0, %v4833_v1  ;;  %4355 = vmatprep.mubr.msk.bf16.mxu0 %vm4834_vm0, %v4833_v1  ;;  %s5776_s3 = smov (!%p792_p3, %s4039_s3), 1  ;;  %s5704_s7 = smov 120  }
  0x23   : > { %s5005_s0 = sshll.u32 %s5776_s3, 3  ;;  %s5698_s3 = smov 96  }
  0x24   : > { %5733 = sst [smem:[#allocation3_spill]] %s5005_s0  ;;  %s5686_s28 = smov 88  }
  0x25   : > { %s5690_s4 = smov 80   ;;  %s5702_s29 = smov 112  }
  0x26   : > { %v4699_v0 = vld [vmem:[%s5732_s8] sm:$0xff]   ;;  %v4700_v2 = vld [vmem:[%s5732_s8 + $0x8] sm:$0xff]   ;;  %s5688_s9 = smov 72   ;;  %s5700_s30 = smov 104  }
  0x27   : > { %4340 = vmatpush3.bf16.msra.mxu1 %v4699_v0  ;;  %s795_s5 = scalar_lea.vmem %s5734_s2, %s5005_s0  ;;  %v4047_v5 = vld [vmem:[%s5735_s1] ss:$0 sm:$0xff]  ;;  %s5683_s2 = smov 56  }
  0x28   : > { %4341 = vmatprep.subr.bf16.mxu1 %v4833_v1  ;;  %v5012_v3 = vld [vmem:[%s795_s5] sm:$0xff]  ;;  %s5685_s5 = smov 64   ;;  %s5682_s10 = smov 40  }
  0x29   : > { %v813_v4 = vpack.c.bf16 %v5012_v3, %v5012_v3  ;;  %s5684_s6 = smov 48   ;;  %s5742_s27 = sld [smem:[#allocation11_spill]] }
  0x2a   : > { %s5743_s11 = sld [smem:[#allocation15_spill]]  ;;  %s5751_s25 = smov 88  }
  0x2b   : > { %4342 = vmatpush3.bf16.msra.mxu1 %v4700_v2  ;;  %s5752_s12 = sld [smem:[#allocation16_spill]]  ;;  %s5755_s22 = smov 24  }
  0x2c   : > { %4347 = vmatprep.subr.bf16.mxu1 %v4833_v1  ;;  %s5756_s13 = sld [smem:[#allocation17_spill]]  ;;  %s5757_s23 = smov 64  }
  0x2d   : > { %s5758_s24 = smov 48   ;;  %s5762_s26 = sld [smem:[#allocation10_spill]] }
  0x2e   : > { %4344 = vmatmul.mubr.msk.bf16.vlgmr.msra.gmra.mrb[0].mxu1 %vm832_vm1, %v813_v4 }
  0x2f   : > { %4349 = vmatprep.mubr.msk.bf16.mxu1 %vm4834_vm0, %v4833_v1 }
 0x101   : > { %v870_v6 = vpop.f32.mrb[0].mxu1 }
 0x102   : > { %v871_v7 = vadd.f32 %v4047_v5, %v870_v6  ;;  %v4345_v8 = vpop.f32.mrb[1].mxu1 }
 0x103   : > { %v873_v9 = vpop.f32.mrb[2].mxu1 }
 0x104   : > { %v876_v10 = vmul.f32 0.35355338, %v871_v7  ;;  %v5022_v11 = vpack.c.bf16 %v871_v7, %v871_v7  ;;  %v4346_v12 = vpop.f32.mrb[3].mxu1 }
 0x106   : > { %v877_v13 = vpack.c.bf16 %v876_v10, %v876_v10  ;;  %880 = vrot.lane.b32.xlu0 %v5022_v11, %s5698_s3  ;;  %s5747_s3 = sld [smem:[#allocation13_spill]] }
 0x108   : > { %991 = vrot.lane.b32.xlu1 %v877_v13, %s5704_s7 }
 0x10a   : > { %993 = vrot.lane.b32.xlu0 %v5022_v11, %s5686_s28  ;;  %s5749_s28 = smov 80  }
 0x10c   : > { %1103 = vrot.lane.b32.xlu1 %v5022_v11, %s5690_s4  ;;  %s5694_s4 = smov 16  }
 0x10e   : > { %1101 = vrot.lane.b32.xlu0 %v877_v13, %s5702_s29  ;;  %s5739_s29 = sld [smem:[#allocation5_spill]] }
 0x110   : > { %1213 = vrot.lane.b32.xlu1 %v5022_v11, %s5688_s9  ;;  %s5750_s9 = smov 72  }
 0x112   : > { %1211 = vrot.lane.b32.xlu0 %v877_v13, %s5700_s30  ;;  %s5746_s30 = smov 104  }
 0x114   : > { %s799_s7 = scalar_lea.vmem %s5739_s29, %s5005_s0  ;;  %s5748_s29 = smov 96  }
 0x115   : > { %s5753_s0 = smov 8  }
 0x178   : > { %v881_v14 = vpop.permute.xlu0 %880 }
 0x179   : > { %v887_v15 = vsel %vm882_vm2, %v881_v14, 0 }
 0x17a   : > { %4348 = vmatpush3.bf16.xpose.msra.mxu1 %v887_v15  ;;  %v992_v17 = vpop.permute.xlu1 %991 }
 0x17b   : > { %4359 = vmatprep.subr.bf16.mxu1 %v4833_v1 }
 0x17c   : > { %v994_v16 = vpop.permute.xlu0 %993 }
 0x17d   : > { %v999_v18 = vsel %vm882_vm2, %v994_v16, 0 }
 0x17e   : > { %v1104_v19 = vpop.permute.xlu1 %1103 }
 0x17f   : > { %v1109_v20 = vsel %vm882_vm2, %v1104_v19, 0 }
 0x180   : > { %v1102_v22 = vpop.permute.xlu0 %1101 }
 0x181   : > { %4350 = vmatmul.mubr.msk.bf16.vlgmr.msra.gmra.mrb[4].mxu1 %vm882_vm2, %v877_v13 }
 0x182   : > { %4360 = vmatpush3.bf16.xpose.msra.mxu1 %v999_v18  ;;  %4361 = vmatprep.mubr.msk.bf16.mxu1 %vm4834_vm0, %v4833_v1  ;;  %v1214_v21 = vpop.permute.xlu1 %1213 }
 0x183   : > { %4371 = vmatprep.subr.bf16.mxu1 %v4833_v1  ;;  %v1219_v23 = vsel %vm882_vm2, %v1214_v21, 0 }
 0x184   : > { %v1212_v24 = vpop.permute.xlu0 %1211 }
 0x189   : > { %4362 = vmatmul.mubr.msk.bf16.vlgmr.msra.gmra.mrb[8].mxu1 %vm882_vm2, %v992_v17 }
 0x18a   : > { %4372 = vmatpush3.bf16.xpose.msra.mxu1 %v1109_v20  ;;  %4373 = vmatprep.mubr.msk.bf16.mxu1 %vm4834_vm0, %v4833_v1 }
 0x18b   : > { %4383 = vmatprep.subr.bf16.mxu1 %v4833_v1 }
 0x191   : > { %4374 = vmatmul.mubr.msk.bf16.vlgmr.msra.gmra.mrb[12].mxu1 %vm882_vm2, %v1102_v22 }
 0x192   : > { %4384 = vmatpush3.bf16.xpose.msra.mxu1 %v1219_v23  ;;  %4385 = vmatprep.mubr.msk.bf16.mxu1 %vm4834_vm0, %v4833_v1 }
 0x193   : > { %4395 = vmatprep.subr.bf16.mxu1 %v4833_v1 }
 0x199   : > { %4386 = vmatmul.mubr.msk.bf16.vlgmr.msra.gmra.mrb[16].mxu1 %vm882_vm2, %v1212_v24 }
 0x19a   : > { %4399 = vmatprep.mubr.msk.bf16.mxu1 %vm4834_vm0, %v4833_v1 }
 0x254   : > { %v923_v25 = vpop.f32.mrb[4].mxu1 }
 0x255   : > { %v4351_v26 = vpop.f32.mrb[5].mxu1  ;;  %v929_v27 = vsel %vm882_vm2, %v923_v25, -inf }
 0x256   : > { %930 = vmax.xlane.f32.xlu1 %v929_v27  ;;  %v926_v28 = vpop.f32.mrb[6].mxu1 }
 0x257   : > { %v4352_v29 = vpop.f32.mrb[7].mxu1 }
 0x25c   : > { %v1035_v30 = vpop.f32.mrb[8].mxu1 }
 0x25d   : > { %v4363_v31 = vpop.f32.mrb[9].mxu1  ;;  %v1041_v32 = vsel %vm882_vm2, %v1035_v30, -inf }
 0x25e   : > { %1042 = vmax.xlane.f32.xlu0 %v1041_v32  ;;  %v1038_v33 = vpop.f32.mrb[10].mxu1 }
 0x25f   : > { %v4364_v34 = vpop.f32.mrb[11].mxu1 }
 0x264   : > { %v1145_v35 = vpop.f32.mrb[12].mxu1 }
 0x265   : > { %v4375_v36 = vpop.f32.mrb[13].mxu1  ;;  %v1151_v37 = vsel %vm882_vm2, %v1145_v35, -inf }
 0x266   : > { %1152 = vmax.xlane.f32.xlu0 %v1151_v37  ;;  %v1148_v38 = vpop.f32.mrb[14].mxu1 }
 0x267   : > { %v4376_v39 = vpop.f32.mrb[15].mxu1 }
 0x26c   : > { %v1255_v40 = vpop.f32.mrb[16].mxu1 }
 0x26d   : > { %v4387_v41 = vpop.f32.mrb[17].mxu1  ;;  %v1261_v42 = vsel %vm882_vm2, %v1255_v40, -inf }
 0x26e   : > { %1262 = vmax.xlane.f32.xlu1 %v1261_v42  ;;  %v1258_v43 = vpop.f32.mrb[18].mxu1 }
 0x26f   : > { %v4388_v44 = vpop.f32.mrb[19].mxu1 }
 0x2e3   : > { %v931_v45 = vpop.xlane.xlu1 %930 }
 0x2e4   : > { %v932_v46 = vsub.f32 %v923_v25, %v931_v45 }
 0x2e6   : > { %v933_v47 = vmul.f32 1.442695, %v932_v46 }
 0x2e8   : > { %4741 = vpow2.f32 %v933_v47 }
 0x2eb   : > { %v1043_v48 = vpop.xlane.xlu0 %1042 }
 0x2ec   : > { %v1044_v49 = vsub.f32 %v1035_v30, %v1043_v48 }
 0x2ee   : > { %v1045_v50 = vmul.f32 1.442695, %v1044_v49 }
 0x2f0   : > { %4743 = vpow2.f32 %v1045_v50 }
 0x2f2   : > { %v4742_v51 = vpop.eup %4741 }
 0x2f3   : > { %v1153_v52 = vpop.xlane.xlu0 %1152  ;;  %v935_v53 = vsel %vm882_vm2, %v4742_v51, 0.0 }
 0x2f4   : > { %v1154_v54 = vsub.f32 %v1145_v35, %v1153_v52  ;;  %936 = vadd.xlane.f32.xlu0 %v935_v53 }
 0x2f6   : > { %v1155_v55 = vmul.f32 1.442695, %v1154_v54 }
 0x2f8   : > { %4745 = vpow2.f32 %v1155_v55 }
 0x2fa   : > { %v4744_v56 = vpop.eup %4743 }
 0x2fb   : > { %v1047_v57 = vsel %vm882_vm2, %v4744_v56, 0.0  ;;  %v1263_v60 = vpop.xlane.xlu1 %1262 }
 0x2fc   : > { %1048 = vadd.xlane.f32.xlu1 %v1047_v57  ;;  %v1264_v61 = vsub.f32 %v1255_v40, %v1263_v60 }
 0x2fe   : > { %v1265_v62 = vmul.f32 1.442695, %v1264_v61 }
 0x300   : > { %4747 = vpow2.f32 %v1265_v62 }
 0x302   : > { %v4746_v58 = vpop.eup %4745 }
 0x303   : > { %v1157_v59 = vsel %vm882_vm2, %v4746_v58, 0.0 }
 0x304   : > { %1158 = vadd.xlane.f32.xlu0 %v1157_v59 }
 0x30a   : > { %v4748_v63 = vpop.eup %4747 }
 0x30b   : > { %v1267_v0 = vsel %vm882_vm2, %v4748_v63, 0.0 }
 0x30d   : > { %1053 = vrot.lane.b32.xlu1 %v5022_v11, %s5683_s2  ;;  %s5692_s2 = smov 24  }
 0x31a   : > { %941 = vrot.lane.b32.xlu0 %v5022_v11, %s5685_s5  ;;  %s5736_s5 = sld [smem:[#allocation8_spill]] }
 0x31e   : > { %1273 = vrot.lane.b32.xlu0 %v5022_v11, %s5682_s10  ;;  %s5696_s10 = smov 8  }
 0x320   : > { %v4701_v35 = vld [vmem:[%s5736_s5] sm:$0xff]   ;;  %v4702_v36 = vld [vmem:[%s5736_s5 + $0x8] sm:$0xff]  }
 0x321   : > { %4396 = vmatpush3.bf16.msra.mxu1 %v4701_v35 }
 0x322   : > { %4397 = vmatprep.subr.bf16.mxu1 %v4833_v1 }
 0x325   : > { %4398 = vmatpush3.bf16.msra.mxu1 %v4702_v36 }
 0x326   : > { %4411 = vmatprep.subr.bf16.mxu1 %v4833_v1 }
 0x331   : > { %1268 = vadd.xlane.f32.xlu1 %v1267_v0 }
 0x342   : > { %1163 = vrot.lane.b32.xlu1 %v5022_v11, %s5684_s6  ;;  %s5737_s6 = sld [smem:[#allocation9_spill]] }
 0x348   : > { %v4059_v52 = vld [vmem:[%s5737_s6] ss:$0 sm:$0xff] }
 0x381   : > { %v937_v2 = vpop.xlane.xlu0 %936 }
 0x382   : > { %4749 = vrcp.f32 %v937_v2 }
 0x389   : > { %v1049_v4 = vpop.xlane.xlu1 %1048 }
 0x38a   : > { %4751 = vrcp.f32 %v1049_v4  ;;  %v806_v4 = vld [vmem:[%s799_s7] sm:$0xff]  ;;  %s5745_s7 = smov 112  }
 0x38c   : > { %v4750_v5 = vpop.eup %4749 }
 0x38d   : > { %v939_v7 = vmul.f32 %v4750_v5, %v4742_v51  ;;  %v1054_v10 = vpop.permute.xlu1 %1053  ;;  %v5125_v5 = vpack.c.bf16 %v806_v4, %v806_v4 }
 0x38e   : > { %v1059_v14 = vsel %vm946_vm3, %v1054_v10, 0 }
 0x38f   : > { %v940_v12 = vpack.c.bf16 %v939_v7, %v939_v7 }
 0x391   : > { %v1159_v6 = vpop.xlane.xlu0 %1158 }
 0x392   : > { %4753 = vrcp.f32 %v1159_v6 }
 0x394   : > { %v4752_v13 = vpop.eup %4751 }
 0x395   : > { %v942_v8 = vpop.permute.xlu0 %941  ;;  %v1051_v11 = vmul.f32 %v4752_v13, %v4744_v56 }
 0x396   : > { %v948_v9 = vsel %vm946_vm3, %v942_v8, 0 }
 0x397   : > { %4354 = vmatpush3.bf16.msra.mxu0 %v948_v9  ;;  %v1052_v15 = vpack.c.bf16 %v1051_v11, %v1051_v11  ;;  %v4064_v11 = vld [vmem:[%s5742_s27] ss:$0 sm:$0xff]  ;;  %s5744_s27 = smov 120  }
 0x398   : > { %4365 = vmatprep.subr.bf16.mxu0 %v4833_v1 }
 0x399   : > { %v1274_v21 = vpop.permute.xlu0 %1273 }
 0x39a   : > { %4356 = vmatmul.mubr.msk.bf16.vlgmr.msra.gmra.mrb[0].mxu0 %vm882_vm2, %v940_v12  ;;  %v1279_v23 = vsel %vm946_vm3, %v1274_v21, 0 }
 0x39b   : > { %4366 = vmatpush3.bf16.msra.mxu0 %v1059_v14  ;;  %4367 = vmatprep.mubr.msk.bf16.mxu0 %vm4834_vm0, %v4833_v1 }
 0x39c   : > { %4377 = vmatprep.subr.bf16.mxu0 %v4833_v1  ;;  %v4754_v16 = vpop.eup %4753 }
 0x39d   : > { %v1161_v18 = vmul.f32 %v4754_v16, %v4746_v58 }
 0x39f   : > { %v1162_v22 = vpack.c.bf16 %v1161_v18, %v1161_v18  ;;  %v4069_v18 = vld [vmem:[%s5743_s11] ss:$0 sm:$0xff]  ;;  %s5754_s11 = smov 16  }
 0x3a2   : > { %4368 = vmatmul.mubr.msk.bf16.vlgmr.msra.gmra.mrb[4].mxu0 %vm882_vm2, %v1052_v15 }
 0x3a3   : > { %4379 = vmatprep.mubr.msk.bf16.mxu0 %vm4834_vm0, %v4833_v1 }
 0x3be   : > { %v1269_v17 = vpop.xlane.xlu1 %1268 }
 0x3bf   : > { %4755 = vrcp.f32 %v1269_v17 }
 0x3c2   : > { %v1164_v19 = vpop.permute.xlu1 %1163 }
 0x3c3   : > { %v1169_v20 = vsel %vm946_vm3, %v1164_v19, 0 }
 0x3c4   : > { %4378 = vmatpush3.bf16.msra.mxu0 %v1169_v20 }
 0x3c5   : > { %4389 = vmatprep.subr.bf16.mxu0 %v4833_v1 }
 0x3c7   : > { %4380 = vmatmul.mubr.msk.bf16.vlgmr.msra.gmra.mrb[8].mxu0 %vm882_vm2, %v1162_v22 }
 0x3c8   : > { %4390 = vmatpush3.bf16.msra.mxu0 %v1279_v23  ;;  %4391 = vmatprep.mubr.msk.bf16.mxu0 %vm4834_vm0, %v4833_v1 }
 0x3c9   : > { %v4756_v24 = vpop.eup %4755  ;;  %4403 = vmatprep.subr.bf16.mxu0 %v4833_v1 }
 0x3ca   : > { %v1271_v25 = vmul.f32 %v4756_v24, %v4748_v63 }
 0x3cc   : > { %v1272_v26 = vpack.c.bf16 %v1271_v25, %v1271_v25 }
 0x3cf   : > { %4392 = vmatmul.mubr.msk.bf16.vlgmr.msra.gmra.mrb[12].mxu0 %vm882_vm2, %v1272_v26  ;;  %v4065_v26 = vld [vmem:[%s5747_s3] ss:$0 sm:$0xff]  ;;  %s5759_s3 = smov 56  }
 0x3d0   : > { %4407 = vmatprep.mubr.msk.bf16.mxu0 %vm4834_vm0, %v4833_v1 }
 0x46d   : > { %v984_v27 = vpop.f32.mrb[0].mxu0 }
 0x46e   : > { %v4357_v28 = vpop.f32.mrb[1].mxu0 }
 0x46f   : > { %v987_v29 = vpop.f32.mrb[2].mxu0 }
 0x470   : > { %v4358_v30 = vpop.f32.mrb[3].mxu0 }
 0x475   : > { %v1095_v31 = vpop.f32.mrb[4].mxu0 }
 0x476   : > { %1322 = vrot.lane.b32.xlu1 %v1095_v31, %s5696_s10  ;;  %v4369_v32 = vpop.f32.mrb[5].mxu0  ;;  %s5741_s10 = sld [smem:[#allocation10_spill]] }
 0x477   : > { %v1098_v33 = vpop.f32.mrb[6].mxu0 }
 0x478   : > { %v4370_v34 = vpop.f32.mrb[7].mxu0 }
 0x47c   : > { %v4063_v13 = vld [vmem:[%s5741_s10] ss:$0 sm:$0xff] }
 0x49a   : > { %v1205_v37 = vpop.f32.mrb[8].mxu0 }
 0x49b   : > { %1326 = vrot.lane.b32.xlu0 %v1205_v37, %s5694_s4  ;;  %v4381_v38 = vpop.f32.mrb[9].mxu0  ;;  %s5740_s4 = sld [smem:[#allocation12_spill]] }
 0x49c   : > { %v1208_v39 = vpop.f32.mrb[10].mxu0 }
 0x49d   : > { %v4382_v40 = vpop.f32.mrb[11].mxu0 }
 0x4a1   : > { %v4705_v6 = vld [vmem:[%s5740_s4] sm:$0xff]   ;;  %v4706_v7 = vld [vmem:[%s5740_s4 + $0x8] sm:$0xff]  }
 0x4a2   : > { %v1315_v41 = vpop.f32.mrb[12].mxu0  ;;  %4404 = vmatpush3.bf16.msra.mxu0 %v4705_v6 }
 0x4a3   : > { %1330 = vrot.lane.b32.xlu1 %v1315_v41, %s5692_s2  ;;  %v4393_v42 = vpop.f32.mrb[13].mxu0  ;;  %s5738_s2 = sld [smem:[#allocation14_spill]]  ;;  %4405 = vmatprep.subr.bf16.mxu0 %v4833_v1 }
 0x4a4   : > { %v1318_v43 = vpop.f32.mrb[14].mxu0 }
 0x4a5   : > { %v4394_v44 = vpop.f32.mrb[15].mxu0 }
 0x4a6   : > { %4406 = vmatpush3.bf16.msra.mxu0 %v4706_v7 }
 0x4a7   : > { %4419 = vmatprep.subr.bf16.mxu0 %v4833_v1 }
 0x4a9   : > { %v4703_v2 = vld [vmem:[%s5738_s2] sm:$0xff]  }
 0x4e8   : > { %v1323_v45 = vpop.permute.xlu1 %1322 }
 0x4e9   : > { %v1333_v47 = vsel %vm882_vm2, %v984_v27, %v1323_v45 }
 0x50d   : > { %v1327_v46 = vpop.permute.xlu0 %1326 }
 0x50e   : > { %v1335_v48 = vsel %vm1334_vm4, %v1333_v47, %v1327_v46 }
 0x515   : > { %v1331_v49 = vpop.permute.xlu1 %1330 }
 0x516   : > { %v1337_v50 = vsel %vm1336_vm5, %v1335_v48, %v1331_v49 }
 0x517   : > { %v1343_v51 = vpack.c.bf16 %v1337_v50, %v1337_v50 }
 0x519   : > { %4400 = vmatmul.mubr.msk.bf16.vlgmr.msra.gmra.mrb[20].mxu1 %vm832_vm1, %v1343_v51 }
 0x51a   : > { %4415 = vmatprep.mubr.msk.bf16.mxu1 %vm4834_vm0, %v4833_v1  ;;  %4412 = vmatpush3.bf16.msra.mxu1 %v4703_v2 }
 0x51b   : > { %4413 = vmatprep.subr.bf16.mxu1 %v4833_v1 }
 0x5ec   : > { %v1399_v53 = vpop.f32.mrb[20].mxu1 }
 0x5ed   : > { %v1400_v54 = vadd.f32 %v4059_v52, %v1399_v53  ;;  %v4401_v55 = vpop.f32.mrb[21].mxu1 }
 0x5ee   : > { %v1402_v56 = vpop.f32.mrb[22].mxu1 }
 0x5ef   : > { %v4402_v57 = vpop.f32.mrb[23].mxu1  ;;  %v1405_v58 = vadd.f32 %v1400_v54, %v5012_v3  ;;  %v4704_v3 = vld [vmem:[%s5738_s2 + $0x8] sm:$0xff]  }
 0x5f0   : > { %4414 = vmatpush3.bf16.msra.mxu1 %v4704_v3 }
 0x5f1   : > { %v1408_v59 = vsel %vm832_vm1, %v1405_v58, 0.0  ;;  %4425 = vmatprep.subr.bf16.mxu1 %v4833_v1 }
 0x5f2   : > { %1409 = vadd.xlane.f32.xlu0 %v1408_v59 }
 0x5f3   : > { %4416 = vmatmul.mubr.msk.bf16.vlgmr.msra.gmra.mrb[24].mxu1 %vm832_vm1, %v5125_v5 }
 0x5f4   : > { %4427 = vmatprep.mubr.msk.bf16.mxu1 %vm4834_vm0, %v4833_v1 }
 0x67f   : > { %v1410_v60 = vpop.xlane.xlu0 %1409 }
 0x680   : > { %v1412_v61 = vmul.f32 0.03125, %v1410_v60 }
 0x682   : > { %v1413_v62 = vsub.f32 %v1405_v58, %v1412_v61 }
 0x684   : > { %v1414_v63 = vmul.f32 %v1413_v62, %v1413_v62 }
 0x686   : > { %v1415_v0 = vsel %vm832_vm1, %v1414_v63, 0.0 }
 0x687   : > { %1416 = vadd.xlane.f32.xlu1 %v1415_v0 }
 0x6c6   : > { %v1563_v19 = vpop.f32.mrb[24].mxu1 }
 0x6c7   : > { %v1564_v20 = vadd.f32 %v4069_v18, %v1563_v19  ;;  %v4417_v21 = vpop.f32.mrb[25].mxu1 }
 0x6c8   : > { %v1566_v22 = vpop.f32.mrb[26].mxu1 }
 0x6c9   : > { %v5156_v23 = vpack.c.bf16 %v1564_v20, %v1564_v20  ;;  %v4418_v24 = vpop.f32.mrb[27].mxu1 }
 0x6cb   : > { %1682 = vrot.lane.b32.xlu0 %v5156_v23, %s5744_s27  ;;  %v1576_v25 = vsel %vm882_vm2, %v5156_v23, 0 }
 0x6cf   : > { %1792 = vrot.lane.b32.xlu0 %v5156_v23, %s5745_s7 }
 0x6d3   : > { %1902 = vrot.lane.b32.xlu0 %v5156_v23, %s5746_s30 }
 0x714   : > { %v1417_v8 = vpop.xlane.xlu1 %1416 }
 0x715   : > { %v1418_v9 = vmul.f32 0.03125, %v1417_v8 }
 0x717   : > { %v1419_v10 = vadd.f32 1e-05, %v1418_v9 }
 0x719   : > { %4757 = vrsqrt.f32 %v1419_v10 }
 0x723   : > { %v4758_v12 = vpop.eup %4757 }
 0x724   : > { %v1421_v14 = vmul.f32 %v4758_v12, %v1413_v62 }
 0x726   : > { %v1428_v15 = vmul.f32 %v4063_v13, %v1421_v14 }
 0x728   : > { %v5146_v16 = vadd.f32 %v4064_v11, %v1428_v15 }
 0x72a   : > { %v1441_v17 = vpack.c.bf16 %v5146_v16, %v5146_v16 }
 0x72c   : > { %4408 = vmatmul.mubr.msk.bf16.vlgmr.msra.gmra.mrb[16].mxu0 %vm832_vm1, %v1441_v17 }
 0x72d   : > { %4421 = vmatprep.mubr.msk.bf16.mxu0 %vm4834_vm0, %v4833_v1  ;;  %4420 = vmatpush3.bf16.xpose.msra.mxu0 %v1576_v25 }
 0x72e   : > { %4431 = vmatprep.subr.bf16.mxu0 %v4833_v1 }
 0x73d   : > { %v1683_v33 = vpop.permute.xlu0 %1682 }
 0x73e   : > { %v1688_v35 = vsel %vm882_vm2, %v1683_v33, 0 }
 0x741   : > { %v1793_v36 = vpop.permute.xlu0 %1792 }
 0x742   : > { %v1798_v38 = vsel %vm882_vm2, %v1793_v36, 0 }
 0x745   : > { %v1903_v39 = vpop.permute.xlu0 %1902 }
 0x746   : > { %v1908_v41 = vsel %vm882_vm2, %v1903_v39, 0 }
 0x7ff   : > { %v1497_v27 = vpop.f32.mrb[16].mxu0 }
 0x800   : > { %v1498_v28 = vadd.f32 %v4065_v26, %v1497_v27  ;;  %v4409_v29 = vpop.f32.mrb[17].mxu0 }
 0x801   : > { %v1500_v30 = vpop.f32.mrb[18].mxu0 }
 0x802   : > { %v1569_v31 = vmul.f32 0.35355338, %v1498_v28  ;;  %v4410_v32 = vpop.f32.mrb[19].mxu0 }
 0x804   : > { %v1570_v34 = vpack.c.bf16 %v1569_v31, %v1569_v31 }
 0x806   : > { %1680 = vrot.lane.b32.xlu1 %v1570_v34, %s5744_s27  ;;  %4422 = vmatmul.mubr.msk.bf16.vlgmr.msra.gmra.mrb[20].mxu0 %vm882_vm2, %v1570_v34 }
 0x807   : > { %4432 = vmatpush3.bf16.xpose.msra.mxu0 %v1688_v35  ;;  %4433 = vmatprep.mubr.msk.bf16.mxu0 %vm4834_vm0, %v4833_v1 }
 0x808   : > { %4443 = vmatprep.subr.bf16.mxu0 %v4833_v1 }
 0x80a   : > { %1790 = vrot.lane.b32.xlu1 %v1570_v34, %s5745_s7 }
 0x80e   : > { %1900 = vrot.lane.b32.xlu1 %v1570_v34, %s5746_s30 }
 0x878   : > { %v1681_v37 = vpop.permute.xlu1 %1680 }
 0x879   : > { %4434 = vmatmul.mubr.msk.bf16.vlgmr.msra.gmra.mrb[24].mxu0 %vm882_vm2, %v1681_v37 }
 0x87a   : > { %4444 = vmatpush3.bf16.xpose.msra.mxu0 %v1798_v38  ;;  %4445 = vmatprep.mubr.msk.bf16.mxu0 %vm4834_vm0, %v4833_v1 }
 0x87b   : > { %4455 = vmatprep.subr.bf16.mxu0 %v4833_v1 }
 0x87c   : > { %v1791_v40 = vpop.permute.xlu1 %1790 }
 0x880   : > { %v1901_v42 = vpop.permute.xlu1 %1900 }
 0x881   : > { %4446 = vmatmul.mubr.msk.bf16.vlgmr.msra.gmra.mrb[28].mxu0 %vm882_vm2, %v1791_v40 }
 0x882   : > { %4456 = vmatpush3.bf16.xpose.msra.mxu0 %v1908_v41  ;;  %4457 = vmatprep.mubr.msk.bf16.mxu0 %vm4834_vm0, %v4833_v1 }
 0x883   : > { %4467 = vmatprep.subr.bf16.mxu0 %v4833_v1 }
 0x889   : > { %4458 = vmatmul.mubr.msk.bf16.vlgmr.msra.gmra.mrb[32].mxu0 %vm882_vm2, %v1901_v42 }
 0x88a   : > { %4471 = vmatprep.mubr.msk.bf16.mxu0 %vm4834_vm0, %v4833_v1 }
 0x8d9   : > { %v1612_v43 = vpop.f32.mrb[20].mxu0 }
 0x8da   : > { %v4423_v44 = vpop.f32.mrb[21].mxu0  ;;  %v1618_v45 = vsel %vm882_vm2, %v1612_v43, -inf }
 0x8db   : > { %1619 = vmax.xlane.f32.xlu0 %v1618_v45  ;;  %v1615_v46 = vpop.f32.mrb[22].mxu0 }
 0x8dc   : > { %v4424_v47 = vpop.f32.mrb[23].mxu0 }
 0x94c   : > { %v1724_v48 = vpop.f32.mrb[24].mxu0 }
 0x94d   : > { %v4435_v49 = vpop.f32.mrb[25].mxu0  ;;  %v1730_v50 = vsel %vm882_vm2, %v1724_v48, -inf }
 0x94e   : > { %1731 = vmax.xlane.f32.xlu1 %v1730_v50  ;;  %v1727_v51 = vpop.f32.mrb[26].mxu0  ;;  %v4707_v50 = vld [vmem:[%s5752_s12] sm:$0xff]  }
 0x94f   : > { %v4436_v52 = vpop.f32.mrb[27].mxu0  ;;  %4468 = vmatpush3.bf16.msra.mxu0 %v4707_v50 }
 0x950   : > { %4469 = vmatprep.subr.bf16.mxu0 %v4833_v1 }
 0x954   : > { %v1834_v53 = vpop.f32.mrb[28].mxu0 }
 0x955   : > { %v4447_v54 = vpop.f32.mrb[29].mxu0  ;;  %v1840_v55 = vsel %vm882_vm2, %v1834_v53, -inf }
 0x956   : > { %1841 = vmax.xlane.f32.xlu0 %v1840_v55  ;;  %v1837_v56 = vpop.f32.mrb[30].mxu0  ;;  %v4708_v55 = vld [vmem:[%s5752_s12 + $0x8] sm:$0xff]  }
 0x957   : > { %v4448_v57 = vpop.f32.mrb[31].mxu0  ;;  %4470 = vmatpush3.bf16.msra.mxu0 %v4708_v55 }
 0x958   : > { %4483 = vmatprep.subr.bf16.mxu0 %v4833_v1 }
 0x95c   : > { %v1944_v58 = vpop.f32.mrb[32].mxu0 }
 0x95d   : > { %v4459_v59 = vpop.f32.mrb[33].mxu0  ;;  %v1950_v60 = vsel %vm882_vm2, %v1944_v58, -inf }
 0x95e   : > { %1951 = vmax.xlane.f32.xlu0 %v1950_v60  ;;  %v1947_v61 = vpop.f32.mrb[34].mxu0 }
 0x95f   : > { %v4460_v62 = vpop.f32.mrb[35].mxu0 }
 0x968   : > { %v1620_v63 = vpop.xlane.xlu0 %1619 }
 0x969   : > { %v1621_v0 = vsub.f32 %v1612_v43, %v1620_v63 }
 0x96b   : > { %v1622_v2 = vmul.f32 1.442695, %v1621_v0 }
 0x96d   : > { %4759 = vpow2.f32 %v1622_v2 }
 0x977   : > { %v4760_v3 = vpop.eup %4759 }
 0x978   : > { %v1624_v4 = vsel %vm882_vm2, %v4760_v3, 0.0 }
 0x979   : > { %1625 = vadd.xlane.f32.xlu1 %v1624_v4 }
 0x98a   : > { %1631 = vrot.lane.b32.xlu1 %v5156_v23, %s5748_s29 }
 0x9db   : > { %v1732_v6 = vpop.xlane.xlu1 %1731 }
 0x9dc   : > { %v1733_v7 = vsub.f32 %v1724_v48, %v1732_v6 }
 0x9de   : > { %v1734_v8 = vmul.f32 1.442695, %v1733_v7 }
 0x9e0   : > { %4761 = vpow2.f32 %v1734_v8 }
 0x9e3   : > { %v1842_v9 = vpop.xlane.xlu0 %1841 }
 0x9e4   : > { %v1843_v10 = vsub.f32 %v1834_v53, %v1842_v9  ;;  %v4081_v9 = vld [vmem:[%s5756_s13] ss:$0 sm:$0xff]  ;;  %s5760_s13 = smov 40  }
 0x9e6   : > { %v1844_v12 = vmul.f32 1.442695, %v1843_v10 }
 0x9e8   : > { %4763 = vpow2.f32 %v1844_v12 }
 0x9ea   : > { %v4762_v13 = vpop.eup %4761 }
 0x9eb   : > { %v1952_v14 = vpop.xlane.xlu0 %1951  ;;  %v1736_v11 = vsel %vm882_vm2, %v4762_v13, 0.0 }
 0x9ec   : > { %v1953_v15 = vsub.f32 %v1944_v58, %v1952_v14  ;;  %1737 = vadd.xlane.f32.xlu0 %v1736_v11 }
 0x9ee   : > { %v1954_v17 = vmul.f32 1.442695, %v1953_v15 }
 0x9f0   : > { %4765 = vpow2.f32 %v1954_v17 }
 0x9f2   : > { %v4764_v18 = vpop.eup %4763 }
 0x9f3   : > { %v1846_v19 = vsel %vm882_vm2, %v4764_v18, 0.0 }
 0x9f4   : > { %1847 = vadd.xlane.f32.xlu1 %v1846_v19 }
 0x9fa   : > { %v4766_v20 = vpop.eup %4765 }
 0x9fb   : > { %v1956_v21 = vsel %vm882_vm2, %v4766_v20, 0.0 }
 0x9fc   : > { %1957 = vadd.xlane.f32.xlu0 %v1956_v21 }
 0xa05   : > { %1852 = vrot.lane.b32.xlu1 %v5156_v23, %s5749_s28 }
 0xa06   : > { %v1626_v22 = vpop.xlane.xlu1 %1625 }
 0xa07   : > { %4767 = vrcp.f32 %v1626_v22 }
 0xa09   : > { %1962 = vrot.lane.b32.xlu1 %v5156_v23, %s5750_s9 }
 0xa0a   : > { %v1632_v24 = vpop.permute.xlu1 %1631 }
 0xa0b   : > { %v1637_v25 = vsel %vm946_vm3, %v1632_v24, 0  ;;  %v4709_v24 = vld [vmem:[%s5662_s16] sm:$0xff]  }
 0xa0c   : > { %4426 = vmatpush3.bf16.msra.mxu1 %v1637_v25  ;;  %v4710_v25 = vld [vmem:[%s5662_s16 + $0x8] sm:$0xff]  }
 0xa0d   : > { %4437 = vmatprep.subr.bf16.mxu1 %v4833_v1 }
 0xa11   : > { %v4768_v26 = vpop.eup %4767 }
 0xa12   : > { %v1628_v27 = vmul.f32 %v4768_v26, %v4760_v3  ;;  %1742 = vrot.lane.b32.xlu0 %v5156_v23, %s5751_s25  ;;  %v4712_v26 = vld [vmem:[%s5664_s18 + $0x8] sm:$0xff]  }
 0xa14   : > { %v1629_v28 = vpack.c.bf16 %v1628_v27, %v1628_v27  ;;  %v4713_v27 = vld [vmem:[%s5664_s18 + $0x10] sm:$0xff]  }
 0xa16   : > { %4428 = vmatmul.mubr.msk.bf16.vlgmr.msra.gmra.mrb[28].mxu1 %vm882_vm2, %v1629_v28 }
 0xa17   : > { %4439 = vmatprep.mubr.msk.bf16.mxu1 %vm4834_vm0, %v4833_v1 }
 0xa79   : > { %v1738_v29 = vpop.xlane.xlu0 %1737 }
 0xa7a   : > { %4769 = vrcp.f32 %v1738_v29 }
 0xa81   : > { %v1848_v30 = vpop.xlane.xlu1 %1847 }
 0xa82   : > { %4771 = vrcp.f32 %v1848_v30 }
 0xa84   : > { %v4770_v31 = vpop.eup %4769 }
 0xa85   : > { %v1740_v33 = vmul.f32 %v4770_v31, %v4762_v13  ;;  %v1853_v36 = vpop.permute.xlu1 %1852 }
 0xa86   : > { %v1858_v38 = vsel %vm946_vm3, %v1853_v36, 0 }
 0xa87   : > { %v1741_v23 = vpack.c.bf16 %v1740_v33, %v1740_v33 }
 0xa89   : > { %v1958_v32 = vpop.xlane.xlu0 %1957  ;;  %v1963_v40 = vpop.permute.xlu1 %1962 }
 0xa8a   : > { %4773 = vrcp.f32 %v1958_v32  ;;  %v1968_v43 = vsel %vm946_vm3, %v1963_v40, 0  ;;  %v4085_v32 = vld [vmem:[%s5660_s14] ss:$0 sm:$0xff]  ;;  %v4717_v40 = vld [vmem:[%s5664_s18 + $0x30] sm:$0xff]  }
 0xa8c   : > { %v4772_v37 = vpop.eup %4771 }
 0xa8d   : > { %v1743_v34 = vpop.permute.xlu0 %1742  ;;  %v1850_v39 = vmul.f32 %v4772_v37, %v4764_v18  ;;  %v4714_v37 = vld [vmem:[%s5664_s18 + $0x18] sm:$0xff]  }
 0xa8e   : > { %v1748_v35 = vsel %vm946_vm3, %v1743_v34, 0  ;;  %v4086_v34 = vld [vmem:[%s5661_s15] ss:$0 sm:$0xff] }
 0xa8f   : > { %4438 = vmatpush3.bf16.msra.mxu1 %v1748_v35  ;;  %v1851_v41 = vpack.c.bf16 %v1850_v39, %v1850_v39  ;;  %v4716_v39 = vld [vmem:[%s5664_s18 + $0x28] sm:$0xff]  }
 0xa90   : > { %4449 = vmatprep.subr.bf16.mxu1 %v4833_v1 }
 0xa92   : > { %4440 = vmatmul.mubr.msk.bf16.vlgmr.msra.gmra.mrb[32].mxu1 %vm882_vm2, %v1741_v23 }
 0xa93   : > { %4450 = vmatpush3.bf16.msra.mxu1 %v1858_v38  ;;  %4451 = vmatprep.mubr.msk.bf16.mxu1 %vm4834_vm0, %v4833_v1  ;;  %v4715_v38 = vld [vmem:[%s5664_s18 + $0x20] sm:$0xff]  }
 0xa94   : > { %4461 = vmatprep.subr.bf16.mxu1 %v4833_v1  ;;  %v4774_v42 = vpop.eup %4773 }
 0xa95   : > { %v1960_v44 = vmul.f32 %v4774_v42, %v4766_v20  ;;  %v4087_v42 = vld [vmem:[%s5663_s17] ss:$0 sm:$0xff] }
 0xa97   : > { %v1961_v45 = vpack.c.bf16 %v1960_v44, %v1960_v44 }
 0xa9a   : > { %4452 = vmatmul.mubr.msk.bf16.vlgmr.msra.gmra.mrb[36].mxu1 %vm882_vm2, %v1851_v41  ;;  %v4718_v41 = vld [vmem:[%s5664_s18 + $0x38] sm:$0xff]  }
 0xa9b   : > { %4462 = vmatpush3.bf16.msra.mxu1 %v1968_v43  ;;  %4463 = vmatprep.mubr.msk.bf16.mxu1 %vm4834_vm0, %v4833_v1 }
 0xa9c   : > { %4475 = vmatprep.subr.bf16.mxu1 %v4833_v1 }
 0xaa2   : > { %4464 = vmatmul.mubr.msk.bf16.vlgmr.msra.gmra.mrb[40].mxu1 %vm882_vm2, %v1961_v45 }
 0xaa3   : > { %4479 = vmatprep.mubr.msk.bf16.mxu1 %vm4834_vm0, %v4833_v1  ;;  %4476 = vmatpush3.bf16.msra.mxu1 %v4709_v24 }
 0xaa4   : > { %4477 = vmatprep.subr.bf16.mxu1 %v4833_v1 }
 0xaa7   : > { %4478 = vmatpush3.bf16.msra.mxu1 %v4710_v25 }
 0xaa8   : > { %4503 = vmatprep.subr.bf16.mxu1 %v4833_v1 }
 0xae9   : > { %v1673_v46 = vpop.f32.mrb[28].mxu1 }
 0xaea   : > { %v4429_v47 = vpop.f32.mrb[29].mxu1 }
 0xaeb   : > { %v1676_v48 = vpop.f32.mrb[30].mxu1 }
 0xaec   : > { %v4430_v49 = vpop.f32.mrb[31].mxu1 }
 0xb65   : > { %v1784_v51 = vpop.f32.mrb[32].mxu1 }
 0xb66   : > { %2011 = vrot.lane.b32.xlu0 %v1784_v51, %s5753_s0  ;;  %v4441_v52 = vpop.f32.mrb[33].mxu1 }
 0xb67   : > { %v1787_v53 = vpop.f32.mrb[34].mxu1 }
 0xb68   : > { %v4442_v54 = vpop.f32.mrb[35].mxu1 }
 0xb69   : > { %v4091_v54 = vld [vmem:[%s5665_s19] ss:$0 sm:$0xff] }
 0xb6d   : > { %v1894_v56 = vpop.f32.mrb[36].mxu1 }
 0xb6e   : > { %2015 = vrot.lane.b32.xlu1 %v1894_v56, %s5754_s11  ;;  %v4453_v57 = vpop.f32.mrb[37].mxu1 }
 0xb6f   : > { %v1897_v58 = vpop.f32.mrb[38].mxu1 }
 0xb70   : > { %v4454_v59 = vpop.f32.mrb[39].mxu1 }
 0xb75   : > { %v2004_v60 = vpop.f32.mrb[40].mxu1 }
 0xb76   : > { %2019 = vrot.lane.b32.xlu0 %v2004_v60, %s5755_s22  ;;  %v4465_v61 = vpop.f32.mrb[41].mxu1 }
 0xb77   : > { %v2007_v62 = vpop.f32.mrb[42].mxu1 }
 0xb78   : > { %v4466_v63 = vpop.f32.mrb[43].mxu1 }
 0xbd8   : > { %v2012_v0 = vpop.permute.xlu0 %2011 }
 0xbd9   : > { %v2022_v3 = vsel %vm882_vm2, %v1673_v46, %v2012_v0 }
 0xbe0   : > { %v2016_v2 = vpop.permute.xlu1 %2015 }
 0xbe1   : > { %v2023_v4 = vsel %vm1334_vm4, %v2022_v3, %v2016_v2 }
 0xbe8   : > { %v2020_v6 = vpop.permute.xlu0 %2019 }
 0xbe9   : > { %v2024_v7 = vsel %vm1336_vm5, %v2023_v4, %v2020_v6  ;;  %v4719_v4 = vld [vmem:[%s5732_s8 + $0x10] sm:$0xff]   ;;  %v4720_v6 = vld [vmem:[%s5732_s8 + $0x18] sm:$0xff]  }
 0xbea   : > { %v2030_v8 = vpack.c.bf16 %v2024_v7, %v2024_v7 }
 0xbec   : > { %4472 = vmatmul.mubr.msk.bf16.vlgmr.msra.gmra.mrb[36].mxu0 %vm832_vm1, %v2030_v8 }
 0xbed   : > { %4499 = vmatprep.mubr.msk.bf16.mxu0 %vm4834_vm0, %v4833_v1 }
 0xcbf   : > { %v2086_v10 = vpop.f32.mrb[36].mxu0 }
 0xcc0   : > { %v2087_v12 = vadd.f32 %v4081_v9, %v2086_v10  ;;  %v4473_v13 = vpop.f32.mrb[37].mxu0 }
 0xcc1   : > { %v2089_v14 = vpop.f32.mrb[38].mxu0 }
 0xcc2   : > { %v4474_v11 = vpop.f32.mrb[39].mxu0  ;;  %v2092_v15 = vadd.f32 %v2087_v12, %v5146_v16  ;;  %v4711_v16 = vld [vmem:[%s5664_s18] sm:$0xff]  }
 0xcc3   : > { %4484 = vmatpush3.bf16.msra.mxu0 %v4711_v16  ;;  %v4100_v12 = vld [vmem:[%s5666_s20] ss:$0 sm:$0xff] }
 0xcc4   : > { %v2095_v17 = vsel %vm832_vm1, %v2092_v15, 0.0  ;;  %4485 = vmatprep.subr.bf16.mxu0 %v4833_v1  ;;  %v4101_v14 = vld [vmem:[%s5667_s21] ss:$0 sm:$0xff] }
 0xcc5   : > { %2096 = vadd.xlane.f32.xlu1 %v2095_v17 }
 0xcc7   : > { %4486 = vmatpush3.bf16.msra.mxu0 %v4712_v26 }
 0xcc8   : > { %4487 = vmatprep.subr.bf16.mxu0 %v4833_v1 }
 0xccb   : > { %4488 = vmatpush3.bf16.msra.mxu0 %v4713_v27 }
 0xccc   : > { %4489 = vmatprep.subr.bf16.mxu0 %v4833_v1 }
 0xccf   : > { %4490 = vmatpush3.bf16.msra.mxu0 %v4714_v37 }
 0xcd0   : > { %4491 = vmatprep.subr.bf16.mxu0 %v4833_v1 }
 0xcd3   : > { %4492 = vmatpush3.bf16.msra.mxu0 %v4715_v38 }
 0xcd4   : > { %4493 = vmatprep.subr.bf16.mxu0 %v4833_v1 }
 0xcd7   : > { %4494 = vmatpush3.bf16.msra.mxu0 %v4716_v39 }
 0xcd8   : > { %4495 = vmatprep.subr.bf16.mxu0 %v4833_v1 }
 0xcdb   : > { %4496 = vmatpush3.bf16.msra.mxu0 %v4717_v40 }
 0xcdc   : > { %4497 = vmatprep.subr.bf16.mxu0 %v4833_v1 }
 0xcdf   : > { %4498 = vmatpush3.bf16.msra.mxu0 %v4718_v41 }
 0xce0   : > { %4529 = vmatprep.subr.bf16.mxu0 %v4833_v1 }
 0xd52   : > { %v2097_v18 = vpop.xlane.xlu1 %2096 }
 0xd53   : > { %v2098_v19 = vmul.f32 0.03125, %v2097_v18  ;;  %v4107_v18 = vld [vmem:[%s5735_s1 + $0x1] ss:$0 sm:$0xff]  ;;  %s5763_s1 = sld [smem:[#allocation11_spill]] }
 0xd55   : > { %v2099_v20 = vsub.f32 %v2092_v15, %v2098_v19 }
 0xd57   : > { %v2100_v21 = vmul.f32 %v2099_v20, %v2099_v20 }
 0xd59   : > { %v2101_v22 = vsel %vm832_vm1, %v2100_v21, 0.0 }
 0xd5a   : > { %2102 = vadd.xlane.f32.xlu0 %v2101_v22 }
 0xde7   : > { %v2103_v28 = vpop.xlane.xlu0 %2102 }
 0xde8   : > { %v2104_v29 = vmul.f32 0.03125, %v2103_v28 }
 0xdea   : > { %v2105_v30 = vadd.f32 1e-05, %v2104_v29 }
 0xdec   : > { %4775 = vrsqrt.f32 %v2105_v30 }
 0xdf6   : > { %v4776_v31 = vpop.eup %4775 }
 0xdf7   : > { %v2107_v33 = vmul.f32 %v4776_v31, %v2099_v20 }
 0xdf9   : > { %v2114_v35 = vmul.f32 %v4085_v32, %v2107_v33 }
 0xdfb   : > { %v2121_v36 = vadd.f32 %v4086_v34, %v2114_v35 }
 0xdfd   : > { %v2127_v23 = vpack.c.bf16 %v2121_v36, %v2121_v36 }
 0xdff   : > { %4480 = vmatmul.mubr.msk.bf16.vlgmr.msra.gmra.mrb[44].mxu1 %vm832_vm1, %v2127_v23 }
 0xe00   : > { %4507 = vmatprep.mubr.msk.bf16.mxu1 %vm4834_vm0, %v4833_v1  ;;  %4504 = vmatpush3.bf16.msra.mxu1 %v4719_v4 }
 0xe01   : > { %4505 = vmatprep.subr.bf16.mxu1 %v4833_v1 }
 0xe04   : > { %4506 = vmatpush3.bf16.msra.mxu1 %v4720_v6 }
 0xe05   : > { %4511 = vmatprep.subr.bf16.mxu1 %v4833_v1 }
 0xed2   : > { %v2183_v43 = vpop.f32.mrb[44].mxu1 }
 0xed3   : > { %v2184_v44 = vadd.f32 %v4087_v42, %v2183_v43  ;;  %v4481_v45 = vpop.f32.mrb[45].mxu1 }
 0xed4   : > { %v2186_v46 = vpop.f32.mrb[46].mxu1 }
 0xed5   : > { %v2190_v47 = vmul.f32 0.70710677, %v2184_v44  ;;  %v4482_v48 = vpop.f32.mrb[47].mxu1  ;;  %v2189_v50 = vmul.f32 0.5, %v2184_v44 }
 0xed7   : > { %4777 = verf.f32 %v2190_v47 }
 0xee1   : > { %v4778_v49 = vpop.eup %4777 }
 0xee2   : > { %v2192_v51 = vadd.f32 1.0, %v4778_v49 }
 0xee4   : > { %v2193_v52 = vmul.f32 %v2192_v51, %v2189_v50 }
 0xee6   : > { %v2211_v53 = vpack.c.bf16 %v2193_v52, %v2193_v52 }
 0xee8   : > { %4500 = vmatmul.mubr.bf16.vlgmr.msra.gmra.mrb[40].mxu0 %v2211_v53 }
 0xee9   : > { %4531 = vmatprep.mubr.msk.bf16.mxu0 %vm4834_vm0, %v4833_v1 }
 0xfbb   : > { %v2300_v55 = vpop.f32.mrb[40].mxu0 }
 0xfbc   : > { %v2301_v56 = vadd.f32 %v4091_v54, %v2300_v55  ;;  %v4501_v57 = vpop.f32.mrb[41].mxu0 }
 0xfbd   : > { %v2303_v58 = vpop.f32.mrb[42].mxu0 }
 0xfbe   : > { %v4502_v59 = vpop.f32.mrb[43].mxu0  ;;  %v2306_v60 = vadd.f32 %v2301_v56, %v2121_v36 }
 0xfc0   : > { %v2309_v61 = vsel %vm832_vm1, %v2306_v60, 0.0 }
 0xfc1   : > { %2310 = vadd.xlane.f32.xlu0 %v2309_v61 }
0x104e   : > { %v2311_v62 = vpop.xlane.xlu0 %2310 }
0x104f   : > { %v2312_v63 = vmul.f32 0.03125, %v2311_v62 }
0x1051   : > { %v2313_v0 = vsub.f32 %v2306_v60, %v2312_v63 }
0x1053   : > { %v2314_v2 = vmul.f32 %v2313_v0, %v2313_v0 }
0x1055   : > { %v2315_v3 = vsel %vm832_vm1, %v2314_v2, 0.0 }
0x1056   : > { %2316 = vadd.xlane.f32.xlu1 %v2315_v3 }
0x10e3   : > { %v2317_v7 = vpop.xlane.xlu1 %2316 }
0x10e4   : > { %v2318_v8 = vmul.f32 0.03125, %v2317_v7 }
0x10e6   : > { %v2319_v9 = vadd.f32 1e-05, %v2318_v8 }
0x10e8   : > { %4779 = vrsqrt.f32 %v2319_v9 }
0x10f2   : > { %v4780_v10 = vpop.eup %4779 }
0x10f3   : > { %v2321_v13 = vmul.f32 %v4780_v10, %v2313_v0 }
0x10f5   : > { %v2328_v11 = vmul.f32 %v4100_v12, %v2321_v13 }
0x10f7   : > { %v5323_v15 = vadd.f32 %v4101_v14, %v2328_v11 }
0x10f9   : > { %v2343_v17 = vpack.c.bf16 %v5323_v15, %v5323_v15 }
0x10fb   : > { %4508 = vmatmul.mubr.msk.bf16.vlgmr.msra.gmra.mrb[48].mxu1 %vm832_vm1, %v2343_v17 }
0x10fc   : > { %4513 = vmatprep.mubr.msk.bf16.mxu1 %vm4834_vm0, %v4833_v1 }
0x11ce   : > { %v2399_v19 = vpop.f32.mrb[48].mxu1 }
0x11cf   : > { %v2400_v20 = vadd.f32 %v4107_v18, %v2399_v19  ;;  %v4509_v21 = vpop.f32.mrb[49].mxu1 }
0x11d0   : > { %v2402_v22 = vpop.f32.mrb[50].mxu1 }
0x11d1   : > { %v5333_v24 = vpack.c.bf16 %v2400_v20, %v2400_v20  ;;  %v4510_v25 = vpop.f32.mrb[51].mxu1  ;;  %v2405_v16 = vmul.f32 0.35355338, %v2400_v20 }
0x11d3   : > { %2409 = vrot.lane.b32.xlu0 %v5333_v24, %s5748_s29  ;;  %v2406_v26 = vpack.c.bf16 %v2405_v16, %v2405_v16 }
0x11d7   : > { %2520 = vrot.lane.b32.xlu0 %v5333_v24, %s5751_s25 }
0x11db   : > { %2518 = vrot.lane.b32.xlu0 %v2406_v26, %s5744_s27 }
0x11df   : > { %2628 = vrot.lane.b32.xlu0 %v2406_v26, %s5745_s7 }
0x11e3   : > { %2738 = vrot.lane.b32.xlu0 %v2406_v26, %s5746_s30 }
0x1245   : > { %v2410_v27 = vpop.permute.xlu0 %2409 }
0x1246   : > { %v2415_v28 = vsel %vm882_vm2, %v2410_v27, 0 }
0x1247   : > { %4512 = vmatpush3.bf16.xpose.msra.mxu1 %v2415_v28 }
0x1248   : > { %4517 = vmatprep.subr.bf16.mxu1 %v4833_v1 }
0x1249   : > { %v2521_v43 = vpop.permute.xlu0 %2520 }
0x124a   : > { %v2526_v45 = vsel %vm882_vm2, %v2521_v43, 0 }
0x124d   : > { %v2519_v47 = vpop.permute.xlu0 %2518 }
0x124e   : > { %4514 = vmatmul.mubr.msk.bf16.vlgmr.msra.gmra.mrb[52].mxu1 %vm882_vm2, %v2406_v26 }
0x124f   : > { %4519 = vmatprep.mubr.msk.bf16.mxu1 %vm4834_vm0, %v4833_v1 }
0x1251   : > { %v2629_v50 = vpop.permute.xlu0 %2628 }
0x1255   : > { %v2739_v52 = vpop.permute.xlu0 %2738 }
0x1321   : > { %v2451_v29 = vpop.f32.mrb[52].mxu1 }
0x1322   : > { %v4515_v30 = vpop.f32.mrb[53].mxu1  ;;  %v2457_v31 = vsel %vm882_vm2, %v2451_v29, -inf }
0x1323   : > { %2458 = vmax.xlane.f32.xlu1 %v2457_v31  ;;  %v2454_v32 = vpop.f32.mrb[54].mxu1 }
0x1324   : > { %v4516_v33 = vpop.f32.mrb[55].mxu1 }
0x13b0   : > { %v2459_v34 = vpop.xlane.xlu1 %2458 }
0x13b1   : > { %v2460_v35 = vsub.f32 %v2451_v29, %v2459_v34 }
0x13b3   : > { %v2461_v36 = vmul.f32 1.442695, %v2460_v35 }
0x13b5   : > { %4781 = vpow2.f32 %v2461_v36 }
0x13bf   : > { %v4782_v23 = vpop.eup %4781 }
0x13c0   : > { %v2463_v37 = vsel %vm882_vm2, %v4782_v23, 0.0 }
0x13c1   : > { %2464 = vadd.xlane.f32.xlu1 %v2463_v37 }
0x13d2   : > { %2469 = vrot.lane.b32.xlu1 %v5333_v24, %s5757_s23  ;;  %s5761_s23 = sld [smem:[#allocation12_spill]] }
0x13d6   : > { %2630 = vrot.lane.b32.xlu1 %v5333_v24, %s5749_s28 }
0x13da   : > { %2740 = vrot.lane.b32.xlu1 %v5333_v24, %s5750_s9 }
0x144e   : > { %v2465_v38 = vpop.xlane.xlu1 %2464 }
0x144f   : > { %4783 = vrcp.f32 %v2465_v38 }
0x1452   : > { %v2470_v39 = vpop.permute.xlu1 %2469 }
0x1453   : > { %v2475_v40 = vsel %vm946_vm3, %v2470_v39, 0 }
0x1454   : > { %4518 = vmatpush3.bf16.msra.mxu1 %v2475_v40 }
0x1455   : > { %4523 = vmatprep.subr.bf16.mxu1 %v4833_v1 }
0x1456   : > { %v2631_v46 = vpop.permute.xlu1 %2630 }
0x1457   : > { %v2636_v48 = vsel %vm882_vm2, %v2631_v46, 0 }
0x1459   : > { %v4784_v41 = vpop.eup %4783 }
0x145a   : > { %v2467_v42 = vmul.f32 %v4784_v41, %v4782_v23  ;;  %v2741_v49 = vpop.permute.xlu1 %2740 }
0x145b   : > { %v2746_v51 = vsel %vm882_vm2, %v2741_v49, 0 }
0x145c   : > { %v2468_v44 = vpack.c.bf16 %v2467_v42, %v2467_v42 }
0x145e   : > { %4520 = vmatmul.mubr.msk.bf16.vlgmr.msra.gmra.mrb[56].mxu1 %vm882_vm2, %v2468_v44  ;;  %v4721_v44 = vld [vmem:[%s5736_s5 + $0x10] sm:$0xff]  }
0x145f   : > { %4524 = vmatpush3.bf16.xpose.msra.mxu1 %v2526_v45  ;;  %4525 = vmatprep.mubr.msk.bf16.mxu1 %vm4834_vm0, %v4833_v1 }
0x1460   : > { %4535 = vmatprep.subr.bf16.mxu1 %v4833_v1 }
0x1466   : > { %4526 = vmatmul.mubr.msk.bf16.vlgmr.msra.gmra.mrb[60].mxu1 %vm882_vm2, %v2519_v47 }
0x1467   : > { %4536 = vmatpush3.bf16.xpose.msra.mxu1 %v2636_v48  ;;  %4537 = vmatprep.mubr.msk.bf16.mxu1 %vm4834_vm0, %v4833_v1 }
0x1468   : > { %4547 = vmatprep.subr.bf16.mxu1 %v4833_v1 }
0x146e   : > { %4538 = vmatmul.mubr.msk.bf16.vlgmr.msra.gmra.mrb[64].mxu1 %vm882_vm2, %v2629_v50 }
0x146f   : > { %4548 = vmatpush3.bf16.xpose.msra.mxu1 %v2746_v51  ;;  %4549 = vmatprep.mubr.msk.bf16.mxu1 %vm4834_vm0, %v4833_v1 }
0x1470   : > { %4559 = vmatprep.subr.bf16.mxu1 %v4833_v1 }
0x1476   : > { %4550 = vmatmul.mubr.msk.bf16.vlgmr.msra.gmra.mrb[68].mxu1 %vm882_vm2, %v2739_v52 }
0x1477   : > { %4563 = vmatprep.mubr.msk.bf16.mxu1 %vm4834_vm0, %v4833_v1  ;;  %4560 = vmatpush3.bf16.msra.mxu1 %v4721_v44 }
0x1478   : > { %4561 = vmatprep.subr.bf16.mxu1 %v4833_v1 }
0x1531   : > { %v5375_v53 = vpop.f32.mrb[56].mxu1 }
0x1532   : > { %v4521_v54 = vpop.f32.mrb[57].mxu1 }
0x1533   : > { %v2514_v55 = vpop.f32.mrb[58].mxu1  ;;  %v4722_v54 = vld [vmem:[%s5736_s5 + $0x18] sm:$0xff]  }
0x1534   : > { %v4522_v56 = vpop.f32.mrb[59].mxu1  ;;  %4562 = vmatpush3.bf16.msra.mxu1 %v4722_v54 }
0x1535   : > { %4575 = vmatprep.subr.bf16.mxu1 %v4833_v1 }
0x1539   : > { %v2562_v57 = vpop.f32.mrb[60].mxu1 }
0x153a   : > { %v4527_v58 = vpop.f32.mrb[61].mxu1  ;;  %v2568_v59 = vsel %vm882_vm2, %v2562_v57, -inf }
0x153b   : > { %2569 = vmax.xlane.f32.xlu1 %v2568_v59  ;;  %v2565_v60 = vpop.f32.mrb[62].mxu1 }
0x153c   : > { %v4528_v61 = vpop.f32.mrb[63].mxu1 }
0x1541   : > { %v2672_v62 = vpop.f32.mrb[64].mxu1 }
0x1542   : > { %v4539_v63 = vpop.f32.mrb[65].mxu1  ;;  %v2678_v0 = vsel %vm882_vm2, %v2672_v62, -inf }
0x1543   : > { %2679 = vmax.xlane.f32.xlu0 %v2678_v0  ;;  %v2675_v2 = vpop.f32.mrb[66].mxu1 }
0x1544   : > { %v4540_v3 = vpop.f32.mrb[67].mxu1 }
0x1545   : > { %v4124_v3 = vld [vmem:[%s5737_s6 + $0x1] ss:$0 sm:$0xff] }
0x1549   : > { %v2782_v4 = vpop.f32.mrb[68].mxu1 }
0x154a   : > { %v4551_v6 = vpop.f32.mrb[69].mxu1  ;;  %v2788_v7 = vsel %vm882_vm2, %v2782_v4, -inf }
0x154b   : > { %2789 = vmax.xlane.f32.xlu0 %v2788_v7  ;;  %v2785_v8 = vpop.f32.mrb[70].mxu1 }
0x154c   : > { %v4552_v9 = vpop.f32.mrb[71].mxu1 }
0x15c8   : > { %v2570_v10 = vpop.xlane.xlu1 %2569 }
0x15c9   : > { %v2571_v12 = vsub.f32 %v2562_v57, %v2570_v10 }
0x15cb   : > { %v2572_v13 = vmul.f32 1.442695, %v2571_v12 }
0x15cd   : > { %4785 = vpow2.f32 %v2572_v13 }
0x15d0   : > { %v2680_v14 = vpop.xlane.xlu0 %2679 }
0x15d1   : > { %v2681_v11 = vsub.f32 %v2672_v62, %v2680_v14 }
0x15d3   : > { %v2682_v17 = vmul.f32 1.442695, %v2681_v11 }
0x15d5   : > { %4787 = vpow2.f32 %v2682_v17 }
0x15d7   : > { %v4786_v18 = vpop.eup %4785 }
0x15d8   : > { %v2574_v19 = vsel %vm882_vm2, %v4786_v18, 0.0  ;;  %v2790_v22 = vpop.xlane.xlu0 %2789 }
0x15d9   : > { %2575 = vadd.xlane.f32.xlu1 %v2574_v19  ;;  %v2791_v25 = vsub.f32 %v2782_v4, %v2790_v22  ;;  %v4725_v19 = vld [vmem:[%s5761_s23 + $0x10] sm:$0xff]  }
0x15db   : > { %v2792_v16 = vmul.f32 1.442695, %v2791_v25 }
0x15dd   : > { %4789 = vpow2.f32 %v2792_v16  ;;  %v4130_v16 = vld [vmem:[%s5762_s26 + $0x1] ss:$0 sm:$0xff]  ;;  %s5765_s26 = sld [smem:[#allocation13_spill]] }
0x15df   : > { %v4788_v20 = vpop.eup %4787 }
0x15e0   : > { %v2684_v21 = vsel %vm882_vm2, %v4788_v20, 0.0 }
0x15e1   : > { %2685 = vadd.xlane.f32.xlu0 %v2684_v21 }
0x15e7   : > { %v4790_v26 = vpop.eup %4789 }
0x15e8   : > { %v2794_v27 = vsel %vm882_vm2, %v4790_v26, 0.0 }
0x15ea   : > { %2690 = vrot.lane.b32.xlu1 %v5333_v24, %s5758_s24  ;;  %s5770_s24 = sld [smem:[#allocation18_spill]] }
0x15f7   : > { %2580 = vrot.lane.b32.xlu0 %v5333_v24, %s5759_s3 }
0x160e   : > { %2795 = vadd.xlane.f32.xlu1 %v2794_v27  ;;  %v4131_v27 = vld [vmem:[%s5763_s1 + $0x1] ss:$0 sm:$0xff]  ;;  %s5771_s1 = sld [smem:[#allocation19_spill]] }
0x161f   : > { %2800 = vrot.lane.b32.xlu1 %v5333_v24, %s5760_s13  ;;  %s5764_s13 = sld [smem:[#allocation15_spill]] }
0x1666   : > { %v2576_v28 = vpop.xlane.xlu1 %2575 }
0x1667   : > { %4791 = vrcp.f32 %v2576_v28 }
0x166a   : > { %v2691_v34 = vpop.permute.xlu1 %2690 }
0x166b   : > { %v2696_v36 = vsel %vm946_vm3, %v2691_v34, 0 }
0x166e   : > { %v2686_v29 = vpop.xlane.xlu0 %2685 }
0x166f   : > { %4793 = vrcp.f32 %v2686_v29 }
0x1671   : > { %v4792_v30 = vpop.eup %4791 }
0x1672   : > { %v2578_v31 = vmul.f32 %v4792_v30, %v4786_v18  ;;  %v2581_v32 = vpop.permute.xlu0 %2580  ;;  %v4723_v18 = vld [vmem:[%s5738_s2 + $0x10] sm:$0xff]  }
0x1673   : > { %v2586_v33 = vsel %vm946_vm3, %v2581_v32, 0 }
0x1674   : > { %4530 = vmatpush3.bf16.msra.mxu0 %v2586_v33  ;;  %v2579_v35 = vpack.c.bf16 %v2578_v31, %v2578_v31  ;;  %v4146_v31 = vld [vmem:[%s5764_s13 + $0x1] ss:$0 sm:$0xff] }
0x1675   : > { %4541 = vmatprep.subr.bf16.mxu0 %v4833_v1 }
0x1677   : > { %4532 = vmatmul.mubr.msk.bf16.vlgmr.msra.gmra.mrb[44].mxu0 %vm882_vm2, %v2579_v35 }
0x1678   : > { %4542 = vmatpush3.bf16.msra.mxu0 %v2696_v36  ;;  %4543 = vmatprep.mubr.msk.bf16.mxu0 %vm4834_vm0, %v4833_v1 }
0x1679   : > { %v4794_v24 = vpop.eup %4793  ;;  %4553 = vmatprep.subr.bf16.mxu0 %v4833_v1 }
0x167a   : > { %v2688_v23 = vmul.f32 %v4794_v24, %v4788_v20  ;;  %v4726_v20 = vld [vmem:[%s5761_s23 + $0x18] sm:$0xff]  }
0x167c   : > { %v2689_v37 = vpack.c.bf16 %v2688_v23, %v2688_v23 }
0x167f   : > { %4544 = vmatmul.mubr.msk.bf16.vlgmr.msra.gmra.mrb[48].mxu0 %vm882_vm2, %v2689_v37  ;;  %v4137_v37 = vld [vmem:[%s5765_s26 + $0x1] ss:$0 sm:$0xff] }
0x1680   : > { %4555 = vmatprep.mubr.msk.bf16.mxu0 %vm4834_vm0, %v4833_v1 }
0x169b   : > { %v2796_v38 = vpop.xlane.xlu1 %2795 }
0x169c   : > { %4795 = vrcp.f32 %v2796_v38 }
0x169f   : > { %v2801_v39 = vpop.permute.xlu1 %2800 }
0x16a0   : > { %v2806_v40 = vsel %vm946_vm3, %v2801_v39, 0 }
0x16a1   : > { %4554 = vmatpush3.bf16.msra.mxu0 %v2806_v40 }
0x16a2   : > { %4567 = vmatprep.subr.bf16.mxu0 %v4833_v1 }
0x16a6   : > { %v4796_v41 = vpop.eup %4795 }
0x16a7   : > { %v2798_v42 = vmul.f32 %v4796_v41, %v4790_v26 }
0x16a9   : > { %v2799_v43 = vpack.c.bf16 %v2798_v42, %v2798_v42 }
0x16ab   : > { %4556 = vmatmul.mubr.msk.bf16.vlgmr.msra.gmra.mrb[52].mxu0 %vm882_vm2, %v2799_v43 }
0x16ac   : > { %4571 = vmatprep.mubr.msk.bf16.mxu0 %vm4834_vm0, %v4833_v1  ;;  %4568 = vmatpush3.bf16.msra.mxu0 %v4725_v19 }
0x16ad   : > { %4569 = vmatprep.subr.bf16.mxu0 %v4833_v1 }
0x16b0   : > { %4570 = vmatpush3.bf16.msra.mxu0 %v4726_v20 }
0x16b1   : > { %4583 = vmatprep.subr.bf16.mxu0 %v4833_v1 }
0x174a   : > { %v2622_v45 = vpop.f32.mrb[44].mxu0 }
0x174b   : > { %2849 = vrot.lane.b32.xlu0 %v2622_v45, %s5753_s0  ;;  %v4533_v46 = vpop.f32.mrb[45].mxu0 }
0x174c   : > { %v2625_v47 = vpop.f32.mrb[46].mxu0 }
0x174d   : > { %v4534_v48 = vpop.f32.mrb[47].mxu0 }
0x1752   : > { %v2732_v49 = vpop.f32.mrb[48].mxu0 }
0x1753   : > { %2853 = vrot.lane.b32.xlu1 %v2732_v49, %s5754_s11  ;;  %v4545_v50 = vpop.f32.mrb[49].mxu0 }
0x1754   : > { %v2735_v51 = vpop.f32.mrb[50].mxu0 }
0x1755   : > { %v4546_v52 = vpop.f32.mrb[51].mxu0 }
0x177e   : > { %v2842_v55 = vpop.f32.mrb[52].mxu0 }
0x177f   : > { %2857 = vrot.lane.b32.xlu0 %v2842_v55, %s5755_s22  ;;  %v4557_v56 = vpop.f32.mrb[53].mxu0 }
0x1780   : > { %v2845_v57 = vpop.f32.mrb[54].mxu0 }
0x1781   : > { %v4558_v58 = vpop.f32.mrb[55].mxu0 }
0x17bd   : > { %v2850_v59 = vpop.permute.xlu0 %2849 }
0x17be   : > { %v2860_v61 = vsel %vm882_vm2, %v5375_v53, %v2850_v59 }
0x17c5   : > { %v2854_v60 = vpop.permute.xlu1 %2853 }
0x17c6   : > { %v2861_v62 = vsel %vm1334_vm4, %v2860_v61, %v2854_v60 }
0x17f1   : > { %v2858_v63 = vpop.permute.xlu0 %2857 }
0x17f2   : > { %v2862_v0 = vsel %vm1336_vm5, %v2861_v62, %v2858_v63 }
0x17f3   : > { %v2870_v2 = vpack.c.bf16 %v2862_v0, %v2862_v0 }
0x17f5   : > { %4564 = vmatmul.mubr.msk.bf16.vlgmr.msra.gmra.mrb[72].mxu1 %vm832_vm1, %v2870_v2 }
0x17f6   : > { %4579 = vmatprep.mubr.msk.bf16.mxu1 %vm4834_vm0, %v4833_v1  ;;  %4576 = vmatpush3.bf16.msra.mxu1 %v4723_v18 }
0x17f7   : > { %4577 = vmatprep.subr.bf16.mxu1 %v4833_v1 }
0x18c8   : > { %v2926_v4 = vpop.f32.mrb[72].mxu1 }
0x18c9   : > { %v2927_v6 = vadd.f32 %v4124_v3, %v2926_v4  ;;  %v4565_v7 = vpop.f32.mrb[73].mxu1 }
0x18ca   : > { %v2929_v8 = vpop.f32.mrb[74].mxu1 }
0x18cb   : > { %v4566_v53 = vpop.f32.mrb[75].mxu1  ;;  %v2932_v9 = vadd.f32 %v2927_v6, %v5323_v15  ;;  %v4724_v15 = vld [vmem:[%s5738_s2 + $0x18] sm:$0xff]  }
0x18cc   : > { %4578 = vmatpush3.bf16.msra.mxu1 %v4724_v15 }
0x18cd   : > { %v2937_v10 = vsel %vm832_vm1, %v2932_v9, 0.0  ;;  %4589 = vmatprep.subr.bf16.mxu1 %v4833_v1 }
0x18ce   : > { %2938 = vadd.xlane.f32.xlu1 %v2937_v10 }
0x18cf   : > { %4580 = vmatmul.mubr.msk.bf16.vlgmr.msra.gmra.mrb[76].mxu1 %vm832_vm1, %v5125_v5 }
0x18d0   : > { %4591 = vmatprep.mubr.msk.bf16.mxu1 %vm4834_vm0, %v4833_v1 }
0x195b   : > { %v2939_v12 = vpop.xlane.xlu1 %2938 }
0x195c   : > { %v2940_v13 = vmul.f32 0.03125, %v2939_v12 }
0x195e   : > { %v2941_v14 = vsub.f32 %v2932_v9, %v2940_v13 }
0x1960   : > { %v2942_v11 = vmul.f32 %v2941_v14, %v2941_v14 }
0x1962   : > { %v2943_v17 = vsel %vm832_vm1, %v2942_v11, 0.0 }
0x1963   : > { %2944 = vadd.xlane.f32.xlu0 %v2943_v17 }
0x19a2   : > { %v3092_v32 = vpop.f32.mrb[76].mxu1 }
0x19a3   : > { %v3093_v33 = vadd.f32 %v4146_v31, %v3092_v32  ;;  %v4581_v34 = vpop.f32.mrb[77].mxu1 }
0x19a4   : > { %v3095_v35 = vpop.f32.mrb[78].mxu1 }
0x19a5   : > { %v5464_v36 = vpack.c.bf16 %v3093_v33, %v3093_v33  ;;  %v4582_v24 = vpop.f32.mrb[79].mxu1 }
0x19a7   : > { %3211 = vrot.lane.b32.xlu0 %v5464_v36, %s5744_s27  ;;  %v3105_v23 = vsel %vm882_vm2, %v5464_v36, 0 }
0x19f0   : > { %v2945_v21 = vpop.xlane.xlu0 %2944 }
0x19f1   : > { %v2946_v22 = vmul.f32 0.03125, %v2945_v21 }
0x19f3   : > { %v2947_v5 = vadd.f32 1e-05, %v2946_v22 }
0x19f5   : > { %4797 = vrsqrt.f32 %v2947_v5 }
0x19ff   : > { %v4798_v25 = vpop.eup %4797 }
0x1a00   : > { %v2949_v26 = vmul.f32 %v4798_v25, %v2941_v14 }
0x1a02   : > { %v2956_v28 = vmul.f32 %v4130_v16, %v2949_v26 }
0x1a04   : > { %v5454_v29 = vadd.f32 %v4131_v27, %v2956_v28 }
0x1a06   : > { %v2971_v30 = vpack.c.bf16 %v5454_v29, %v5454_v29 }
0x1a08   : > { %4572 = vmatmul.mubr.msk.bf16.vlgmr.msra.gmra.mrb[56].mxu0 %vm832_vm1, %v2971_v30 }
0x1a09   : > { %4585 = vmatprep.mubr.msk.bf16.mxu0 %vm4834_vm0, %v4833_v1  ;;  %4584 = vmatpush3.bf16.xpose.msra.mxu0 %v3105_v23 }
0x1a0a   : > { %4595 = vmatprep.subr.bf16.mxu0 %v4833_v1 }
0x1a19   : > { %v3212_v44 = vpop.permute.xlu0 %3211 }
0x1a1a   : > { %v3217_v46 = vsel %vm882_vm2, %v3212_v44, 0 }
0x1adb   : > { %v3027_v38 = vpop.f32.mrb[56].mxu0 }
0x1adc   : > { %v3028_v39 = vadd.f32 %v4137_v37, %v3027_v38  ;;  %v4573_v40 = vpop.f32.mrb[57].mxu0 }
0x1add   : > { %v3030_v41 = vpop.f32.mrb[58].mxu0 }
0x1ade   : > { %v3098_v42 = vmul.f32 0.35355338, %v3028_v39  ;;  %v4574_v43 = vpop.f32.mrb[59].mxu0 }
0x1ae0   : > { %v3099_v45 = vpack.c.bf16 %v3098_v42, %v3098_v42 }
0x1ae2   : > { %3209 = vrot.lane.b32.xlu1 %v3099_v45, %s5744_s27  ;;  %3319 = vrot.lane.b32.xlu0 %v3099_v45, %s5745_s7 }
0x1ae3   : > { %4586 = vmatmul.mubr.msk.bf16.vlgmr.msra.gmra.mrb[60].mxu0 %vm882_vm2, %v3099_v45 }
0x1ae4   : > { %4596 = vmatpush3.bf16.xpose.msra.mxu0 %v3217_v46  ;;  %4597 = vmatprep.mubr.msk.bf16.mxu0 %vm4834_vm0, %v4833_v1 }
0x1ae5   : > { %4607 = vmatprep.subr.bf16.mxu0 %v4833_v1 }
0x1ae6   : > { %3321 = vrot.lane.b32.xlu1 %v5464_v36, %s5745_s7  ;;  %3429 = vrot.lane.b32.xlu0 %v3099_v45, %s5746_s30  ;;  %s5766_s7 = sld [smem:[#allocation16_spill]] }
0x1aea   : > { %3431 = vrot.lane.b32.xlu1 %v5464_v36, %s5746_s30  ;;  %s5773_s30 = sld [smem:[#allocation22_spill]] }
0x1b54   : > { %v3210_v47 = vpop.permute.xlu1 %3209  ;;  %v3320_v51 = vpop.permute.xlu0 %3319 }
0x1b55   : > { %4598 = vmatmul.mubr.msk.bf16.vlgmr.msra.gmra.mrb[64].mxu0 %vm882_vm2, %v3210_v47 }
0x1b56   : > { %4609 = vmatprep.mubr.msk.bf16.mxu0 %vm4834_vm0, %v4833_v1 }
0x1b58   : > { %v3322_v48 = vpop.permute.xlu1 %3321  ;;  %v3430_v54 = vpop.permute.xlu0 %3429 }
0x1b59   : > { %v3327_v49 = vsel %vm882_vm2, %v3322_v48, 0 }
0x1b5a   : > { %4608 = vmatpush3.bf16.xpose.msra.mxu0 %v3327_v49 }
0x1b5b   : > { %4619 = vmatprep.subr.bf16.mxu0 %v4833_v1 }
0x1b5c   : > { %v3432_v50 = vpop.permute.xlu1 %3431 }
0x1b5d   : > { %v3437_v52 = vsel %vm882_vm2, %v3432_v50, 0 }
0x1b61   : > { %4610 = vmatmul.mubr.msk.bf16.vlgmr.msra.gmra.mrb[68].mxu0 %vm882_vm2, %v3320_v51 }
0x1b62   : > { %4620 = vmatpush3.bf16.xpose.msra.mxu0 %v3437_v52  ;;  %4621 = vmatprep.mubr.msk.bf16.mxu0 %vm4834_vm0, %v4833_v1 }
0x1b63   : > { %4631 = vmatprep.subr.bf16.mxu0 %v4833_v1 }
0x1b69   : > { %4622 = vmatmul.mubr.msk.bf16.vlgmr.msra.gmra.mrb[72].mxu0 %vm882_vm2, %v3430_v54 }
0x1b6a   : > { %4635 = vmatprep.mubr.msk.bf16.mxu0 %vm4834_vm0, %v4833_v1 }
0x1bb6   : > { %v3141_v55 = vpop.f32.mrb[60].mxu0 }
0x1bb7   : > { %v4587_v56 = vpop.f32.mrb[61].mxu0  ;;  %v3147_v57 = vsel %vm882_vm2, %v3141_v55, -inf }
0x1bb8   : > { %3148 = vmax.xlane.f32.xlu1 %v3147_v57  ;;  %v3144_v58 = vpop.f32.mrb[62].mxu0 }
0x1bb9   : > { %v4588_v59 = vpop.f32.mrb[63].mxu0 }
0x1c28   : > { %v3253_v60 = vpop.f32.mrb[64].mxu0 }
0x1c29   : > { %v4599_v61 = vpop.f32.mrb[65].mxu0  ;;  %v3259_v62 = vsel %vm882_vm2, %v3253_v60, -inf }
0x1c2a   : > { %3260 = vmax.xlane.f32.xlu0 %v3259_v62  ;;  %v3256_v63 = vpop.f32.mrb[66].mxu0 }
0x1c2b   : > { %v4600_v0 = vpop.f32.mrb[67].mxu0 }
0x1c34   : > { %v3363_v2 = vpop.f32.mrb[68].mxu0 }
0x1c35   : > { %v4611_v3 = vpop.f32.mrb[69].mxu0  ;;  %v3369_v4 = vsel %vm882_vm2, %v3363_v2, -inf }
0x1c36   : > { %3370 = vmax.xlane.f32.xlu0 %v3369_v4  ;;  %v3366_v6 = vpop.f32.mrb[70].mxu0  ;;  %v4728_v3 = vld [vmem:[%s5766_s7 + $0x18] sm:$0xff]  }
0x1c37   : > { %v4612_v7 = vpop.f32.mrb[71].mxu0 }
0x1c3c   : > { %v3473_v8 = vpop.f32.mrb[72].mxu0 }
0x1c3d   : > { %v4623_v53 = vpop.f32.mrb[73].mxu0  ;;  %v3479_v9 = vsel %vm882_vm2, %v3473_v8, -inf }
0x1c3e   : > { %3480 = vmax.xlane.f32.xlu1 %v3479_v9  ;;  %v3476_v10 = vpop.f32.mrb[74].mxu0 }
0x1c3f   : > { %v4624_v12 = vpop.f32.mrb[75].mxu0 }
0x1c45   : > { %v3149_v13 = vpop.xlane.xlu1 %3148 }
0x1c46   : > { %v3150_v14 = vsub.f32 %v3141_v55, %v3149_v13 }
0x1c48   : > { %v3151_v11 = vmul.f32 1.442695, %v3150_v14 }
0x1c4a   : > { %4799 = vpow2.f32 %v3151_v11 }
0x1c54   : > { %v4800_v17 = vpop.eup %4799 }
0x1c55   : > { %v3153_v18 = vsel %vm882_vm2, %v4800_v17, 0.0 }
0x1c56   : > { %3154 = vadd.xlane.f32.xlu0 %v3153_v18 }
0x1cb7   : > { %v3261_v15 = vpop.xlane.xlu0 %3260 }
0x1cb8   : > { %v3262_v19 = vsub.f32 %v3253_v60, %v3261_v15 }
0x1cba   : > { %v3263_v20 = vmul.f32 1.442695, %v3262_v19 }
0x1cbc   : > { %4801 = vpow2.f32 %v3263_v20 }
0x1cc3   : > { %v3371_v21 = vpop.xlane.xlu0 %3370 }
0x1cc4   : > { %v3372_v22 = vsub.f32 %v3363_v2, %v3371_v21  ;;  %v4727_v2 = vld [vmem:[%s5766_s7 + $0x10] sm:$0xff]  }
0x1cc5   : > { %4632 = vmatpush3.bf16.msra.mxu0 %v4727_v2 }
0x1cc6   : > { %v4802_v5 = vpop.eup %4801  ;;  %v3373_v25 = vmul.f32 1.442695, %v3372_v22  ;;  %4633 = vmatprep.subr.bf16.mxu0 %v4833_v1 }
0x1cc7   : > { %v3265_v16 = vsel %vm882_vm2, %v4802_v5, 0.0 }
0x1cc8   : > { %4803 = vpow2.f32 %v3373_v25  ;;  %3266 = vadd.xlane.f32.xlu1 %v3265_v16 }
0x1cc9   : > { %4634 = vmatpush3.bf16.msra.mxu0 %v4728_v3 }
0x1cca   : > { %4647 = vmatprep.subr.bf16.mxu0 %v4833_v1 }
0x1ccb   : > { %v3481_v28 = vpop.xlane.xlu1 %3480 }
0x1ccc   : > { %v3482_v30 = vsub.f32 %v3473_v8, %v3481_v28 }
0x1cce   : > { %v3483_v31 = vmul.f32 1.442695, %v3482_v30 }
0x1cd0   : > { %4805 = vpow2.f32 %v3483_v31 }
0x1cd2   : > { %v4804_v26 = vpop.eup %4803 }
0x1cd3   : > { %v3375_v27 = vsel %vm882_vm2, %v4804_v26, 0.0 }
0x1cd4   : > { %3376 = vadd.xlane.f32.xlu0 %v3375_v27 }
0x1cd9   : > { %3271 = vrot.lane.b32.xlu1 %v5464_v36, %s5751_s25  ;;  %s5772_s25 = sld [smem:[#allocation21_spill]] }
0x1cda   : > { %v4806_v32 = vpop.eup %4805 }
0x1cdb   : > { %v3485_v33 = vsel %vm882_vm2, %v4806_v32, 0.0 }
0x1ce3   : > { %v3155_v34 = vpop.xlane.xlu0 %3154 }
0x1ce4   : > { %4807 = vrcp.f32 %v3155_v34  ;;  %v4729_v34 = vld [vmem:[%s5662_s16 + $0x10] sm:$0xff]  }
0x1cea   : > { %3160 = vrot.lane.b32.xlu0 %v5464_v36, %s5748_s29 }
0x1cee   : > { %3491 = vrot.lane.b32.xlu0 %v5464_v36, %s5750_s9  ;;  %v4808_v24 = vpop.eup %4807 }
0x1cef   : > { %v3157_v37 = vmul.f32 %v4808_v24, %v4800_v17  ;;  %v4732_v24 = vld [vmem:[%s5664_s18 + $0x48] sm:$0xff]  }
0x1cf1   : > { %v3158_v41 = vpack.c.bf16 %v3157_v37, %v3157_v37 }
0x1cfd   : > { %3486 = vadd.xlane.f32.xlu1 %v3485_v33 }
0x1d0e   : > { %3381 = vrot.lane.b32.xlu1 %v5464_v36, %s5749_s28  ;;  %s5767_s28 = sld [smem:[#allocation17_spill]] }
0x1d14   : > { %v4163_v20 = vld [vmem:[%s5767_s28 + $0x1] ss:$0 sm:$0xff] }
0x1d55   : > { %v3267_v35 = vpop.xlane.xlu1 %3266 }
0x1d56   : > { %4809 = vrcp.f32 %v3267_v35  ;;  %v4730_v35 = vld [vmem:[%s5662_s16 + $0x18] sm:$0xff]  }
0x1d59   : > { %v3272_v40 = vpop.permute.xlu1 %3271 }
0x1d5a   : > { %v3277_v43 = vsel %vm946_vm3, %v3272_v40, 0 }
0x1d60   : > { %v4810_v42 = vpop.eup %4809 }
0x1d61   : > { %v3377_v23 = vpop.xlane.xlu0 %3376  ;;  %v3269_v36 = vmul.f32 %v4810_v42, %v4802_v5 }
0x1d62   : > { %4811 = vrcp.f32 %v3377_v23  ;;  %v4733_v23 = vld [vmem:[%s5664_s18 + $0x50] sm:$0xff]  }
0x1d63   : > { %v3270_v44 = vpack.c.bf16 %v3269_v36, %v3269_v36 }
0x1d65   : > { %v3161_v38 = vpop.permute.xlu0 %3160 }
0x1d66   : > { %v3166_v39 = vsel %vm946_vm3, %v3161_v38, 0 }
0x1d67   : > { %4590 = vmatpush3.bf16.msra.mxu1 %v3166_v39 }
0x1d68   : > { %4601 = vmatprep.subr.bf16.mxu1 %v4833_v1 }
0x1d69   : > { %v3492_v50 = vpop.permute.xlu0 %3491 }
0x1d6a   : > { %4592 = vmatmul.mubr.msk.bf16.vlgmr.msra.gmra.mrb[80].mxu1 %vm882_vm2, %v3158_v41  ;;  %v3497_v52 = vsel %vm946_vm3, %v3492_v50, 0  ;;  %v4169_v41 = vld [vmem:[%s5660_s14 + $0x1] ss:$0 sm:$0xff]  ;;  %v4738_v50 = vld [vmem:[%s5664_s18 + $0x78] sm:$0xff]  }
0x1d6b   : > { %4602 = vmatpush3.bf16.msra.mxu1 %v3277_v43  ;;  %4603 = vmatprep.mubr.msk.bf16.mxu1 %vm4834_vm0, %v4833_v1  ;;  %v4170_v43 = vld [vmem:[%s5661_s15 + $0x1] ss:$0 sm:$0xff] }
0x1d6c   : > { %4613 = vmatprep.subr.bf16.mxu1 %v4833_v1  ;;  %v4812_v45 = vpop.eup %4811 }
0x1d6d   : > { %v3379_v47 = vmul.f32 %v4812_v45, %v4804_v26 }
0x1d6f   : > { %v3380_v51 = vpack.c.bf16 %v3379_v47, %v3379_v47  ;;  %v4735_v47 = vld [vmem:[%s5664_s18 + $0x60] sm:$0xff]  }
0x1d72   : > { %4604 = vmatmul.mubr.msk.bf16.vlgmr.msra.gmra.mrb[84].mxu1 %vm882_vm2, %v3270_v44 }
0x1d73   : > { %4615 = vmatprep.mubr.msk.bf16.mxu1 %vm4834_vm0, %v4833_v1 }
0x1d8a   : > { %v3487_v46 = vpop.xlane.xlu1 %3486 }
0x1d8b   : > { %4813 = vrcp.f32 %v3487_v46  ;;  %v4734_v46 = vld [vmem:[%s5664_s18 + $0x58] sm:$0xff]  }
0x1d8e   : > { %v3382_v48 = vpop.permute.xlu1 %3381 }
0x1d8f   : > { %v3387_v49 = vsel %vm946_vm3, %v3382_v48, 0  ;;  %v4736_v48 = vld [vmem:[%s5664_s18 + $0x68] sm:$0xff]  }
0x1d90   : > { %4614 = vmatpush3.bf16.msra.mxu1 %v3387_v49  ;;  %v4737_v49 = vld [vmem:[%s5664_s18 + $0x70] sm:$0xff]  }
0x1d91   : > { %4625 = vmatprep.subr.bf16.mxu1 %v4833_v1 }
0x1d93   : > { %4616 = vmatmul.mubr.msk.bf16.vlgmr.msra.gmra.mrb[88].mxu1 %vm882_vm2, %v3380_v51  ;;  %v4176_v51 = vld [vmem:[%s5663_s17 + $0x1] ss:$0 sm:$0xff] }
0x1d94   : > { %4626 = vmatpush3.bf16.msra.mxu1 %v3497_v52  ;;  %4627 = vmatprep.mubr.msk.bf16.mxu1 %vm4834_vm0, %v4833_v1 }
0x1d95   : > { %v4814_v54 = vpop.eup %4813  ;;  %4639 = vmatprep.subr.bf16.mxu1 %v4833_v1 }
0x1d96   : > { %v3489_v55 = vmul.f32 %v4814_v54, %v4806_v32 }
0x1d98   : > { %v3490_v56 = vpack.c.bf16 %v3489_v55, %v3489_v55 }
0x1d9b   : > { %4628 = vmatmul.mubr.msk.bf16.vlgmr.msra.gmra.mrb[92].mxu1 %vm882_vm2, %v3490_v56 }
0x1d9c   : > { %4643 = vmatprep.mubr.msk.bf16.mxu1 %vm4834_vm0, %v4833_v1  ;;  %4640 = vmatpush3.bf16.msra.mxu1 %v4729_v34 }
0x1d9d   : > { %4641 = vmatprep.subr.bf16.mxu1 %v4833_v1 }
0x1da0   : > { %4642 = vmatpush3.bf16.msra.mxu1 %v4730_v35 }
0x1da1   : > { %4667 = vmatprep.subr.bf16.mxu1 %v4833_v1 }
0x1e3d   : > { %v3202_v57 = vpop.f32.mrb[80].mxu1 }
0x1e3e   : > { %v4593_v58 = vpop.f32.mrb[81].mxu1 }
0x1e3f   : > { %v3205_v59 = vpop.f32.mrb[82].mxu1 }
0x1e40   : > { %v4594_v60 = vpop.f32.mrb[83].mxu1 }
0x1e45   : > { %v3313_v61 = vpop.f32.mrb[84].mxu1 }
0x1e46   : > { %3540 = vrot.lane.b32.xlu1 %v3313_v61, %s5753_s0  ;;  %v4605_v62 = vpop.f32.mrb[85].mxu1  ;;  %s5768_s0 = sld [smem:[#allocation20_spill]] }
0x1e47   : > { %v3316_v63 = vpop.f32.mrb[86].mxu1 }
0x1e48   : > { %v4606_v0 = vpop.f32.mrb[87].mxu1 }
0x1e49   : > { %v4197_v0 = vld [vmem:[%s5665_s19 + $0x1] ss:$0 sm:$0xff] }
0x1e66   : > { %v3423_v4 = vpop.f32.mrb[88].mxu1 }
0x1e67   : > { %3544 = vrot.lane.b32.xlu0 %v3423_v4, %s5754_s11  ;;  %v4617_v6 = vpop.f32.mrb[89].mxu1 }
0x1e68   : > { %v3426_v7 = vpop.f32.mrb[90].mxu1 }
0x1e69   : > { %v4618_v8 = vpop.f32.mrb[91].mxu1 }
0x1e6e   : > { %v3533_v53 = vpop.f32.mrb[92].mxu1 }
0x1e6f   : > { %3548 = vrot.lane.b32.xlu1 %v3533_v53, %s5755_s22  ;;  %v4629_v9 = vpop.f32.mrb[93].mxu1  ;;  %s5769_s22 = sld [smem:[#allocation3_spill]] }
0x1e70   : > { %v3536_v10 = vpop.f32.mrb[94].mxu1 }
0x1e71   : > { %v4630_v12 = vpop.f32.mrb[95].mxu1 }
0x1e75   : > { %s803_s29 = scalar_lea.vmem %s5773_s30, %s5769_s22 }
0x1eb8   : > { %v3541_v13 = vpop.permute.xlu1 %3540 }
0x1eb9   : > { %v3551_v11 = vsel %vm882_vm2, %v3202_v57, %v3541_v13 }
0x1ed9   : > { %v3545_v14 = vpop.permute.xlu0 %3544 }
0x1eda   : > { %v3552_v17 = vsel %vm1334_vm4, %v3551_v11, %v3545_v14 }
0x1ee1   : > { %v3549_v18 = vpop.permute.xlu1 %3548 }
0x1ee2   : > { %v3553_v15 = vsel %vm1336_vm5, %v3552_v17, %v3549_v18 }
0x1ee3   : > { %v3561_v19 = vpack.c.bf16 %v3553_v15, %v3553_v15 }
0x1ee5   : > { %4636 = vmatmul.mubr.msk.bf16.vlgmr.msra.gmra.mrb[76].mxu0 %vm832_vm1, %v3561_v19  ;;  %v4208_v19 = vld [vmem:[%s5666_s20 + $0x1] ss:$0 sm:$0xff] }
0x1ee6   : > { %4663 = vmatprep.mubr.msk.bf16.mxu0 %vm4834_vm0, %v4833_v1 }
0x1fb8   : > { %v3617_v21 = vpop.f32.mrb[76].mxu0 }
0x1fb9   : > { %v3618_v22 = vadd.f32 %v4163_v20, %v3617_v21  ;;  %v4637_v5 = vpop.f32.mrb[77].mxu0  ;;  %v4209_v21 = vld [vmem:[%s5667_s21 + $0x1] ss:$0 sm:$0xff] }
0x1fba   : > { %v3620_v25 = vpop.f32.mrb[78].mxu0 }
0x1fbb   : > { %v4638_v16 = vpop.f32.mrb[79].mxu0  ;;  %v3623_v26 = vadd.f32 %v3618_v22, %v5454_v29  ;;  %v4731_v29 = vld [vmem:[%s5664_s18 + $0x40] sm:$0xff]  }
0x1fbc   : > { %4648 = vmatpush3.bf16.msra.mxu0 %v4731_v29 }
0x1fbd   : > { %v3628_v27 = vsel %vm832_vm1, %v3623_v26, 0.0  ;;  %4649 = vmatprep.subr.bf16.mxu0 %v4833_v1 }
0x1fbe   : > { %3629 = vadd.xlane.f32.xlu0 %v3628_v27 }
0x1fc0   : > { %4650 = vmatpush3.bf16.msra.mxu0 %v4732_v24  ;;  %v4210_v24 = vld [vmem:[%s5770_s24] ss:$0 sm:$0xff] }
0x1fc1   : > { %4651 = vmatprep.subr.bf16.mxu0 %v4833_v1 }
0x1fc4   : > { %4652 = vmatpush3.bf16.msra.mxu0 %v4733_v23 }
0x1fc5   : > { %4653 = vmatprep.subr.bf16.mxu0 %v4833_v1 }
0x1fc8   : > { %4654 = vmatpush3.bf16.msra.mxu0 %v4734_v46 }
0x1fc9   : > { %4655 = vmatprep.subr.bf16.mxu0 %v4833_v1 }
0x1fcc   : > { %4656 = vmatpush3.bf16.msra.mxu0 %v4735_v47 }
0x1fcd   : > { %4657 = vmatprep.subr.bf16.mxu0 %v4833_v1 }
0x1fd0   : > { %4658 = vmatpush3.bf16.msra.mxu0 %v4736_v48 }
0x1fd1   : > { %4659 = vmatprep.subr.bf16.mxu0 %v4833_v1 }
0x1fd4   : > { %4660 = vmatpush3.bf16.msra.mxu0 %v4737_v49 }
0x1fd5   : > { %4661 = vmatprep.subr.bf16.mxu0 %v4833_v1 }
0x1fd8   : > { %4662 = vmatpush3.bf16.msra.mxu0 %v4738_v50 }
0x204b   : > { %v3630_v28 = vpop.xlane.xlu0 %3629 }
0x204c   : > { %v3631_v30 = vmul.f32 0.03125, %v3630_v28 }
0x204e   : > { %v3632_v31 = vsub.f32 %v3623_v26, %v3631_v30 }
0x2050   : > { %v3633_v32 = vmul.f32 %v3632_v31, %v3632_v31 }
0x2052   : > { %v3634_v33 = vsel %vm832_vm1, %v3633_v32, 0.0  ;;  %v4740_v32 = vld [vmem:[%s5768_s0 + $0x8] sm:$0xff]  }
0x2053   : > { %3635 = vadd.xlane.f32.xlu1 %v3634_v33 }
0x20e0   : > { %v3636_v37 = vpop.xlane.xlu1 %3635 }
0x20e1   : > { %v3637_v38 = vmul.f32 0.03125, %v3636_v37  ;;  %v4211_v37 = vld [vmem:[%s5771_s1] ss:$0 sm:$0xff] }
0x20e3   : > { %v3638_v39 = vadd.f32 1e-05, %v3637_v38 }
0x20e5   : > { %4815 = vrsqrt.f32 %v3638_v39 }
0x20ef   : > { %v4816_v40 = vpop.eup %4815 }
0x20f0   : > { %v3640_v42 = vmul.f32 %v4816_v40, %v3632_v31  ;;  %v4739_v31 = vld [vmem:[%s5768_s0] sm:$0xff]  }
0x20f2   : > { %v3647_v36 = vmul.f32 %v4169_v41, %v3640_v42 }
0x20f4   : > { %v3654_v44 = vadd.f32 %v4170_v43, %v3647_v36 }
0x20f6   : > { %v3662_v45 = vpack.c.bf16 %v3654_v44, %v3654_v44 }
0x20f8   : > { %4644 = vmatmul.mubr.msk.bf16.vlgmr.msra.gmra.mrb[96].mxu1 %vm832_vm1, %v3662_v45 }
0x20f9   : > { %4671 = vmatprep.mubr.msk.bf16.mxu1 %vm4834_vm0, %v4833_v1  ;;  %4668 = vmatpush3.bf16.msra.mxu1 %v4739_v31 }
0x20fa   : > { %4669 = vmatprep.subr.bf16.mxu1 %v4833_v1  ;;  %v4212_v1 = vld [vmem:[%s5772_s25] ss:$0 sm:$0xff] }
0x20fd   : > { %4670 = vmatpush3.bf16.msra.mxu1 %v4740_v32 }
0x21cb   : > { %v3718_v52 = vpop.f32.mrb[96].mxu1 }
0x21cc   : > { %v3719_v54 = vadd.f32 %v4176_v51, %v3718_v52  ;;  %v4645_v55 = vpop.f32.mrb[97].mxu1 }
0x21cd   : > { %v3721_v56 = vpop.f32.mrb[98].mxu1 }
0x21ce   : > { %v3725_v57 = vmul.f32 0.70710677, %v3719_v54  ;;  %v4646_v58 = vpop.f32.mrb[99].mxu1  ;;  %v3724_v60 = vmul.f32 0.5, %v3719_v54 }
0x21d0   : > { %4817 = verf.f32 %v3725_v57 }
0x21da   : > { %v4818_v59 = vpop.eup %4817 }
0x21db   : > { %v3727_v61 = vadd.f32 1.0, %v4818_v59 }
0x21dd   : > { %v3728_v62 = vmul.f32 %v3727_v61, %v3724_v60 }
0x21df   : > { %v3748_v63 = vpack.c.bf16 %v3728_v62, %v3728_v62 }
0x21e1   : > { %4664 = vmatmul.mubr.bf16.vlgmr.msra.gmra.mrb[80].mxu0 %v3748_v63 }
0x22b4   : > { %v3837_v2 = vpop.f32.mrb[80].mxu0 }
0x22b5   : > { %v3838_v3 = vadd.f32 %v4197_v0, %v3837_v2  ;;  %v4665_v4 = vpop.f32.mrb[81].mxu0 }
0x22b6   : > { %v3840_v6 = vpop.f32.mrb[82].mxu0 }
0x22b7   : > { %v4666_v7 = vpop.f32.mrb[83].mxu0  ;;  %v3843_v8 = vadd.f32 %v3838_v3, %v3654_v44 }
0x22b9   : > { %v3848_v53 = vsel %vm832_vm1, %v3843_v8, 0.0 }
0x22ba   : > { %3849 = vadd.xlane.f32.xlu0 %v3848_v53 }
0x2347   : > { %v3850_v9 = vpop.xlane.xlu0 %3849 }
0x2348   : > { %v3851_v10 = vmul.f32 0.03125, %v3850_v9 }
0x234a   : > { %v3852_v12 = vsub.f32 %v3843_v8, %v3851_v10 }
0x234c   : > { %v3853_v13 = vmul.f32 %v3852_v12, %v3852_v12 }
0x234e   : > { %v3854_v14 = vsel %vm832_vm1, %v3853_v13, 0.0 }
0x234f   : > { %3855 = vadd.xlane.f32.xlu0 %v3854_v14 }
0x23dc   : > { %v3856_v11 = vpop.xlane.xlu0 %3855 }
0x23dd   : > { %v3857_v17 = vmul.f32 0.03125, %v3856_v11 }
0x23df   : > { %v3858_v18 = vadd.f32 1e-05, %v3857_v17 }
0x23e1   : > { %4819 = vrsqrt.f32 %v3858_v18 }
0x23eb   : > { %v4820_v15 = vpop.eup %4819 }
0x23ec   : > { %v3860_v20 = vmul.f32 %v4820_v15, %v3852_v12 }
0x23ee   : > { %v3867_v22 = vmul.f32 %v4208_v19, %v3860_v20 }
0x23f0   : > { %v3874_v5 = vadd.f32 %v4209_v21, %v3867_v22 }
0x23f2   : > { %v3877_v25 = vsel %vm832_vm1, %v3874_v5, 0.0 }
0x23f3   : > { %3878 = vadd.xlane.f32.xlu1 %v3877_v25 }
0x2480   : > { %v3879_v16 = vpop.xlane.xlu1 %3878 }
0x2481   : > { %v3880_v26 = vmul.f32 0.03125, %v3879_v16 }
0x2483   : > { %v3881_v27 = vsub.f32 %v3874_v5, %v3880_v26 }
0x2485   : > { %v3882_v28 = vmul.f32 %v3881_v27, %v3881_v27 }
0x2487   : > { %v3883_v30 = vsel %vm832_vm1, %v3882_v28, 0.0 }
0x2488   : > { %3884 = vadd.xlane.f32.xlu0 %v3883_v30 }
0x2515   : > { %v3885_v33 = vpop.xlane.xlu0 %3884 }
0x2516   : > { %v3886_v34 = vmul.f32 0.03125, %v3885_v33 }
0x2518   : > { %v3887_v35 = vadd.f32 1e-05, %v3886_v34 }
0x251a   : > { %4821 = vrsqrt.f32 %v3887_v35 }
0x2524   : > { %v4822_v29 = vpop.eup %4821 }
0x2525   : > { %v3889_v23 = vmul.f32 %v4822_v29, %v3881_v27 }
0x2527   : > { %v3896_v38 = vmul.f32 %v4210_v24, %v3889_v23 }
0x2529   : > { %v3903_v39 = vadd.f32 %v4211_v37, %v3896_v38 }
0x252b   : > { %v3909_v40 = vpack.c.bf16 %v3903_v39, %v3903_v39 }
0x252d   : > { %4672 = vmatmul.mubr.msk.bf16.vlgmr.msra.gmra.mrb[100].mxu1 %vm832_vm1, %v3909_v40 }
0x2600   : > { %v3965_v41 = vpop.f32.mrb[100].mxu1 }
0x2601   : > { %v3966_v42 = vadd.f32 %v4212_v1, %v3965_v41  ;;  %v4673_v43 = vpop.f32.mrb[101].mxu1 }
0x2602   : > { %v3968_v36 = vpop.f32.mrb[102].mxu1 }
0x2603   : > { %4823 = vtanh.f32 %v3966_v42  ;;  %v4674_v44 = vpop.f32.mrb[103].mxu1 }
0x260d   : > { %v4824_v45 = vpop.eup %4823 }
0x260e   : > { %3973 = vst.msk [vmem:[%s803_s29] sm:$0xff] %vm3972_vm6, %v4824_v45 }
0x260f PF: > { %s5774_s11 = sld [smem:[#allocation2_spill]] }
0x2615   : > { %s36_s27 = sadd.s32 1, %s5774_s11  }
0x2616   : > { %p33_p4 = scmp.ge.s32.totalorder %s36_s27, 4  }
0x2618   :  { %35 = sbr.rel (!%p33_p4) target bundleno = 20 (0x14), region = 177 }

</bundles_post_ra>
